<compile_context>
chip_gen: v7x
topology: tpu7x:2x2x1
jax: 0.10.0
libtpu: 0.0.40
codegen_flags: <defaults>
</compile_context>

<pallas_src>
import numpy as np
import jax
import jax.numpy as jnp
from jax import lax
from jax.experimental import pallas as pl
from jax.experimental.pallas import tpu as pltpu

KSIZE = 7
PAD = KSIZE // 2


def _largest_divisor_leq(n, cap):
    cap = max(1, min(n, cap))
    for d in range(cap, 0, -1):
        if n % d == 0:
            return d
    return 1


def spatial_attention(x, conv_w, conv_b):
    """x: (B, C, H, W) f32; conv_w: (1, 2, 7, 7); conv_b: (1,). Returns (B, 1, H, W)."""
    B, C, H, W = x.shape
    Hp = H + 2 * PAD
    Wpad = ((W + 2 * PAD + 127) // 128) * 128      # lane dim: multiple of 128

    # Batch tile (amortize per-grid-step overhead).
    BB = _largest_divisor_leq(B, 8)
    # Channel tile: keep the double-buffered (BB, CT, H, W) input block bounded.
    slab_bytes = BB * H * W * 4
    ct_cap = max(1, (8 * 2 ** 20) // (2 * slab_bytes))
    CT = _largest_divisor_leq(C, min(ct_cap, 512))

    w_flat = conv_w.reshape(-1).astype(jnp.float32)    # (98,), OIHW-flattened
    b_flat = conv_b.reshape(-1).astype(jnp.float32)    # (1,)

    def kernel(w_ref, b_ref, x_ref, o_ref, max_ref, sum_ref, pad_ref):
        c_step = pl.program_id(1)

        @pl.when(c_step == 0)
        def _init():
            max_ref[...] = jnp.full((BB, H, W), -jnp.inf, dtype=jnp.float32)
            sum_ref[...] = jnp.zeros((BB, H, W), dtype=jnp.float32)

        # Fused single pass over this channel tile: running max + running sum.
        def body(i, carry):
            m, s = carry
            xc = x_ref[:, i]                       # (BB, H, W), one VMEM read per channel
            return jnp.maximum(m, xc), s + xc

        m0 = jnp.full((BB, H, W), -jnp.inf, dtype=jnp.float32)
        s0 = jnp.zeros((BB, H, W), dtype=jnp.float32)
        m, s = lax.fori_loop(0, CT, body, (m0, s0))
        max_ref[...] = jnp.maximum(max_ref[...], m)
        sum_ref[...] = sum_ref[...] + s

        @pl.when(c_step == pl.num_programs(1) - 1)
        def _conv():
            max_map = max_ref[...]
            avg_map = sum_ref[...] * (1.0 / C)     # 1/C is a compile-time constant

            # Zero only the halo; the interior is fully overwritten below.
            zrow = jnp.zeros((2, BB, PAD, Wpad), jnp.float32)
            pad_ref[:, :, 0:PAD, :] = zrow
            pad_ref[:, :, PAD + H:, :] = zrow
            pad_ref[:, :, PAD:PAD + H, 0:PAD] = jnp.zeros((2, BB, H, PAD), jnp.float32)
            pad_ref[:, :, PAD:PAD + H, PAD + W:] = jnp.zeros(
                (2, BB, H, Wpad - PAD - W), jnp.float32)

            pad_ref[0, :, PAD:PAD + H, PAD:PAD + W] = max_map
            pad_ref[1, :, PAD:PAD + H, PAD:PAD + W] = avg_map

            acc = jnp.full((BB, H, Wpad), b_ref[0], dtype=jnp.float32)
            for m_ch in range(2):                      # 0: max map, 1: avg map
                pm = pad_ref[m_ch]                     # (BB, Hp, Wpad)
                # 7 lane-shifted copies (kj direction) via XLU rolls.
                shifted = [pm]
                for kj in range(1, KSIZE):
                    shifted.append(pltpu.roll(pm, shift=Wpad - kj, axis=2))
                base = m_ch * KSIZE * KSIZE
                for ki in range(KSIZE):
                    r = shifted[0] * w_ref[base + ki * KSIZE]
                    for kj in range(1, KSIZE):
                        r = r + shifted[kj] * w_ref[base + ki * KSIZE + kj]
                    acc = acc + r[:, ki:ki + H, :]     # sublane-shifted row add

            o_ref[...] = jax.nn.sigmoid(acc[:, :, 0:W])

    # VMEM budget: double-buffered x + output blocks, plus scratch, plus headroom.
    xblk = BB * CT * H * W * 4
    scratch_bytes = 4 * (2 * BB * H * W + 2 * BB * Hp * Wpad)
    est = 2 * xblk + 2 * BB * H * W * 4 + scratch_bytes + (4 << 20)
    vmem_limit = int(min(64 * 2 ** 20, max(32 * 2 ** 20, est)))

    out = pl.pallas_call(
        kernel,
        out_shape=jax.ShapeDtypeStruct((B, H, W), jnp.float32),
        grid=(B // BB, C // CT),                       # reduction (C) axis last
        in_specs=[
            pl.BlockSpec(memory_space=pltpu.MemorySpace.SMEM),           # conv weights (98,)
            pl.BlockSpec(memory_space=pltpu.MemorySpace.SMEM),           # conv bias (1,)
            pl.BlockSpec((BB, CT, H, W), lambda b, c: (b, c, 0, 0)),     # x
        ],
        out_specs=pl.BlockSpec((BB, H, W), lambda b, c: (b, 0, 0)),
        scratch_shapes=[
            pltpu.VMEM((BB, H, W), jnp.float32),        # running channel-max
            pltpu.VMEM((BB, H, W), jnp.float32),        # running channel-sum
            pltpu.VMEM((2, BB, Hp, Wpad), jnp.float32), # zero-padded conv staging
        ],
        compiler_params=pltpu.CompilerParams(
            dimension_semantics=("parallel", "arbitrary"),
            vmem_limit_bytes=vmem_limit,
        ),
    )(w_flat, b_flat, x)

    return out.reshape(B, 1, H, W)


def _reference(x, conv_w, conv_b):
    max_map = jnp.max(x, axis=1, keepdims=True)
    avg_map = jnp.mean(x, axis=1, keepdims=True)
    stacked = jnp.concatenate([max_map, avg_map], axis=1)   # (B, 2, H, W)
    out = lax.conv_general_dilated(
        stacked, conv_w, window_strides=(1, 1), padding=((PAD, PAD), (PAD, PAD)),
        dimension_numbers=("NCHW", "OIHW", "NCHW"))
    out = out + conv_b.reshape(1, 1, 1, 1)
    return jax.nn.sigmoid(out)


if __name__ == "__main__":
    key = jax.random.PRNGKey(0)
    kx, kw, kb = jax.random.split(key, 3)

    B, C, H, W = 2, 4, 16, 16
    x = jax.random.normal(kx, (B, C, H, W), dtype=jnp.float32)

    # Deterministic parameter init (Conv2d(2, 1, 7) shapes; uniform fan-in scale).
    fan_in = 2 * KSIZE * KSIZE
    bound = 1.0 / np.sqrt(fan_in)
    conv_w = jax.random.uniform(kw, (1, 2, KSIZE, KSIZE), jnp.float32, -bound, bound)
    conv_b = jax.random.uniform(kb, (1,), jnp.float32, -bound, bound)

    out = jax.block_until_ready(spatial_attention(x, conv_w, conv_b))
    ref = jax.block_until_ready(_reference(x, conv_w, conv_b))

    np.testing.assert_allclose(np.asarray(out), np.asarray(ref), rtol=1e-5, atol=1e-5)
    print("KERNEL_OK")
</pallas_src>

<mosaic_0001>
module attributes {stable_mosaic.version = 11 : i64} {
  func.func @kernel(%arg0: i32, %arg1: i32, %arg2: memref<98xf32, #tpu.memory_space<smem>>, %arg3: memref<1xf32, #tpu.memory_space<smem>>, %arg4: memref<2x4x16x16xf32, #tpu.memory_space<vmem>>, %arg5: memref<2x16x16xf32, #tpu.memory_space<vmem>>, %arg6: memref<2x16x16xf32, #tpu.memory_space<vmem>>, %arg7: memref<2x16x16xf32, #tpu.memory_space<vmem>>, %arg8: memref<2x2x22x128xf32, #tpu.memory_space<vmem>>) attributes {dimension_semantics = [#tpu.dimension_semantics<parallel>, #tpu.dimension_semantics<arbitrary>], iteration_bounds = array<i64: 1, 1>, scalar_prefetch = 0 : i64, scratch_operands = 3 : i64, tpu.core_type = #tpu.core_type<tc>, window_params = [{transform_indices = @transform_0, window_bounds = array<i64: 98>}, {transform_indices = @transform_1, window_bounds = array<i64: 1>}, {transform_indices = @transform_2, window_bounds = array<i64: 2, 4, 16, 16>}, {transform_indices = @transform_3, window_bounds = array<i64: 2, 16, 16>}]} {
    %c0_i32 = arith.constant 0 : i32
    %0 = arith.cmpi eq, %arg1, %c0_i32 : i32
    %1 = arith.extui %0 : i1 to i32
    %c0_i32_0 = arith.constant 0 : i32
    %2 = arith.cmpi ne, %1, %c0_i32_0 : i32
    scf.if %2 {
      %cst_17 = arith.constant 0xFF800000 : f32
      %16 = vector.broadcast %cst_17 : f32 to vector<2x16x16xf32>
      %c0_18 = arith.constant 0 : index
      %c0_19 = arith.constant 0 : index
      %c0_20 = arith.constant 0 : index
      %17 = vector.load %arg6[%c0_18, %c0_19, %c0_20] : memref<2x16x16xf32, #tpu.memory_space<vmem>>, vector<2x16x16xf32>
      tpu.vector_store %arg6[%c0_18, %c0_19, %c0_20], %16 {strides = array<i32>} : memref<2x16x16xf32, #tpu.memory_space<vmem>>, vector<2x16x16xf32>,
      %cst_21 = arith.constant 0.000000e+00 : f32
      %18 = vector.broadcast %cst_21 : f32 to vector<2x16x16xf32>
      %c0_22 = arith.constant 0 : index
      %c0_23 = arith.constant 0 : index
      %c0_24 = arith.constant 0 : index
      %19 = vector.load %arg7[%c0_22, %c0_23, %c0_24] : memref<2x16x16xf32, #tpu.memory_space<vmem>>, vector<2x16x16xf32>
      tpu.vector_store %arg7[%c0_22, %c0_23, %c0_24], %18 {strides = array<i32>} : memref<2x16x16xf32, #tpu.memory_space<vmem>>, vector<2x16x16xf32>,
    } else {
    }
    %cst = arith.constant 0xFF800000 : f32
    %3 = vector.broadcast %cst : f32 to vector<2x16x16xf32>
    %cst_1 = arith.constant 0.000000e+00 : f32
    %4 = vector.broadcast %cst_1 : f32 to vector<2x16x16xf32>
    %c0_i32_2 = arith.constant 0 : i32
    %c4_i32 = arith.constant 4 : i32
    %5 = arith.addi %c0_i32_2, %c4_i32 : i32
    %c1_i32 = arith.constant 1 : i32
    %6:2 = scf.for %arg9 = %c0_i32_2 to %5 step %c1_i32 iter_args(%arg10 = %3, %arg11 = %4) -> (vector<2x16x16xf32>, vector<2x16x16xf32>)  : i32 {
      %c0_17 = arith.constant 0 : index
      %16 = arith.index_cast %arg9 : i32 to index
      %c0_18 = arith.constant 0 : index
      %c0_19 = arith.constant 0 : index
      %17 = vector.load %arg4[%c0_17, %16, %c0_18, %c0_19] : memref<2x4x16x16xf32, #tpu.memory_space<vmem>>, vector<2x1x16x16xf32>
      %18 = vector.shape_cast %17 : vector<2x1x16x16xf32> to vector<2x16x16xf32>
      %19 = arith.maximumf %arg10, %18 : vector<2x16x16xf32>
      %20 = arith.addf %arg11, %18 : vector<2x16x16xf32>
      scf.yield %19, %20 : vector<2x16x16xf32>, vector<2x16x16xf32>
    }
    %c4_i32_3 = arith.constant 4 : i32
    %c0 = arith.constant 0 : index
    %c0_4 = arith.constant 0 : index
    %c0_5 = arith.constant 0 : index
    %7 = vector.load %arg6[%c0, %c0_4, %c0_5] : memref<2x16x16xf32, #tpu.memory_space<vmem>>, vector<2x16x16xf32>
    %8 = arith.maximumf %7, %6#0 : vector<2x16x16xf32>
    %c0_6 = arith.constant 0 : index
    %c0_7 = arith.constant 0 : index
    %c0_8 = arith.constant 0 : index
    %9 = vector.load %arg6[%c0_6, %c0_7, %c0_8] : memref<2x16x16xf32, #tpu.memory_space<vmem>>, vector<2x16x16xf32>
    tpu.vector_store %arg6[%c0_6, %c0_7, %c0_8], %8 {strides = array<i32>} : memref<2x16x16xf32, #tpu.memory_space<vmem>>, vector<2x16x16xf32>,
    %c0_9 = arith.constant 0 : index
    %c0_10 = arith.constant 0 : index
    %c0_11 = arith.constant 0 : index
    %10 = vector.load %arg7[%c0_9, %c0_10, %c0_11] : memref<2x16x16xf32, #tpu.memory_space<vmem>>, vector<2x16x16xf32>
    %11 = arith.addf %10, %6#1 : vector<2x16x16xf32>
    %c0_12 = arith.constant 0 : index
    %c0_13 = arith.constant 0 : index
    %c0_14 = arith.constant 0 : index
    %12 = vector.load %arg7[%c0_12, %c0_13, %c0_14] : memref<2x16x16xf32, #tpu.memory_space<vmem>>, vector<2x16x16xf32>
    tpu.vector_store %arg7[%c0_12, %c0_13, %c0_14], %11 {strides = array<i32>} : memref<2x16x16xf32, #tpu.memory_space<vmem>>, vector<2x16x16xf32>,
    %c0_i32_15 = arith.constant 0 : i32
    %13 = arith.cmpi eq, %arg1, %c0_i32_15 : i32
    %14 = arith.extui %13 : i1 to i32
    %c0_i32_16 = arith.constant 0 : i32
    %15 = arith.cmpi ne, %14, %c0_i32_16 : i32
    scf.if %15 {
      %c0_17 = arith.constant 0 : index
      %c0_18 = arith.constant 0 : index
      %c0_19 = arith.constant 0 : index
      %16 = vector.load %arg6[%c0_17, %c0_18, %c0_19] : memref<2x16x16xf32, #tpu.memory_space<vmem>>, vector<2x16x16xf32>
      %c0_20 = arith.constant 0 : index
      %c0_21 = arith.constant 0 : index
      %c0_22 = arith.constant 0 : index
      %17 = vector.load %arg7[%c0_20, %c0_21, %c0_22] : memref<2x16x16xf32, #tpu.memory_space<vmem>>, vector<2x16x16xf32>
      %cst_23 = arith.constant 2.500000e-01 : f32
      %18 = vector.broadcast %cst_23 : f32 to vector<2x16x16xf32>
      %19 = arith.mulf %17, %18 : vector<2x16x16xf32>
      %cst_24 = arith.constant 0.000000e+00 : f32
      %20 = vector.broadcast %cst_24 : f32 to vector<2x2x3x128xf32>
      %c0_25 = arith.constant 0 : index
      %c0_26 = arith.constant 0 : index
      %c0_27 = arith.constant 0 : index
      %c0_28 = arith.constant 0 : index
      %21 = vector.load %arg8[%c0_25, %c0_26, %c0_27, %c0_28] : memref<2x2x22x128xf32, #tpu.memory_space<vmem>>, vector<2x2x3x128xf32>
      tpu.vector_store %arg8[%c0_25, %c0_26, %c0_27, %c0_28], %20 {strides = array<i32>} : memref<2x2x22x128xf32, #tpu.memory_space<vmem>>, vector<2x2x3x128xf32>,
      %c0_29 = arith.constant 0 : index
      %c0_30 = arith.constant 0 : index
      %c19 = arith.constant 19 : index
      %c0_31 = arith.constant 0 : index
      %22 = vector.load %arg8[%c0_29, %c0_30, %c19, %c0_31] : memref<2x2x22x128xf32, #tpu.memory_space<vmem>>, vector<2x2x3x128xf32>
      tpu.vector_store %arg8[%c0_29, %c0_30, %c19, %c0_31], %20 {strides = array<i32>} : memref<2x2x22x128xf32, #tpu.memory_space<vmem>>, vector<2x2x3x128xf32>,
      %cst_32 = arith.constant 0.000000e+00 : f32
      %23 = vector.broadcast %cst_32 : f32 to vector<2x2x16x3xf32>
      %c0_33 = arith.constant 0 : index
      %c0_34 = arith.constant 0 : index
      %c3 = arith.constant 3 : index
      %c0_35 = arith.constant 0 : index
      %24 = vector.load %arg8[%c0_33, %c0_34, %c3, %c0_35] : memref<2x2x22x128xf32, #tpu.memory_space<vmem>>, vector<2x2x16x3xf32>
      tpu.vector_store %arg8[%c0_33, %c0_34, %c3, %c0_35], %23 {strides = array<i32>} : memref<2x2x22x128xf32, #tpu.memory_space<vmem>>, vector<2x2x16x3xf32>,
      %cst_36 = arith.constant 0.000000e+00 : f32
      %25 = vector.broadcast %cst_36 : f32 to vector<2x2x16x109xf32>
      %c0_37 = arith.constant 0 : index
      %c0_38 = arith.constant 0 : index
      %c3_39 = arith.constant 3 : index
      %c19_40 = arith.constant 19 : index
      %26 = vector.load %arg8[%c0_37, %c0_38, %c3_39, %c19_40] : memref<2x2x22x128xf32, #tpu.memory_space<vmem>>, vector<2x2x16x109xf32>
      tpu.vector_store %arg8[%c0_37, %c0_38, %c3_39, %c19_40], %25 {strides = array<i32>} : memref<2x2x22x128xf32, #tpu.memory_space<vmem>>, vector<2x2x16x109xf32>,
      %c0_41 = arith.constant 0 : index
      %c0_42 = arith.constant 0 : index
      %c3_43 = arith.constant 3 : index
      %c3_44 = arith.constant 3 : index
      %27 = vector.load %arg8[%c0_41, %c0_42, %c3_43, %c3_44] : memref<2x2x22x128xf32, #tpu.memory_space<vmem>>, vector<1x2x16x16xf32>
      %28 = vector.shape_cast %27 : vector<1x2x16x16xf32> to vector<2x16x16xf32>
      %29 = vector.shape_cast %16 : vector<2x16x16xf32> to vector<1x2x16x16xf32>
      tpu.vector_store %arg8[%c0_41, %c0_42, %c3_43, %c3_44], %29 {strides = array<i32>} : memref<2x2x22x128xf32, #tpu.memory_space<vmem>>, vector<1x2x16x16xf32>,
      %c1 = arith.constant 1 : index
      %c0_45 = arith.constant 0 : index
      %c3_46 = arith.constant 3 : index
      %c3_47 = arith.constant 3 : index
      %30 = vector.load %arg8[%c1, %c0_45, %c3_46, %c3_47] : memref<2x2x22x128xf32, #tpu.memory_space<vmem>>, vector<1x2x16x16xf32>
      %31 = vector.shape_cast %30 : vector<1x2x16x16xf32> to vector<2x16x16xf32>
      %32 = vector.shape_cast %19 : vector<2x16x16xf32> to vector<1x2x16x16xf32>
      tpu.vector_store %arg8[%c1, %c0_45, %c3_46, %c3_47], %32 {strides = array<i32>} : memref<2x2x22x128xf32, #tpu.memory_space<vmem>>, vector<1x2x16x16xf32>,
      %c0_48 = arith.constant 0 : index
      %33 = memref.load %arg3[%c0_48] : memref<1xf32, #tpu.memory_space<smem>>
      %34 = vector.broadcast %33 : f32 to vector<2x16x128xf32>
      %c0_49 = arith.constant 0 : index
      %c0_50 = arith.constant 0 : index
      %c0_51 = arith.constant 0 : index
      %c0_52 = arith.constant 0 : index
      %35 = vector.load %arg8[%c0_49, %c0_50, %c0_51, %c0_52] : memref<2x2x22x128xf32, #tpu.memory_space<vmem>>, vector<1x2x22x128xf32>
      %36 = vector.shape_cast %35 : vector<1x2x22x128xf32> to vector<2x22x128xf32>
      %c127_i32 = arith.constant 127 : i32
      %37 = tpu.dynamic_rotate %36 by %c127_i32 dim 2 : vector<2x22x128xf32>, i32 -> vector<2x22x128xf32>
      %c126_i32 = arith.constant 126 : i32
      %38 = tpu.dynamic_rotate %36 by %c126_i32 dim 2 : vector<2x22x128xf32>, i32 -> vector<2x22x128xf32>
      %c125_i32 = arith.constant 125 : i32
      %39 = tpu.dynamic_rotate %36 by %c125_i32 dim 2 : vector<2x22x128xf32>, i32 -> vector<2x22x128xf32>
      %c124_i32 = arith.constant 124 : i32
      %40 = tpu.dynamic_rotate %36 by %c124_i32 dim 2 : vector<2x22x128xf32>, i32 -> vector<2x22x128xf32>
      %c123_i32 = arith.constant 123 : i32
      %41 = tpu.dynamic_rotate %36 by %c123_i32 dim 2 : vector<2x22x128xf32>, i32 -> vector<2x22x128xf32>
      %c122_i32 = arith.constant 122 : i32
      %42 = tpu.dynamic_rotate %36 by %c122_i32 dim 2 : vector<2x22x128xf32>, i32 -> vector<2x22x128xf32>
      %c0_53 = arith.constant 0 : index
      %43 = memref.load %arg2[%c0_53] : memref<98xf32, #tpu.memory_space<smem>>
      %44 = vector.broadcast %43 : f32 to vector<2x22x128xf32>
      %45 = arith.mulf %36, %44 : vector<2x22x128xf32>
      %c1_54 = arith.constant 1 : index
      %46 = memref.load %arg2[%c1_54] : memref<98xf32, #tpu.memory_space<smem>>
      %47 = vector.broadcast %46 : f32 to vector<2x22x128xf32>
      %48 = arith.mulf %37, %47 : vector<2x22x128xf32>
      %49 = arith.addf %45, %48 : vector<2x22x128xf32>
      %c2 = arith.constant 2 : index
      %50 = memref.load %arg2[%c2] : memref<98xf32, #tpu.memory_space<smem>>
      %51 = vector.broadcast %50 : f32 to vector<2x22x128xf32>
      %52 = arith.mulf %38, %51 : vector<2x22x128xf32>
      %53 = arith.addf %49, %52 : vector<2x22x128xf32>
      %c3_55 = arith.constant 3 : index
      %54 = memref.load %arg2[%c3_55] : memref<98xf32, #tpu.memory_space<smem>>
      %55 = vector.broadcast %54 : f32 to vector<2x22x128xf32>
      %56 = arith.mulf %39, %55 : vector<2x22x128xf32>
      %57 = arith.addf %53, %56 : vector<2x22x128xf32>
      %c4 = arith.constant 4 : index
      %58 = memref.load %arg2[%c4] : memref<98xf32, #tpu.memory_space<smem>>
      %59 = vector.broadcast %58 : f32 to vector<2x22x128xf32>
      %60 = arith.mulf %40, %59 : vector<2x22x128xf32>
      %61 = arith.addf %57, %60 : vector<2x22x128xf32>
      %c5 = arith.constant 5 : index
      %62 = memref.load %arg2[%c5] : memref<98xf32, #tpu.memory_space<smem>>
      %63 = vector.broadcast %62 : f32 to vector<2x22x128xf32>
      %64 = arith.mulf %41, %63 : vector<2x22x128xf32>
      %65 = arith.addf %61, %64 : vector<2x22x128xf32>
      %c6 = arith.constant 6 : index
      %66 = memref.load %arg2[%c6] : memref<98xf32, #tpu.memory_space<smem>>
      %67 = vector.broadcast %66 : f32 to vector<2x22x128xf32>
      %68 = arith.mulf %42, %67 : vector<2x22x128xf32>
      %69 = arith.addf %65, %68 : vector<2x22x128xf32>
      %70 = vector.extract_strided_slice %69 {offsets = [0, 0, 0], sizes = [2, 16, 128], strides = [1, 1, 1]} : vector<2x22x128xf32> to vector<2x16x128xf32>
      %71 = arith.addf %34, %70 : vector<2x16x128xf32>
      %c7 = arith.constant 7 : index
      %72 = memref.load %arg2[%c7] : memref<98xf32, #tpu.memory_space<smem>>
      %73 = vector.broadcast %72 : f32 to vector<2x22x128xf32>
      %74 = arith.mulf %36, %73 : vector<2x22x128xf32>
      %c8 = arith.constant 8 : index
      %75 = memref.load %arg2[%c8] : memref<98xf32, #tpu.memory_space<smem>>
      %76 = vector.broadcast %75 : f32 to vector<2x22x128xf32>
      %77 = arith.mulf %37, %76 : vector<2x22x128xf32>
      %78 = arith.addf %74, %77 : vector<2x22x128xf32>
      %c9 = arith.constant 9 : index
      %79 = memref.load %arg2[%c9] : memref<98xf32, #tpu.memory_space<smem>>
      %80 = vector.broadcast %79 : f32 to vector<2x22x128xf32>
      %81 = arith.mulf %38, %80 : vector<2x22x128xf32>
      %82 = arith.addf %78, %81 : vector<2x22x128xf32>
      %c10 = arith.constant 10 : index
      %83 = memref.load %arg2[%c10] : memref<98xf32, #tpu.memory_space<smem>>
      %84 = vector.broadcast %83 : f32 to vector<2x22x128xf32>
      %85 = arith.mulf %39, %84 : vector<2x22x128xf32>
      %86 = arith.addf %82, %85 : vector<2x22x128xf32>
      %c11 = arith.constant 11 : index
      %87 = memref.load %arg2[%c11] : memref<98xf32, #tpu.memory_space<smem>>
      %88 = vector.broadcast %87 : f32 to vector<2x22x128xf32>
      %89 = arith.mulf %40, %88 : vector<2x22x128xf32>
      %90 = arith.addf %86, %89 : vector<2x22x128xf32>
      %c12 = arith.constant 12 : index
      %91 = memref.load %arg2[%c12] : memref<98xf32, #tpu.memory_space<smem>>
      %92 = vector.broadcast %91 : f32 to vector<2x22x128xf32>
      %93 = arith.mulf %41, %92 : vector<2x22x128xf32>
      %94 = arith.addf %90, %93 : vector<2x22x128xf32>
      %c13 = arith.constant 13 : index
      %95 = memref.load %arg2[%c13] : memref<98xf32, #tpu.memory_space<smem>>
      %96 = vector.broadcast %95 : f32 to vector<2x22x128xf32>
      %97 = arith.mulf %42, %96 : vector<2x22x128xf32>
      %98 = arith.addf %94, %97 : vector<2x22x128xf32>
      %99 = vector.extract_strided_slice %98 {offsets = [0, 1, 0], sizes = [2, 16, 128], strides = [1, 1, 1]} : vector<2x22x128xf32> to vector<2x16x128xf32>
      %100 = arith.addf %71, %99 : vector<2x16x128xf32>
      %c14 = arith.constant 14 : index
      %101 = memref.load %arg2[%c14] : memref<98xf32, #tpu.memory_space<smem>>
      %102 = vector.broadcast %101 : f32 to vector<2x22x128xf32>
      %103 = arith.mulf %36, %102 : vector<2x22x128xf32>
      %c15 = arith.constant 15 : index
      %104 = memref.load %arg2[%c15] : memref<98xf32, #tpu.memory_space<smem>>
      %105 = vector.broadcast %104 : f32 to vector<2x22x128xf32>
      %106 = arith.mulf %37, %105 : vector<2x22x128xf32>
      %107 = arith.addf %103, %106 : vector<2x22x128xf32>
      %c16 = arith.constant 16 : index
      %108 = memref.load %arg2[%c16] : memref<98xf32, #tpu.memory_space<smem>>
      %109 = vector.broadcast %108 : f32 to vector<2x22x128xf32>
      %110 = arith.mulf %38, %109 : vector<2x22x128xf32>
      %111 = arith.addf %107, %110 : vector<2x22x128xf32>
      %c17 = arith.constant 17 : index
      %112 = memref.load %arg2[%c17] : memref<98xf32, #tpu.memory_space<smem>>
      %113 = vector.broadcast %112 : f32 to vector<2x22x128xf32>
      %114 = arith.mulf %39, %113 : vector<2x22x128xf32>
      %115 = arith.addf %111, %114 : vector<2x22x128xf32>
      %c18 = arith.constant 18 : index
      %116 = memref.load %arg2[%c18] : memref<98xf32, #tpu.memory_space<smem>>
      %117 = vector.broadcast %116 : f32 to vector<2x22x128xf32>
      %118 = arith.mulf %40, %117 : vector<2x22x128xf32>
      %119 = arith.addf %115, %118 : vector<2x22x128xf32>
      %c19_56 = arith.constant 19 : index
      %120 = memref.load %arg2[%c19_56] : memref<98xf32, #tpu.memory_space<smem>>
      %121 = vector.broadcast %120 : f32 to vector<2x22x128xf32>
      %122 = arith.mulf %41, %121 : vector<2x22x128xf32>
      %123 = arith.addf %119, %122 : vector<2x22x128xf32>
      %c20 = arith.constant 20 : index
      %124 = memref.load %arg2[%c20] : memref<98xf32, #tpu.memory_space<smem>>
      %125 = vector.broadcast %124 : f32 to vector<2x22x128xf32>
      %126 = arith.mulf %42, %125 : vector<2x22x128xf32>
      %127 = arith.addf %123, %126 : vector<2x22x128xf32>
      %128 = vector.extract_strided_slice %127 {offsets = [0, 2, 0], sizes = [2, 16, 128], strides = [1, 1, 1]} : vector<2x22x128xf32> to vector<2x16x128xf32>
      %129 = arith.addf %100, %128 : vector<2x16x128xf32>
      %c21 = arith.constant 21 : index
      %130 = memref.load %arg2[%c21] : memref<98xf32, #tpu.memory_space<smem>>
      %131 = vector.broadcast %130 : f32 to vector<2x22x128xf32>
      %132 = arith.mulf %36, %131 : vector<2x22x128xf32>
      %c22 = arith.constant 22 : index
      %133 = memref.load %arg2[%c22] : memref<98xf32, #tpu.memory_space<smem>>
      %134 = vector.broadcast %133 : f32 to vector<2x22x128xf32>
      %135 = arith.mulf %37, %134 : vector<2x22x128xf32>
      %136 = arith.addf %132, %135 : vector<2x22x128xf32>
      %c23 = arith.constant 23 : index
      %137 = memref.load %arg2[%c23] : memref<98xf32, #tpu.memory_space<smem>>
      %138 = vector.broadcast %137 : f32 to vector<2x22x128xf32>
      %139 = arith.mulf %38, %138 : vector<2x22x128xf32>
      %140 = arith.addf %136, %139 : vector<2x22x128xf32>
      %c24 = arith.constant 24 : index
      %141 = memref.load %arg2[%c24] : memref<98xf32, #tpu.memory_space<smem>>
      %142 = vector.broadcast %141 : f32 to vector<2x22x128xf32>
      %143 = arith.mulf %39, %142 : vector<2x22x128xf32>
      %144 = arith.addf %140, %143 : vector<2x22x128xf32>
      %c25 = arith.constant 25 : index
      %145 = memref.load %arg2[%c25] : memref<98xf32, #tpu.memory_space<smem>>
      %146 = vector.broadcast %145 : f32 to vector<2x22x128xf32>
      %147 = arith.mulf %40, %146 : vector<2x22x128xf32>
      %148 = arith.addf %144, %147 : vector<2x22x128xf32>
      %c26 = arith.constant 26 : index
      %149 = memref.load %arg2[%c26] : memref<98xf32, #tpu.memory_space<smem>>
      %150 = vector.broadcast %149 : f32 to vector<2x22x128xf32>
      %151 = arith.mulf %41, %150 : vector<2x22x128xf32>
      %152 = arith.addf %148, %151 : vector<2x22x128xf32>
      %c27 = arith.constant 27 : index
      %153 = memref.load %arg2[%c27] : memref<98xf32, #tpu.memory_space<smem>>
      %154 = vector.broadcast %153 : f32 to vector<2x22x128xf32>
      %155 = arith.mulf %42, %154 : vector<2x22x128xf32>
      %156 = arith.addf %152, %155 : vector<2x22x128xf32>
      %157 = vector.extract_strided_slice %156 {offsets = [0, 3, 0], sizes = [2, 16, 128], strides = [1, 1, 1]} : vector<2x22x128xf32> to vector<2x16x128xf32>
      %158 = arith.addf %129, %157 : vector<2x16x128xf32>
      %c28 = arith.constant 28 : index
      %159 = memref.load %arg2[%c28] : memref<98xf32, #tpu.memory_space<smem>>
      %160 = vector.broadcast %159 : f32 to vector<2x22x128xf32>
      %161 = arith.mulf %36, %160 : vector<2x22x128xf32>
      %c29 = arith.constant 29 : index
      %162 = memref.load %arg2[%c29] : memref<98xf32, #tpu.memory_space<smem>>
      %163 = vector.broadcast %162 : f32 to vector<2x22x128xf32>
      %164 = arith.mulf %37, %163 : vector<2x22x128xf32>
      %165 = arith.addf %161, %164 : vector<2x22x128xf32>
      %c30 = arith.constant 30 : index
      %166 = memref.load %arg2[%c30] : memref<98xf32, #tpu.memory_space<smem>>
      %167 = vector.broadcast %166 : f32 to vector<2x22x128xf32>
      %168 = arith.mulf %38, %167 : vector<2x22x128xf32>
      %169 = arith.addf %165, %168 : vector<2x22x128xf32>
      %c31 = arith.constant 31 : index
      %170 = memref.load %arg2[%c31] : memref<98xf32, #tpu.memory_space<smem>>
      %171 = vector.broadcast %170 : f32 to vector<2x22x128xf32>
      %172 = arith.mulf %39, %171 : vector<2x22x128xf32>
      %173 = arith.addf %169, %172 : vector<2x22x128xf32>
      %c32 = arith.constant 32 : index
      %174 = memref.load %arg2[%c32] : memref<98xf32, #tpu.memory_space<smem>>
      %175 = vector.broadcast %174 : f32 to vector<2x22x128xf32>
      %176 = arith.mulf %40, %175 : vector<2x22x128xf32>
      %177 = arith.addf %173, %176 : vector<2x22x128xf32>
      %c33 = arith.constant 33 : index
      %178 = memref.load %arg2[%c33] : memref<98xf32, #tpu.memory_space<smem>>
      %179 = vector.broadcast %178 : f32 to vector<2x22x128xf32>
      %180 = arith.mulf %41, %179 : vector<2x22x128xf32>
      %181 = arith.addf %177, %180 : vector<2x22x128xf32>
      %c34 = arith.constant 34 : index
      %182 = memref.load %arg2[%c34] : memref<98xf32, #tpu.memory_space<smem>>
      %183 = vector.broadcast %182 : f32 to vector<2x22x128xf32>
      %184 = arith.mulf %42, %183 : vector<2x22x128xf32>
      %185 = arith.addf %181, %184 : vector<2x22x128xf32>
      %186 = vector.extract_strided_slice %185 {offsets = [0, 4, 0], sizes = [2, 16, 128], strides = [1, 1, 1]} : vector<2x22x128xf32> to vector<2x16x128xf32>
      %187 = arith.addf %158, %186 : vector<2x16x128xf32>
      %c35 = arith.constant 35 : index
      %188 = memref.load %arg2[%c35] : memref<98xf32, #tpu.memory_space<smem>>
      %189 = vector.broadcast %188 : f32 to vector<2x22x128xf32>
      %190 = arith.mulf %36, %189 : vector<2x22x128xf32>
      %c36 = arith.constant 36 : index
      %191 = memref.load %arg2[%c36] : memref<98xf32, #tpu.memory_space<smem>>
      %192 = vector.broadcast %191 : f32 to vector<2x22x128xf32>
      %193 = arith.mulf %37, %192 : vector<2x22x128xf32>
      %194 = arith.addf %190, %193 : vector<2x22x128xf32>
      %c37 = arith.constant 37 : index
      %195 = memref.load %arg2[%c37] : memref<98xf32, #tpu.memory_space<smem>>
      %196 = vector.broadcast %195 : f32 to vector<2x22x128xf32>
      %197 = arith.mulf %38, %196 : vector<2x22x128xf32>
      %198 = arith.addf %194, %197 : vector<2x22x128xf32>
      %c38 = arith.constant 38 : index
      %199 = memref.load %arg2[%c38] : memref<98xf32, #tpu.memory_space<smem>>
      %200 = vector.broadcast %199 : f32 to vector<2x22x128xf32>
      %201 = arith.mulf %39, %200 : vector<2x22x128xf32>
      %202 = arith.addf %198, %201 : vector<2x22x128xf32>
      %c39 = arith.constant 39 : index
      %203 = memref.load %arg2[%c39] : memref<98xf32, #tpu.memory_space<smem>>
      %204 = vector.broadcast %203 : f32 to vector<2x22x128xf32>
      %205 = arith.mulf %40, %204 : vector<2x22x128xf32>
      %206 = arith.addf %202, %205 : vector<2x22x128xf32>
      %c40 = arith.constant 40 : index
      %207 = memref.load %arg2[%c40] : memref<98xf32, #tpu.memory_space<smem>>
      %208 = vector.broadcast %207 : f32 to vector<2x22x128xf32>
      %209 = arith.mulf %41, %208 : vector<2x22x128xf32>
      %210 = arith.addf %206, %209 : vector<2x22x128xf32>
      %c41 = arith.constant 41 : index
      %211 = memref.load %arg2[%c41] : memref<98xf32, #tpu.memory_space<smem>>
      %212 = vector.broadcast %211 : f32 to vector<2x22x128xf32>
      %213 = arith.mulf %42, %212 : vector<2x22x128xf32>
      %214 = arith.addf %210, %213 : vector<2x22x128xf32>
      %215 = vector.extract_strided_slice %214 {offsets = [0, 5, 0], sizes = [2, 16, 128], strides = [1, 1, 1]} : vector<2x22x128xf32> to vector<2x16x128xf32>
      %216 = arith.addf %187, %215 : vector<2x16x128xf32>
      %c42 = arith.constant 42 : index
      %217 = memref.load %arg2[%c42] : memref<98xf32, #tpu.memory_space<smem>>
      %218 = vector.broadcast %217 : f32 to vector<2x22x128xf32>
      %219 = arith.mulf %36, %218 : vector<2x22x128xf32>
      %c43 = arith.constant 43 : index
      %220 = memref.load %arg2[%c43] : memref<98xf32, #tpu.memory_space<smem>>
      %221 = vector.broadcast %220 : f32 to vector<2x22x128xf32>
      %222 = arith.mulf %37, %221 : vector<2x22x128xf32>
      %223 = arith.addf %219, %222 : vector<2x22x128xf32>
      %c44 = arith.constant 44 : index
      %224 = memref.load %arg2[%c44] : memref<98xf32, #tpu.memory_space<smem>>
      %225 = vector.broadcast %224 : f32 to vector<2x22x128xf32>
      %226 = arith.mulf %38, %225 : vector<2x22x128xf32>
      %227 = arith.addf %223, %226 : vector<2x22x128xf32>
      %c45 = arith.constant 45 : index
      %228 = memref.load %arg2[%c45] : memref<98xf32, #tpu.memory_space<smem>>
      %229 = vector.broadcast %228 : f32 to vector<2x22x128xf32>
      %230 = arith.mulf %39, %229 : vector<2x22x128xf32>
      %231 = arith.addf %227, %230 : vector<2x22x128xf32>
      %c46 = arith.constant 46 : index
      %232 = memref.load %arg2[%c46] : memref<98xf32, #tpu.memory_space<smem>>
      %233 = vector.broadcast %232 : f32 to vector<2x22x128xf32>
      %234 = arith.mulf %40, %233 : vector<2x22x128xf32>
      %235 = arith.addf %231, %234 : vector<2x22x128xf32>
      %c47 = arith.constant 47 : index
      %236 = memref.load %arg2[%c47] : memref<98xf32, #tpu.memory_space<smem>>
      %237 = vector.broadcast %236 : f32 to vector<2x22x128xf32>
      %238 = arith.mulf %41, %237 : vector<2x22x128xf32>
      %239 = arith.addf %235, %238 : vector<2x22x128xf32>
      %c48 = arith.constant 48 : index
      %240 = memref.load %arg2[%c48] : memref<98xf32, #tpu.memory_space<smem>>
      %241 = vector.broadcast %240 : f32 to vector<2x22x128xf32>
      %242 = arith.mulf %42, %241 : vector<2x22x128xf32>
      %243 = arith.addf %239, %242 : vector<2x22x128xf32>
      %244 = vector.extract_strided_slice %243 {offsets = [0, 6, 0], sizes = [2, 16, 128], strides = [1, 1, 1]} : vector<2x22x128xf32> to vector<2x16x128xf32>
      %245 = arith.addf %216, %244 : vector<2x16x128xf32>
      %c1_57 = arith.constant 1 : index
      %c0_58 = arith.constant 0 : index
      %c0_59 = arith.constant 0 : index
      %c0_60 = arith.constant 0 : index
      %246 = vector.load %arg8[%c1_57, %c0_58, %c0_59, %c0_60] : memref<2x2x22x128xf32, #tpu.memory_space<vmem>>, vector<1x2x22x128xf32>
      %247 = vector.shape_cast %246 : vector<1x2x22x128xf32> to vector<2x22x128xf32>
      %c127_i32_61 = arith.constant 127 : i32
      %248 = tpu.dynamic_rotate %247 by %c127_i32_61 dim 2 : vector<2x22x128xf32>, i32 -> vector<2x22x128xf32>
      %c126_i32_62 = arith.constant 126 : i32
      %249 = tpu.dynamic_rotate %247 by %c126_i32_62 dim 2 : vector<2x22x128xf32>, i32 -> vector<2x22x128xf32>
      %c125_i32_63 = arith.constant 125 : i32
      %250 = tpu.dynamic_rotate %247 by %c125_i32_63 dim 2 : vector<2x22x128xf32>, i32 -> vector<2x22x128xf32>
      %c124_i32_64 = arith.constant 124 : i32
      %251 = tpu.dynamic_rotate %247 by %c124_i32_64 dim 2 : vector<2x22x128xf32>, i32 -> vector<2x22x128xf32>
      %c123_i32_65 = arith.constant 123 : i32
      %252 = tpu.dynamic_rotate %247 by %c123_i32_65 dim 2 : vector<2x22x128xf32>, i32 -> vector<2x22x128xf32>
      %c122_i32_66 = arith.constant 122 : i32
      %253 = tpu.dynamic_rotate %247 by %c122_i32_66 dim 2 : vector<2x22x128xf32>, i32 -> vector<2x22x128xf32>
      %c49 = arith.constant 49 : index
      %254 = memref.load %arg2[%c49] : memref<98xf32, #tpu.memory_space<smem>>
      %255 = vector.broadcast %254 : f32 to vector<2x22x128xf32>
      %256 = arith.mulf %247, %255 : vector<2x22x128xf32>
      %c50 = arith.constant 50 : index
      %257 = memref.load %arg2[%c50] : memref<98xf32, #tpu.memory_space<smem>>
      %258 = vector.broadcast %257 : f32 to vector<2x22x128xf32>
      %259 = arith.mulf %248, %258 : vector<2x22x128xf32>
      %260 = arith.addf %256, %259 : vector<2x22x128xf32>
      %c51 = arith.constant 51 : index
      %261 = memref.load %arg2[%c51] : memref<98xf32, #tpu.memory_space<smem>>
      %262 = vector.broadcast %261 : f32 to vector<2x22x128xf32>
      %263 = arith.mulf %249, %262 : vector<2x22x128xf32>
      %264 = arith.addf %260, %263 : vector<2x22x128xf32>
      %c52 = arith.constant 52 : index
      %265 = memref.load %arg2[%c52] : memref<98xf32, #tpu.memory_space<smem>>
      %266 = vector.broadcast %265 : f32 to vector<2x22x128xf32>
      %267 = arith.mulf %250, %266 : vector<2x22x128xf32>
      %268 = arith.addf %264, %267 : vector<2x22x128xf32>
      %c53 = arith.constant 53 : index
      %269 = memref.load %arg2[%c53] : memref<98xf32, #tpu.memory_space<smem>>
      %270 = vector.broadcast %269 : f32 to vector<2x22x128xf32>
      %271 = arith.mulf %251, %270 : vector<2x22x128xf32>
      %272 = arith.addf %268, %271 : vector<2x22x128xf32>
      %c54 = arith.constant 54 : index
      %273 = memref.load %arg2[%c54] : memref<98xf32, #tpu.memory_space<smem>>
      %274 = vector.broadcast %273 : f32 to vector<2x22x128xf32>
      %275 = arith.mulf %252, %274 : vector<2x22x128xf32>
      %276 = arith.addf %272, %275 : vector<2x22x128xf32>
      %c55 = arith.constant 55 : index
      %277 = memref.load %arg2[%c55] : memref<98xf32, #tpu.memory_space<smem>>
      %278 = vector.broadcast %277 : f32 to vector<2x22x128xf32>
      %279 = arith.mulf %253, %278 : vector<2x22x128xf32>
      %280 = arith.addf %276, %279 : vector<2x22x128xf32>
      %281 = vector.extract_strided_slice %280 {offsets = [0, 0, 0], sizes = [2, 16, 128], strides = [1, 1, 1]} : vector<2x22x128xf32> to vector<2x16x128xf32>
      %282 = arith.addf %245, %281 : vector<2x16x128xf32>
      %c56 = arith.constant 56 : index
      %283 = memref.load %arg2[%c56] : memref<98xf32, #tpu.memory_space<smem>>
      %284 = vector.broadcast %283 : f32 to vector<2x22x128xf32>
      %285 = arith.mulf %247, %284 : vector<2x22x128xf32>
      %c57 = arith.constant 57 : index
      %286 = memref.load %arg2[%c57] : memref<98xf32, #tpu.memory_space<smem>>
      %287 = vector.broadcast %286 : f32 to vector<2x22x128xf32>
      %288 = arith.mulf %248, %287 : vector<2x22x128xf32>
      %289 = arith.addf %285, %288 : vector<2x22x128xf32>
      %c58 = arith.constant 58 : index
      %290 = memref.load %arg2[%c58] : memref<98xf32, #tpu.memory_space<smem>>
      %291 = vector.broadcast %290 : f32 to vector<2x22x128xf32>
      %292 = arith.mulf %249, %291 : vector<2x22x128xf32>
      %293 = arith.addf %289, %292 : vector<2x22x128xf32>
      %c59 = arith.constant 59 : index
      %294 = memref.load %arg2[%c59] : memref<98xf32, #tpu.memory_space<smem>>
      %295 = vector.broadcast %294 : f32 to vector<2x22x128xf32>
      %296 = arith.mulf %250, %295 : vector<2x22x128xf32>
      %297 = arith.addf %293, %296 : vector<2x22x128xf32>
      %c60 = arith.constant 60 : index
      %298 = memref.load %arg2[%c60] : memref<98xf32, #tpu.memory_space<smem>>
      %299 = vector.broadcast %298 : f32 to vector<2x22x128xf32>
      %300 = arith.mulf %251, %299 : vector<2x22x128xf32>
      %301 = arith.addf %297, %300 : vector<2x22x128xf32>
      %c61 = arith.constant 61 : index
      %302 = memref.load %arg2[%c61] : memref<98xf32, #tpu.memory_space<smem>>
      %303 = vector.broadcast %302 : f32 to vector<2x22x128xf32>
      %304 = arith.mulf %252, %303 : vector<2x22x128xf32>
      %305 = arith.addf %301, %304 : vector<2x22x128xf32>
      %c62 = arith.constant 62 : index
      %306 = memref.load %arg2[%c62] : memref<98xf32, #tpu.memory_space<smem>>
      %307 = vector.broadcast %306 : f32 to vector<2x22x128xf32>
      %308 = arith.mulf %253, %307 : vector<2x22x128xf32>
      %309 = arith.addf %305, %308 : vector<2x22x128xf32>
      %310 = vector.extract_strided_slice %309 {offsets = [0, 1, 0], sizes = [2, 16, 128], strides = [1, 1, 1]} : vector<2x22x128xf32> to vector<2x16x128xf32>
      %311 = arith.addf %282, %310 : vector<2x16x128xf32>
      %c63 = arith.constant 63 : index
      %312 = memref.load %arg2[%c63] : memref<98xf32, #tpu.memory_space<smem>>
      %313 = vector.broadcast %312 : f32 to vector<2x22x128xf32>
      %314 = arith.mulf %247, %313 : vector<2x22x128xf32>
      %c64 = arith.constant 64 : index
      %315 = memref.load %arg2[%c64] : memref<98xf32, #tpu.memory_space<smem>>
      %316 = vector.broadcast %315 : f32 to vector<2x22x128xf32>
      %317 = arith.mulf %248, %316 : vector<2x22x128xf32>
      %318 = arith.addf %314, %317 : vector<2x22x128xf32>
      %c65 = arith.constant 65 : index
      %319 = memref.load %arg2[%c65] : memref<98xf32, #tpu.memory_space<smem>>
      %320 = vector.broadcast %319 : f32 to vector<2x22x128xf32>
      %321 = arith.mulf %249, %320 : vector<2x22x128xf32>
      %322 = arith.addf %318, %321 : vector<2x22x128xf32>
      %c66 = arith.constant 66 : index
      %323 = memref.load %arg2[%c66] : memref<98xf32, #tpu.memory_space<smem>>
      %324 = vector.broadcast %323 : f32 to vector<2x22x128xf32>
      %325 = arith.mulf %250, %324 : vector<2x22x128xf32>
      %326 = arith.addf %322, %325 : vector<2x22x128xf32>
      %c67 = arith.constant 67 : index
      %327 = memref.load %arg2[%c67] : memref<98xf32, #tpu.memory_space<smem>>
      %328 = vector.broadcast %327 : f32 to vector<2x22x128xf32>
      %329 = arith.mulf %251, %328 : vector<2x22x128xf32>
      %330 = arith.addf %326, %329 : vector<2x22x128xf32>
      %c68 = arith.constant 68 : index
      %331 = memref.load %arg2[%c68] : memref<98xf32, #tpu.memory_space<smem>>
      %332 = vector.broadcast %331 : f32 to vector<2x22x128xf32>
      %333 = arith.mulf %252, %332 : vector<2x22x128xf32>
      %334 = arith.addf %330, %333 : vector<2x22x128xf32>
      %c69 = arith.constant 69 : index
      %335 = memref.load %arg2[%c69] : memref<98xf32, #tpu.memory_space<smem>>
      %336 = vector.broadcast %335 : f32 to vector<2x22x128xf32>
      %337 = arith.mulf %253, %336 : vector<2x22x128xf32>
      %338 = arith.addf %334, %337 : vector<2x22x128xf32>
      %339 = vector.extract_strided_slice %338 {offsets = [0, 2, 0], sizes = [2, 16, 128], strides = [1, 1, 1]} : vector<2x22x128xf32> to vector<2x16x128xf32>
      %340 = arith.addf %311, %339 : vector<2x16x128xf32>
      %c70 = arith.constant 70 : index
      %341 = memref.load %arg2[%c70] : memref<98xf32, #tpu.memory_space<smem>>
      %342 = vector.broadcast %341 : f32 to vector<2x22x128xf32>
      %343 = arith.mulf %247, %342 : vector<2x22x128xf32>
      %c71 = arith.constant 71 : index
      %344 = memref.load %arg2[%c71] : memref<98xf32, #tpu.memory_space<smem>>
      %345 = vector.broadcast %344 : f32 to vector<2x22x128xf32>
      %346 = arith.mulf %248, %345 : vector<2x22x128xf32>
      %347 = arith.addf %343, %346 : vector<2x22x128xf32>
      %c72 = arith.constant 72 : index
      %348 = memref.load %arg2[%c72] : memref<98xf32, #tpu.memory_space<smem>>
      %349 = vector.broadcast %348 : f32 to vector<2x22x128xf32>
      %350 = arith.mulf %249, %349 : vector<2x22x128xf32>
      %351 = arith.addf %347, %350 : vector<2x22x128xf32>
      %c73 = arith.constant 73 : index
      %352 = memref.load %arg2[%c73] : memref<98xf32, #tpu.memory_space<smem>>
      %353 = vector.broadcast %352 : f32 to vector<2x22x128xf32>
      %354 = arith.mulf %250, %353 : vector<2x22x128xf32>
      %355 = arith.addf %351, %354 : vector<2x22x128xf32>
      %c74 = arith.constant 74 : index
      %356 = memref.load %arg2[%c74] : memref<98xf32, #tpu.memory_space<smem>>
      %357 = vector.broadcast %356 : f32 to vector<2x22x128xf32>
      %358 = arith.mulf %251, %357 : vector<2x22x128xf32>
      %359 = arith.addf %355, %358 : vector<2x22x128xf32>
      %c75 = arith.constant 75 : index
      %360 = memref.load %arg2[%c75] : memref<98xf32, #tpu.memory_space<smem>>
      %361 = vector.broadcast %360 : f32 to vector<2x22x128xf32>
      %362 = arith.mulf %252, %361 : vector<2x22x128xf32>
      %363 = arith.addf %359, %362 : vector<2x22x128xf32>
      %c76 = arith.constant 76 : index
      %364 = memref.load %arg2[%c76] : memref<98xf32, #tpu.memory_space<smem>>
      %365 = vector.broadcast %364 : f32 to vector<2x22x128xf32>
      %366 = arith.mulf %253, %365 : vector<2x22x128xf32>
      %367 = arith.addf %363, %366 : vector<2x22x128xf32>
      %368 = vector.extract_strided_slice %367 {offsets = [0, 3, 0], sizes = [2, 16, 128], strides = [1, 1, 1]} : vector<2x22x128xf32> to vector<2x16x128xf32>
      %369 = arith.addf %340, %368 : vector<2x16x128xf32>
      %c77 = arith.constant 77 : index
      %370 = memref.load %arg2[%c77] : memref<98xf32, #tpu.memory_space<smem>>
      %371 = vector.broadcast %370 : f32 to vector<2x22x128xf32>
      %372 = arith.mulf %247, %371 : vector<2x22x128xf32>
      %c78 = arith.constant 78 : index
      %373 = memref.load %arg2[%c78] : memref<98xf32, #tpu.memory_space<smem>>
      %374 = vector.broadcast %373 : f32 to vector<2x22x128xf32>
      %375 = arith.mulf %248, %374 : vector<2x22x128xf32>
      %376 = arith.addf %372, %375 : vector<2x22x128xf32>
      %c79 = arith.constant 79 : index
      %377 = memref.load %arg2[%c79] : memref<98xf32, #tpu.memory_space<smem>>
      %378 = vector.broadcast %377 : f32 to vector<2x22x128xf32>
      %379 = arith.mulf %249, %378 : vector<2x22x128xf32>
      %380 = arith.addf %376, %379 : vector<2x22x128xf32>
      %c80 = arith.constant 80 : index
      %381 = memref.load %arg2[%c80] : memref<98xf32, #tpu.memory_space<smem>>
      %382 = vector.broadcast %381 : f32 to vector<2x22x128xf32>
      %383 = arith.mulf %250, %382 : vector<2x22x128xf32>
      %384 = arith.addf %380, %383 : vector<2x22x128xf32>
      %c81 = arith.constant 81 : index
      %385 = memref.load %arg2[%c81] : memref<98xf32, #tpu.memory_space<smem>>
      %386 = vector.broadcast %385 : f32 to vector<2x22x128xf32>
      %387 = arith.mulf %251, %386 : vector<2x22x128xf32>
      %388 = arith.addf %384, %387 : vector<2x22x128xf32>
      %c82 = arith.constant 82 : index
      %389 = memref.load %arg2[%c82] : memref<98xf32, #tpu.memory_space<smem>>
      %390 = vector.broadcast %389 : f32 to vector<2x22x128xf32>
      %391 = arith.mulf %252, %390 : vector<2x22x128xf32>
      %392 = arith.addf %388, %391 : vector<2x22x128xf32>
      %c83 = arith.constant 83 : index
      %393 = memref.load %arg2[%c83] : memref<98xf32, #tpu.memory_space<smem>>
      %394 = vector.broadcast %393 : f32 to vector<2x22x128xf32>
      %395 = arith.mulf %253, %394 : vector<2x22x128xf32>
      %396 = arith.addf %392, %395 : vector<2x22x128xf32>
      %397 = vector.extract_strided_slice %396 {offsets = [0, 4, 0], sizes = [2, 16, 128], strides = [1, 1, 1]} : vector<2x22x128xf32> to vector<2x16x128xf32>
      %398 = arith.addf %369, %397 : vector<2x16x128xf32>
      %c84 = arith.constant 84 : index
      %399 = memref.load %arg2[%c84] : memref<98xf32, #tpu.memory_space<smem>>
      %400 = vector.broadcast %399 : f32 to vector<2x22x128xf32>
      %401 = arith.mulf %247, %400 : vector<2x22x128xf32>
      %c85 = arith.constant 85 : index
      %402 = memref.load %arg2[%c85] : memref<98xf32, #tpu.memory_space<smem>>
      %403 = vector.broadcast %402 : f32 to vector<2x22x128xf32>
      %404 = arith.mulf %248, %403 : vector<2x22x128xf32>
      %405 = arith.addf %401, %404 : vector<2x22x128xf32>
      %c86 = arith.constant 86 : index
      %406 = memref.load %arg2[%c86] : memref<98xf32, #tpu.memory_space<smem>>
      %407 = vector.broadcast %406 : f32 to vector<2x22x128xf32>
      %408 = arith.mulf %249, %407 : vector<2x22x128xf32>
      %409 = arith.addf %405, %408 : vector<2x22x128xf32>
      %c87 = arith.constant 87 : index
      %410 = memref.load %arg2[%c87] : memref<98xf32, #tpu.memory_space<smem>>
      %411 = vector.broadcast %410 : f32 to vector<2x22x128xf32>
      %412 = arith.mulf %250, %411 : vector<2x22x128xf32>
      %413 = arith.addf %409, %412 : vector<2x22x128xf32>
      %c88 = arith.constant 88 : index
      %414 = memref.load %arg2[%c88] : memref<98xf32, #tpu.memory_space<smem>>
      %415 = vector.broadcast %414 : f32 to vector<2x22x128xf32>
      %416 = arith.mulf %251, %415 : vector<2x22x128xf32>
      %417 = arith.addf %413, %416 : vector<2x22x128xf32>
      %c89 = arith.constant 89 : index
      %418 = memref.load %arg2[%c89] : memref<98xf32, #tpu.memory_space<smem>>
      %419 = vector.broadcast %418 : f32 to vector<2x22x128xf32>
      %420 = arith.mulf %252, %419 : vector<2x22x128xf32>
      %421 = arith.addf %417, %420 : vector<2x22x128xf32>
      %c90 = arith.constant 90 : index
      %422 = memref.load %arg2[%c90] : memref<98xf32, #tpu.memory_space<smem>>
      %423 = vector.broadcast %422 : f32 to vector<2x22x128xf32>
      %424 = arith.mulf %253, %423 : vector<2x22x128xf32>
      %425 = arith.addf %421, %424 : vector<2x22x128xf32>
      %426 = vector.extract_strided_slice %425 {offsets = [0, 5, 0], sizes = [2, 16, 128], strides = [1, 1, 1]} : vector<2x22x128xf32> to vector<2x16x128xf32>
      %427 = arith.addf %398, %426 : vector<2x16x128xf32>
      %c91 = arith.constant 91 : index
      %428 = memref.load %arg2[%c91] : memref<98xf32, #tpu.memory_space<smem>>
      %429 = vector.broadcast %428 : f32 to vector<2x22x128xf32>
      %430 = arith.mulf %247, %429 : vector<2x22x128xf32>
      %c92 = arith.constant 92 : index
      %431 = memref.load %arg2[%c92] : memref<98xf32, #tpu.memory_space<smem>>
      %432 = vector.broadcast %431 : f32 to vector<2x22x128xf32>
      %433 = arith.mulf %248, %432 : vector<2x22x128xf32>
      %434 = arith.addf %430, %433 : vector<2x22x128xf32>
      %c93 = arith.constant 93 : index
      %435 = memref.load %arg2[%c93] : memref<98xf32, #tpu.memory_space<smem>>
      %436 = vector.broadcast %435 : f32 to vector<2x22x128xf32>
      %437 = arith.mulf %249, %436 : vector<2x22x128xf32>
      %438 = arith.addf %434, %437 : vector<2x22x128xf32>
      %c94 = arith.constant 94 : index
      %439 = memref.load %arg2[%c94] : memref<98xf32, #tpu.memory_space<smem>>
      %440 = vector.broadcast %439 : f32 to vector<2x22x128xf32>
      %441 = arith.mulf %250, %440 : vector<2x22x128xf32>
      %442 = arith.addf %438, %441 : vector<2x22x128xf32>
      %c95 = arith.constant 95 : index
      %443 = memref.load %arg2[%c95] : memref<98xf32, #tpu.memory_space<smem>>
      %444 = vector.broadcast %443 : f32 to vector<2x22x128xf32>
      %445 = arith.mulf %251, %444 : vector<2x22x128xf32>
      %446 = arith.addf %442, %445 : vector<2x22x128xf32>
      %c96 = arith.constant 96 : index
      %447 = memref.load %arg2[%c96] : memref<98xf32, #tpu.memory_space<smem>>
      %448 = vector.broadcast %447 : f32 to vector<2x22x128xf32>
      %449 = arith.mulf %252, %448 : vector<2x22x128xf32>
      %450 = arith.addf %446, %449 : vector<2x22x128xf32>
      %c97 = arith.constant 97 : index
      %451 = memref.load %arg2[%c97] : memref<98xf32, #tpu.memory_space<smem>>
      %452 = vector.broadcast %451 : f32 to vector<2x22x128xf32>
      %453 = arith.mulf %253, %452 : vector<2x22x128xf32>
      %454 = arith.addf %450, %453 : vector<2x22x128xf32>
      %455 = vector.extract_strided_slice %454 {offsets = [0, 6, 0], sizes = [2, 16, 128], strides = [1, 1, 1]} : vector<2x22x128xf32> to vector<2x16x128xf32>
      %456 = arith.addf %427, %455 : vector<2x16x128xf32>
      %457 = vector.extract_strided_slice %456 {offsets = [0, 0, 0], sizes = [2, 16, 16], strides = [1, 1, 1]} : vector<2x16x128xf32> to vector<2x16x16xf32>
      %458 = arith.negf %457 : vector<2x16x16xf32>
      %459 = math.exp %458 : vector<2x16x16xf32>
      %cst_67 = arith.constant 1.000000e+00 : f32
      %460 = vector.broadcast %cst_67 : f32 to vector<2x16x16xf32>
      %461 = arith.addf %460, %459 : vector<2x16x16xf32>
      %462 = arith.divf %460, %461 : vector<2x16x16xf32>
      %c0_68 = arith.constant 0 : index
      %c0_69 = arith.constant 0 : index
      %c0_70 = arith.constant 0 : index
      %463 = vector.load %arg5[%c0_68, %c0_69, %c0_70] : memref<2x16x16xf32, #tpu.memory_space<vmem>>, vector<2x16x16xf32>
      tpu.vector_store %arg5[%c0_68, %c0_69, %c0_70], %462 {strides = array<i32>} : memref<2x16x16xf32, #tpu.memory_space<vmem>>, vector<2x16x16xf32>,
    } else {
    }
    return
  }
  func.func @transform_0(%arg0: i32, %arg1: i32) -> i32 {
    %c0_i32 = arith.constant 0 : i32
    %c0_i32_0 = arith.constant 0 : i32
    return %c0_i32 : i32
  }
  func.func @transform_1(%arg0: i32, %arg1: i32) -> i32 {
    %c0_i32 = arith.constant 0 : i32
    %c0_i32_0 = arith.constant 0 : i32
    return %c0_i32 : i32
  }
  func.func @transform_2(%arg0: i32, %arg1: i32) -> (i32, i32, i32, i32) {
    %c0_i32 = arith.constant 0 : i32
    %c0_i32_0 = arith.constant 0 : i32
    %c0_i32_1 = arith.constant 0 : i32
    return %arg0, %arg1, %c0_i32, %c0_i32_0 : i32, i32, i32, i32
  }
  func.func @transform_3(%arg0: i32, %arg1: i32) -> (i32, i32, i32) {
    %c0_i32 = arith.constant 0 : i32
    %c0_i32_0 = arith.constant 0 : i32
    %c0_i32_1 = arith.constant 0 : i32
    return %arg0, %c0_i32, %c0_i32_0 : i32, i32, i32
  }
}

</mosaic_0001>

<bundles_post_ra>
// kernel: tpu_custom_call.1
= control target key start
LH: loop header
LB: loop body
LE: loop exit
PB: predicated region body
PF: predicated region fallthrough
CT: control target
= control target key end

     0   :  { %s5366_s0 = inlined_call_operand.vmem [shape: f32[98], index: 0, kind: input, shape index: {}]   ;;  %s5367_s1 = inlined_call_operand.<no memory space> [shape: f32[1], index: 1, kind: input, shape index: {}]   ;;  %s5368_s2 = inlined_call_operand.hbm [shape: f32[2,4,16,16], index: 2, kind: input, shape index: {}]   ;;  %s5369_s3 = inlined_call_operand.hbm [shape: f32[2,16,16], index: 3, kind: output, shape index: {}]  }
   0x1   :  { %8 = sst [smem:[#allocation5]] %s5367_s1 }
   0x2   :  { %9 = vsyncpa [#allocation9], 0 }
   0x3   :  { %10 = vsyncpa [#allocation7], 0 }
   0x4   :  { %11 = vsyncpa [#allocation8], 0  ;;  %s18_s16 = sshll.u32 %s5366_s0, 4  ;;  %s19_s16 = int_to_ptr.vmem [resolvable:$true] %s18_s16 }
   0x5   :  { %s2170_s17 = scalar_lea.vmem %s19_s16, 16  ;;  %p2175_p1 = scmp.lt.s32.totalorder %s19_s16, %s19_s16 }
   0x6   :  { %p2171_p0 = scmp.ne.s32.totalorder %s19_s16, %s2170_s17  ;;  %p2176_p2 = scmp.lt.s32.totalorder %s2170_s17, %s2170_s17 }
   0x8   :  { %p2177_p3 = por %p2176_p2, %p2175_p1 }
   0xa   :  { %p2178_p4 = pnand %p2177_p3, %p2171_p0 }
   0xc   :  { %2181 = shalt.err (!%p2178_p4)
}
   0xd   :  { %s2304_s18 = smov [#allocation6]   ;;  %s2305_s19 = smov [#allocation10]  }
   0xe   :  { %21 = dma.vmem_to_smem %s19_s16, 16, %s2304_s18, [#allocation9]  }
   0xf   :  { %s29_s20 = sshll.u32 %s2305_s19, 4  ;;  %s2182_s22 = scalar_lea.hbm %s5368_s2, 2048  ;;  %s30_s20 = int_to_ptr.vmem [resolvable:$true] %s29_s20 }
  0x10   :  { %p2183_p5 = scmp.ne.s32.totalorder %s5368_s2, %s2182_s22  ;;  %p2186_p6 = scmp.lt.u32.totalorder %s2182_s22, %s5368_s2 }
  0x12   :  { %p2188_p7 = pnand %p2186_p6, %p2183_p5 }
  0x14   :  { %2191 = shalt.err (!%p2188_p7)
}
  0x15   :  { %s2192_s26 = scalar_lea.vmem %s30_s20, 2048  ;;  %p2197_p9 = scmp.lt.s32.totalorder %s30_s20, %s30_s20 }
  0x16   :  { %p2193_p8 = scmp.ne.s32.totalorder %s30_s20, %s2192_s26  ;;  %p2198_p10 = scmp.lt.s32.totalorder %s2192_s26, %s2192_s26 }
  0x18   :  { %p2199_p11 = por %p2198_p10, %p2197_p9 }
  0x1a   :  { %p2200_p12 = pnand %p2199_p11, %p2193_p8 }
  0x1c   :  { %2203 = shalt.err (!%p2200_p12)
}
  0x1d   :  { %s2306_s27 = smov 128   ;;  %s2307_s28 = smov 8  }
  0x1e   :  { %35 = dma.hbm_to_vmem [thread:$0]  %s5368_s2, 2048, %s30_s20, [#allocation7], %s2306_s27, %s2306_s27, %s2307_s28  }
  0x1f   :  { %2262 = dma.done.wait [#allocation9], 16  }
  0x20   :  { %2263 = vsyncadd [#allocation9], 4294967280 }
  0x21   :  { %2264 = dma.done.wait [#allocation7], 2048  }
  0x22   :  { %2265 = vsyncadd [#allocation7], 4294965248 }
  0x23   :  { %42 = sfence }
  0x24   :  { %vm47_vm0 = vcmask 130048   ;;  %v2308_v0 = vmov -inf   ;;  %v2309_v1 = vmov 0.0   ;;  %v2268_v2 = vmov 0.0   ;;  %s2371_s2 = smov 0  }
  0x25   :  { %48 = vst.msk [vmem:[#allocation2] sm:$0xff] %vm47_vm0, %v2308_v0  ;;  %49 = vst.msk [vmem:[#allocation2 + $0x8] sm:$0xff] %vm47_vm0, %v2308_v0  ;;  %v2272_v3 = vmov 0.0   ;;  %v2276_v4 = vmov 0.0   ;;  %v2280_v5 = vmov 0.0   ;;  %v2284_v6 = vmov -inf  }
  0x26   :  { %50 = vst.msk [vmem:[#allocation2 + $0x10] sm:$0xff] %vm47_vm0, %v2308_v0  ;;  %51 = vst.msk [vmem:[#allocation2 + $0x18] sm:$0xff] %vm47_vm0, %v2308_v0  ;;  %v2288_v7 = vmov -inf   ;;  %v2292_v8 = vmov -inf   ;;  %v2296_v9 = vmov -inf  }
  0x27   :  { %52 = vst.msk [vmem:[#allocation3] sm:$0xff] %vm47_vm0, %v2309_v1  ;;  %53 = vst.msk [vmem:[#allocation3 + $0x8] sm:$0xff] %vm47_vm0, %v2309_v1 }
  0x28   :  { %54 = vst.msk [vmem:[#allocation3 + $0x10] sm:$0xff] %vm47_vm0, %v2309_v1  ;;  %55 = vst.msk [vmem:[#allocation3 + $0x18] sm:$0xff] %vm47_vm0, %v2309_v1 }
  0x29 LB: > { %s1965_s4 = sshll.u32 %s2302_s2, 4  ;;  %s61_s2 = sadd.s32 1, %s2302_s2   ;;  %s2302_s2 = sphi %s2371_s2, %s61_s2   ;;  %v2298_v9 = vphi %v2296_v9, %v2297_v9   ;;  %v2294_v8 = vphi %v2292_v8, %v2293_v8   ;;  %v2290_v7 = vphi %v2288_v7, %v2289_v7   ;;  %v2286_v6 = vphi %v2284_v6, %v2285_v6   ;;  %v2282_v5 = vphi %v2280_v5, %v2281_v5   ;;  %v2278_v4 = vphi %v2276_v4, %v2277_v4   ;;  %v2274_v3 = vphi %v2272_v3, %v2273_v3   ;;  %v2270_v2 = vphi %v2268_v2, %v2269_v2  }
  0x2a   : > { %s71_s5 = scalar_lea.vmem [#allocation10], %s1965_s4  ;;  %p58_p13 = scmp.ge.s32.totalorder %s61_s2, 4  }
  0x2b   : > { %v72_v10 = vld [vmem:[%s71_s5] sm:$0xff]  ;;  %v73_v11 = vld [vmem:[%s71_s5 + $0x8] sm:$0xff]  ;;  %124 = vst [vmem:[#allocation4] sm:$0x7] (%p58_p13), %v2309_v1  ;;  %vm132_vm1 = vcmask (%p58_p13), 23552   ;;  %vm141_vm2 = vcmask (%p58_p13), 1047704  }
  0x2c   : > { %v74_v12 = vld [vmem:[%s71_s5 + $0x40] sm:$0xff]  ;;  %v75_v13 = vld [vmem:[%s71_s5 + $0x48] sm:$0xff]  ;;  %v76_v14 = vmax.f32 %v2298_v9, %v72_v10   ;;  %v77_v15 = vmax.f32 %v2294_v8, %v73_v11   ;;  %v80_v17 = vadd.f32 %v2282_v5, %v72_v10   ;;  %v81_v19 = vadd.f32 %v2278_v4, %v73_v11   ;;  %60 = sbr.rel (!%p58_p13) target bundleno = 41 (0x29), region = 57  ;;  %125 = vst [vmem:[#allocation4 + $0x18] sm:$0x7] (%p58_p13), %v2309_v1  ;;  %s2310_s6 = smov (%p58_p13), 3  }
  0x2d   : > { %v78_v16 = vmax.f32 %v2290_v7, %v74_v12   ;;  %v79_v18 = vmax.f32 %v2286_v6, %v75_v13   ;;  %v82_v20 = vadd.f32 %v2274_v3, %v74_v12   ;;  %v83_v21 = vadd.f32 %v2270_v2, %v75_v13   ;;  %v84_v22 = vld [vmem:[#allocation2] sm:$0xff] (%p58_p13)  ;;  %v86_v23 = vld [vmem:[#allocation2 + $0x10] sm:$0xff] (%p58_p13)  ;;  %v85_v24 = vld [vmem:[#allocation2 + $0x8] sm:$0xff] (%p58_p13)  ;;  %128 = vst [vmem:[#allocation4 + $0x13] sm:$0x7] (%p58_p13), %v2309_v1  ;;  %s2311_s7 = smov (%p58_p13), 127  }
  0x2e   : > { %v2277_v4 = vmov %v81_v19   ;;  %v2281_v5 = vmov %v80_v17   ;;  %v2293_v8 = vmov %v77_v15   ;;  %v2297_v9 = vmov %v76_v14   ;;  %129 = vst [vmem:[#allocation4 + $0x2b] sm:$0x7] (%p58_p13), %v2309_v1  ;;  %126 = vst [vmem:[#allocation4 + $0x30] sm:$0x7] (%p58_p13), %v2309_v1  ;;  %v87_v28 = vld [vmem:[#allocation2 + $0x18] sm:$0xff] (%p58_p13)  ;;  %v97_v29 = vld [vmem:[#allocation3] sm:$0xff] (%p58_p13) }
  0x2f   : > { %v2269_v2 = vmov %v83_v21   ;;  %v2273_v3 = vmov %v82_v20   ;;  %v2285_v6 = vmov %v79_v18   ;;  %v2289_v7 = vmov %v78_v16   ;;  %130 = vst [vmem:[#allocation4 + $0x43] sm:$0x7] (%p58_p13), %v2309_v1  ;;  %131 = vst [vmem:[#allocation4 + $0x5b] sm:$0x7] (%p58_p13), %v2309_v1  ;;  %v98_v30 = vld [vmem:[#allocation3 + $0x8] sm:$0xff] (%p58_p13)  ;;  %v100_v34 = vld [vmem:[#allocation3 + $0x18] sm:$0xff] (%p58_p13) }
  0x30   :  { %127 = vst [vmem:[#allocation4 + $0x48] sm:$0x7] (%p58_p13), %v2309_v1  ;;  %v88_v25 = vmax.f32 (%p58_p13), %v84_v22, %v76_v14  ;;  %v90_v26 = vmax.f32 (%p58_p13), %v86_v23, %v78_v16  ;;  %v89_v27 = vmax.f32 (%p58_p13), %v85_v24, %v77_v15  ;;  %133 = vst.msk [vmem:[#allocation4 + $0x3] sm:$0xff] (%p58_p13), %vm132_vm1, %v2309_v1  ;;  %v99_v35 = vld [vmem:[#allocation3 + $0x10] sm:$0xff] (%p58_p13)  ;;  %vm166_vm3 = vcmask (%p58_p13), 154648   ;;  %s2312_s8 = smov (%p58_p13), 126  }
  0x31   :  { %134 = vst.msk [vmem:[#allocation4 + $0xb] sm:$0xff] (%p58_p13), %vm132_vm1, %v2309_v1  ;;  %135 = vst.msk [vmem:[#allocation4 + $0x1b] sm:$0xff] (%p58_p13), %vm132_vm1, %v2309_v1  ;;  %v91_v31 = vmax.f32 (%p58_p13), %v87_v28, %v79_v18  ;;  %v101_v32 = vadd.f32 (%p58_p13), %v97_v29, %v80_v17  ;;  %v102_v33 = vadd.f32 (%p58_p13), %v98_v30, %v81_v19  ;;  %s2313_s9 = smov (%p58_p13), 125   ;;  %s2314_s10 = smov (%p58_p13), 124   ;;  %vm440_vm4 = vcmask (%p58_p13), 1046528  }
  0x32   :  { %136 = vst.msk [vmem:[#allocation4 + $0x23] sm:$0xff] (%p58_p13), %vm132_vm1, %v2309_v1  ;;  %137 = vst.msk [vmem:[#allocation4 + $0x33] sm:$0xff] (%p58_p13), %vm132_vm1, %v2309_v1  ;;  %v104_v36 = vadd.f32 (%p58_p13), %v100_v34, %v83_v21  ;;  %v103_v37 = vadd.f32 (%p58_p13), %v99_v35, %v82_v20  ;;  %s2315_s11 = smov (%p58_p13), 123   ;;  %s2316_s12 = smov (%p58_p13), 122   ;;  %vm557_vm5 = vcmask (%p58_p13), 1045504   ;;  %vm674_vm6 = vcmask (%p58_p13), 1044480  }
  0x33   :  { %138 = vst.msk [vmem:[#allocation4 + $0x3b] sm:$0xff] %vm132_vm1, %v2309_v1  ;;  %139 = vst.msk [vmem:[#allocation4 + $0x4b] sm:$0xff] %vm132_vm1, %v2309_v1  ;;  %s272_s13 = sld [smem:[#allocation6]]  ;;  %s1972_s14 = sld [smem:[#allocation6 + $0x7]]  ;;  %vm791_vm7 = vcmask 1043456   ;;  %vm908_vm8 = vcmask 1042432  }
  0x34   :  { %140 = vst.msk [vmem:[#allocation4 + $0x53] sm:$0xff] %vm132_vm1, %v2309_v1  ;;  %s1979_s15 = sld [smem:[#allocation6 + $0xe]]  ;;  %s1986_s16 = sld [smem:[#allocation6 + $0x15]]  ;;  %vm1025_vm9 = vcmask 1041408  }
  0x35   :  { %142 = vst.msk [vmem:[#allocation4 + $0x3] sm:$0xff] %vm141_vm2, %v2309_v1  ;;  %144 = vst.msk [vmem:[#allocation4 + $0x1b] sm:$0xff] %vm141_vm2, %v2309_v1  ;;  %s1993_s17 = sld [smem:[#allocation6 + $0x1c]]  ;;  %s2000_s18 = sld [smem:[#allocation6 + $0x23]] }
  0x36   :  { %143 = vst.msk [vmem:[#allocation4 + $0xb] sm:$0xff] %vm141_vm2, %v2309_v1  ;;  %145 = vst.msk [vmem:[#allocation4 + $0x23] sm:$0xff] %vm141_vm2, %v2309_v1  ;;  %s1966_s19 = sld [smem:[#allocation6 + $0x1]]  ;;  %s2007_s20 = sld [smem:[#allocation6 + $0x2a]] }
  0x37   :  { %146 = vst.msk [vmem:[#allocation4 + $0x33] sm:$0xff] %vm141_vm2, %v2309_v1  ;;  %147 = vst.msk [vmem:[#allocation4 + $0x3b] sm:$0xff] %vm141_vm2, %v2309_v1  ;;  %s1973_s1 = sld [smem:[#allocation6 + $0x8]]  ;;  %s1980_s21 = sld [smem:[#allocation6 + $0xf]] }
  0x38   :  { %148 = vst.msk [vmem:[#allocation4 + $0x4b] sm:$0xff] %vm141_vm2, %v2309_v1  ;;  %149 = vst.msk [vmem:[#allocation4 + $0x53] sm:$0xff] %vm141_vm2, %v2309_v1  ;;  %s1987_s22 = sld [smem:[#allocation6 + $0x16]]  ;;  %s1994_s23 = sld [smem:[#allocation6 + $0x1d]] }
  0x39   :  { %93 = vst.msk [vmem:[#allocation2] sm:$0xff] %vm47_vm0, %v88_v25  ;;  %95 = vst.msk [vmem:[#allocation2 + $0x10] sm:$0xff] %vm47_vm0, %v90_v26  ;;  %s2536_s24 = sld [smem:[#allocation6 + $0x24]]  ;;  %v273_v6 = vstv %s272_s13  ;;  %v2540_v7 = vstv %s1972_s14  ;;  %s2569_s0 = sld [smem:[#allocation6 + $0x2b]] }
  0x3a   :  { %94 = vst.msk [vmem:[#allocation2 + $0x8] sm:$0xff] %vm47_vm0, %v89_v27  ;;  %96 = vst.msk [vmem:[#allocation2 + $0x18] sm:$0xff] %vm47_vm0, %v91_v31  ;;  %v2542_v8 = vstv %s1979_s15  ;;  %v2544_v9 = vstv %s1986_s16  ;;  %s2571_s25 = sld [smem:[#allocation6 + $0x2]]  ;;  %s2589_s26 = sld [smem:[#allocation6 + $0x9]] }
  0x3b   :  { %105 = vst.msk [vmem:[#allocation3] sm:$0xff] %vm47_vm0, %v101_v32  ;;  %106 = vst.msk [vmem:[#allocation3 + $0x8] sm:$0xff] %vm47_vm0, %v102_v33  ;;  %v2546_v10 = vstv %s1993_s17  ;;  %v2548_v11 = vstv %s2000_s18  ;;  %s2591_s29 = sld [smem:[#allocation6 + $0x10]]  ;;  %s2608_s30 = sld [smem:[#allocation6 + $0x31]] }
  0x3c   :  { %108 = vst.msk [vmem:[#allocation3 + $0x18] sm:$0xff] %vm47_vm0, %v104_v36  ;;  %107 = vst.msk [vmem:[#allocation3 + $0x10] sm:$0xff] %vm47_vm0, %v103_v37  ;;  %v2550_v12 = vstv %s1966_s19  ;;  %v2556_v15 = vstv %s2007_s20  ;;  %s2610_s2 = sld [smem:[#allocation6 + $0x38]]  ;;  %s2628_s4 = sld [smem:[#allocation6 + $0x3f]] }
  0x3d   :  { %v2552_v13 = vstv %s1973_s1  ;;  %v2554_v14 = vstv %s1980_s21  ;;  %s2630_s5 = sld [smem:[#allocation6 + $0x46]]  ;;  %s2670_s13 = sld [smem:[#allocation6 + $0x17]] }
  0x3e   :  { %v2565_v17 = vstv %s1987_s22  ;;  %v2567_v18 = vstv %s1994_s23  ;;  %s2672_s14 = sld [smem:[#allocation6 + $0x5b]]  ;;  %s2690_s15 = sld [smem:[#allocation6 + $0x1e]] }
  0x3f   :  { %v2637_v31 = vstv %s2536_s24  ;;  %s2692_s16 = sld [smem:[#allocation6 + $0x25]]  ;;  %s2728_s17 = sld [smem:[#allocation6 + $0x2c]] }
  0x40   :  { %v112_v38 = vld [vmem:[#allocation2] sm:$0xff]  ;;  %v114_v39 = vld [vmem:[#allocation2 + $0x10] sm:$0xff]  ;;  %s2745_s18 = sld [smem:[#allocation6 + $0x3]]  ;;  %s2763_s19 = sld [smem:[#allocation6 + $0xa]] }
  0x41   :  { %154 = vrot.lane.b32.xlu0 %v112_v38, %s2310_s6  ;;  %158 = vrot.lane.b32.xlu1 %v114_v39, %s2310_s6  ;;  %v113_v40 = vld [vmem:[#allocation2 + $0x8] sm:$0xff]  ;;  %v115_v41 = vld [vmem:[#allocation2 + $0x18] sm:$0xff]  ;;  %s2765_s20 = sld [smem:[#allocation6 + $0x11]]  ;;  %s2767_s1 = sld [smem:[#allocation6 + $0x18]] }
  0x42   :  { %v116_v42 = vld [vmem:[#allocation3] sm:$0xff]  ;;  %v117_v43 = vld [vmem:[#allocation3 + $0x8] sm:$0xff]  ;;  %s2769_s21 = sld [smem:[#allocation6 + $0x1f]]  ;;  %s2795_s22 = sld [smem:[#allocation6 + $0x26]] }
  0x43   :  { %v120_v44 = vmul.f32 0.25, %v116_v42  ;;  %v121_v45 = vmul.f32 0.25, %v117_v43  ;;  %v119_v46 = vld [vmem:[#allocation3 + $0x18] sm:$0xff]  ;;  %v118_v47 = vld [vmem:[#allocation3 + $0x10] sm:$0xff]  ;;  %s2797_s23 = sld [smem:[#allocation6 + $0x2d]]  ;;  %s2816_s24 = sld [smem:[#allocation6 + $0xb]] }
  0x44   :  { %v123_v48 = vmul.f32 0.25, %v119_v46  ;;  %v122_v49 = vmul.f32 0.25, %v118_v47  ;;  %v2714_v47 = vstv %s2569_s0  ;;  %s2827_s0 = sld [smem:[#allocation6 + $0x12]] }
  0x45   :  { %156 = vrot.lane.b32.xlu0 %v113_v40, %s2310_s6  ;;  %160 = vrot.lane.b32.xlu1 %v115_v41, %s2310_s6 }
  0x49   :  { %175 = vrot.lane.b32.xlu0 %v120_v44, %s2310_s6  ;;  %177 = vrot.lane.b32.xlu1 %v121_v45, %s2310_s6 }
  0x4d   :  { %181 = vrot.lane.b32.xlu1 %v123_v48, %s2310_s6  ;;  %179 = vrot.lane.b32.xlu0 %v122_v49, %s2310_s6  ;;  %s2650_s6 = sld [smem:[#allocation6 + $0x4d]] }
  0xb3   :  { %v155_v50 = vpop.permute.xlu0 %154  ;;  %v159_v51 = vpop.permute.xlu1 %158 }
  0xb4   :  { %167 = vst.msk [vmem:[#allocation4 + $0x3] sm:$0xff] %vm166_vm3, %v155_v50  ;;  %169 = vst.msk [vmem:[#allocation4 + $0x1b] sm:$0xff] %vm166_vm3, %v159_v51 }
  0xb7   :  { %v157_v52 = vpop.permute.xlu0 %156  ;;  %v161_v53 = vpop.permute.xlu1 %160 }
  0xb8   :  { %168 = vst.msk [vmem:[#allocation4 + $0xb] sm:$0xff] %vm166_vm3, %v157_v52  ;;  %170 = vst.msk [vmem:[#allocation4 + $0x23] sm:$0xff] %vm166_vm3, %v161_v53 }
  0xbb   :  { %v2428_v54 = vld [vmem:[#allocation4] sm:$0xff]  ;;  %v176_v55 = vpop.permute.xlu0 %175  ;;  %v178_v56 = vpop.permute.xlu1 %177  ;;  %v2444_v61 = vld [vmem:[#allocation4 + $0x18] sm:$0xff] }
  0xbc   :  { %200 = vrot.lane.b32.xlu0 %v2428_v54, %s2311_s7  ;;  %188 = vst.msk [vmem:[#allocation4 + $0x33] sm:$0xff] %vm166_vm3, %v176_v55  ;;  %189 = vst.msk [vmem:[#allocation4 + $0x3b] sm:$0xff] %vm166_vm3, %v178_v56  ;;  %v2563_v16 = vmul.f32 %v273_v6, %v2428_v54  ;;  %v2575_v19 = vmul.f32 %v2540_v7, %v2428_v54  ;;  %v2579_v20 = vmul.f32 %v2542_v8, %v2428_v54 }
  0xbd   :  { %v2583_v21 = vmul.f32 %v2544_v9, %v2428_v54  ;;  %v2587_v22 = vmul.f32 %v2546_v10, %v2428_v54  ;;  %v2595_v23 = vmul.f32 %v2548_v11, %v2428_v54  ;;  %v2599_v24 = vmul.f32 %v2556_v15, %v2428_v54 }
  0xbe   :  { %v2602_v25 = vmul.f32 %v273_v6, %v2444_v61  ;;  %v2606_v26 = vmul.f32 %v2540_v7, %v2444_v61  ;;  %v2614_v27 = vmul.f32 %v2542_v8, %v2444_v61  ;;  %v2618_v28 = vmul.f32 %v2544_v9, %v2444_v61 }
  0xbf   :  { %v2434_v57 = vld [vmem:[#allocation4 + $0x8] sm:$0xff]  ;;  %v2436_v58 = vld [vmem:[#allocation4 + $0x10] sm:$0x3f]  ;;  %v182_v59 = vpop.permute.xlu1 %181  ;;  %v180_v60 = vpop.permute.xlu0 %179  ;;  %v2446_v62 = vld [vmem:[#allocation4 + $0x20] sm:$0xff]  ;;  %v2622_v29 = vmul.f32 %v2546_v10, %v2444_v61  ;;  %v2626_v30 = vmul.f32 %v2548_v11, %v2444_v61  ;;  %v2648_v34 = vmul.f32 %v2556_v15, %v2444_v61 }
  0xc0   :  { %204 = vrot.lane.b32.xlu0 %v2436_v58, %s2311_s7  ;;  %202 = vrot.lane.b32.xlu1 %v2434_v57, %s2311_s7  ;;  %191 = vst.msk [vmem:[#allocation4 + $0x53] sm:$0xff] %vm166_vm3, %v182_v59  ;;  %190 = vst.msk [vmem:[#allocation4 + $0x4b] sm:$0xff] %vm166_vm3, %v180_v60  ;;  %v2452_v63 = vld [vmem:[#allocation4 + $0x28] sm:$0x3f]  ;;  %v2640_v32 = vmul.f32 %v273_v6, %v2434_v57  ;;  %v2644_v33 = vmul.f32 %v2540_v7, %v2434_v57  ;;  %v2772_v59 = vstv %s2608_s30  ;;  %s2866_s30 = sld [smem:[#allocation6 + $0x2e]] }
  0xc1   :  { %v2656_v35 = vmul.f32 %v2542_v8, %v2434_v57  ;;  %v2660_v36 = vmul.f32 %v2544_v9, %v2434_v57  ;;  %v2664_v37 = vmul.f32 %v2546_v10, %v2434_v57  ;;  %v2668_v38 = vmul.f32 %v2548_v11, %v2434_v57 }
  0xc2   :  { %v2676_v39 = vmul.f32 %v2556_v15, %v2434_v57  ;;  %v2680_v40 = vmul.f32 %v2540_v7, %v2436_v58  ;;  %v2684_v41 = vmul.f32 %v2542_v8, %v2436_v58  ;;  %v2688_v42 = vmul.f32 %v2544_v9, %v2436_v58 }
  0xc3   :  { %v2514_v0 = vld [vmem:[#allocation4 + $0x30] sm:$0xff]  ;;  %v2520_v1 = vld [vmem:[#allocation4 + $0x38] sm:$0xff]  ;;  %v2522_v2 = vld [vmem:[#allocation4 + $0x40] sm:$0x3f]  ;;  %v2696_v43 = vmul.f32 %v2546_v10, %v2436_v58  ;;  %v2700_v44 = vmul.f32 %v2548_v11, %v2436_v58  ;;  %v2704_v45 = vmul.f32 %v2556_v15, %v2436_v58  ;;  %v2707_v46 = vmul.f32 %v273_v6, %v2446_v62 }
  0xc4   :  { %208 = vrot.lane.b32.xlu0 %v2446_v62, %s2311_s7  ;;  %206 = vrot.lane.b32.xlu1 %v2444_v61, %s2311_s7  ;;  %v2718_v48 = vmul.f32 %v2540_v7, %v2446_v62  ;;  %v2722_v49 = vmul.f32 %v2542_v8, %v2446_v62  ;;  %v2726_v50 = vmul.f32 %v2544_v9, %v2446_v62  ;;  %v2775_v60 = vstv %s2610_s2  ;;  %s2868_s2 = sld [smem:[#allocation6 + $0x5]] }
  0xc5   :  { %v2732_v51 = vmul.f32 %v2546_v10, %v2446_v62  ;;  %v2736_v52 = vmul.f32 %v2548_v11, %v2446_v62  ;;  %v2740_v53 = vmul.f32 %v2556_v15, %v2446_v62  ;;  %v2749_v55 = vmul.f32 %v2540_v7, %v2452_v63 }
  0xc6   :  { %v2753_v56 = vmul.f32 %v2542_v8, %v2452_v63  ;;  %v2789_v6 = vmul.f32 %v2548_v11, %v2452_v63  ;;  %v2793_v7 = vmul.f32 %v2556_v15, %v2452_v63  ;;  %v2800_v8 = vstv %s2650_s6  ;;  %s2902_s6 = sld [smem:[#allocation6 + $0x1a]] }
  0xc7   :  { %v2528_v3 = vld [vmem:[#allocation4 + $0x48] sm:$0xff]  ;;  %v2530_v4 = vld [vmem:[#allocation4 + $0x50] sm:$0xff]  ;;  %v2538_v5 = vld [vmem:[#allocation4 + $0x58] sm:$0x3f]  ;;  %v2822_v11 = vstv %s2690_s15  ;;  %v2825_v15 = vstv %s2692_s16  ;;  %s2951_s15 = sld [smem:[#allocation6 + $0x6]]  ;;  %s2953_s16 = sld [smem:[#allocation6 + $0xd]] }
  0xc8   :  { %212 = vrot.lane.b32.xlu0 %v2428_v54, %s2312_s8  ;;  %210 = vrot.lane.b32.xlu1 %v2452_v63, %s2311_s7  ;;  %5418 = vst [vmem:[#allocation17_spill] sm:$0xff] %v2789_v6  ;;  %5419 = vst [vmem:[#allocation18_spill] sm:$0xff] %v2793_v7  ;;  %v2833_v7 = vmul.f32 %v2772_v59, %v2514_v0 }
  0xc9   :  { %5425 = vst [vmem:[#allocation24_spill] sm:$0xff] %v2822_v11  ;;  %5426 = vst [vmem:[#allocation25_spill] sm:$0xff] %v2825_v15 }
  0xca   :  { %5427 = vst [vmem:[#allocation26_spill] sm:$0xff] %v2833_v7 }
  0xcc   :  { %216 = vrot.lane.b32.xlu0 %v2436_v58, %s2312_s8  ;;  %214 = vrot.lane.b32.xlu1 %v2434_v57, %s2312_s8 }
  0xd0   :  { %220 = vrot.lane.b32.xlu0 %v2446_v62, %s2312_s8  ;;  %218 = vrot.lane.b32.xlu1 %v2444_v61, %s2312_s8 }
  0xd4   :  { %224 = vrot.lane.b32.xlu0 %v2428_v54, %s2313_s9  ;;  %222 = vrot.lane.b32.xlu1 %v2452_v63, %s2312_s8 }
  0xd8   :  { %228 = vrot.lane.b32.xlu0 %v2436_v58, %s2313_s9  ;;  %226 = vrot.lane.b32.xlu1 %v2434_v57, %s2313_s9 }
  0xdc   :  { %232 = vrot.lane.b32.xlu0 %v2446_v62, %s2313_s9  ;;  %230 = vrot.lane.b32.xlu1 %v2444_v61, %s2313_s9 }
  0xe0   :  { %236 = vrot.lane.b32.xlu0 %v2428_v54, %s2314_s10  ;;  %234 = vrot.lane.b32.xlu1 %v2452_v63, %s2313_s9 }
  0xe4   :  { %240 = vrot.lane.b32.xlu0 %v2436_v58, %s2314_s10  ;;  %238 = vrot.lane.b32.xlu1 %v2434_v57, %s2314_s10 }
  0xe8   :  { %244 = vrot.lane.b32.xlu0 %v2446_v62, %s2314_s10  ;;  %242 = vrot.lane.b32.xlu1 %v2444_v61, %s2314_s10 }
  0xec   :  { %248 = vrot.lane.b32.xlu0 %v2428_v54, %s2315_s11  ;;  %246 = vrot.lane.b32.xlu1 %v2452_v63, %s2314_s10 }
  0xf0   :  { %252 = vrot.lane.b32.xlu0 %v2436_v58, %s2315_s11  ;;  %250 = vrot.lane.b32.xlu1 %v2434_v57, %s2315_s11 }
  0xf4   :  { %256 = vrot.lane.b32.xlu0 %v2446_v62, %s2315_s11  ;;  %254 = vrot.lane.b32.xlu1 %v2444_v61, %s2315_s11 }
  0xf8   :  { %260 = vrot.lane.b32.xlu0 %v2428_v54, %s2316_s12  ;;  %258 = vrot.lane.b32.xlu1 %v2452_v63, %s2315_s11  ;;  %v2743_v54 = vstv %s2571_s25  ;;  %s2829_s25 = sld [smem:[#allocation6 + $0x19]] }
  0xf9   :  { %5416 = vst [vmem:[#allocation15_spill] sm:$0xff] %v2743_v54  ;;  %v2809_v54 = vstv %s2591_s29  ;;  %s2841_s29 = sld [smem:[#allocation6 + $0x27]] }
  0xfa   :  { %5422 = vst [vmem:[#allocation21_spill] sm:$0xff] %v2809_v54  ;;  %v2853_v54 = vmul.f32 %v2800_v8, %v2514_v0 }
  0xfc   :  { %264 = vrot.lane.b32.xlu0 %v2436_v58, %s2316_s12  ;;  %262 = vrot.lane.b32.xlu1 %v2434_v57, %s2316_s12  ;;  %v2757_v57 = vmul.f32 %v2544_v9, %v2452_v63  ;;  %v2761_v58 = vmul.f32 %v2546_v10, %v2452_v63  ;;  %v2806_v10 = vstv %s2589_s26  ;;  %s2839_s26 = sld [smem:[#allocation6 + $0x20]]  ;;  %5431 = vst [vmem:[#allocation30_spill] sm:$0xff] %v2853_v54 }
  0xfd   :  { %5421 = vst [vmem:[#allocation20_spill] sm:$0xff] %v2806_v10  ;;  %v2967_v10 = vstv %s2769_s21  ;;  %s4072_s21 = sld [smem:[#allocation6 + $0x47]] }
  0xfe   :  { %5417 = vst [vmem:[#allocation16_spill] sm:$0xff] %v2761_v58  ;;  %v2812_v58 = vstv %s2670_s13  ;;  %s2925_s13 = sld [smem:[#allocation6 + $0x28]]  ;;  %5454 = vst [vmem:[#allocation53_spill] sm:$0xff] %v2967_v10 }
  0xff   :  { %5423 = vst [vmem:[#allocation22_spill] sm:$0xff] %v2812_v58  ;;  %v2837_v58 = vmul.f32 %v2775_v60, %v2514_v0 }
 0x100   :  { %268 = vrot.lane.b32.xlu0 %v2446_v62, %s2316_s12  ;;  %266 = vrot.lane.b32.xlu1 %v2444_v61, %s2316_s12  ;;  %v2778_v61 = vstv %s2628_s4  ;;  %v2781_v62 = vstv %s2630_s5  ;;  %s2882_s4 = sld [smem:[#allocation6 + $0xc]]  ;;  %s2884_s5 = sld [smem:[#allocation6 + $0x13]] }
 0x101   :  { %5428 = vst [vmem:[#allocation27_spill] sm:$0xff] %v2837_v58  ;;  %v2845_v11 = vmul.f32 %v2778_v61, %v2514_v0  ;;  %v2849_v15 = vmul.f32 %v2781_v62, %v2514_v0  ;;  %v2864_v58 = vstv %s2728_s17  ;;  %s2969_s17 = sld [smem:[#allocation6 + $0x14]] }
 0x102   :  { %5433 = vst [vmem:[#allocation32_spill] sm:$0xff] %v2864_v58  ;;  %v2892_v58 = vmul.f32 %v2781_v62, %v2520_v1 }
 0x103   :  { %5429 = vst [vmem:[#allocation28_spill] sm:$0xff] %v2845_v11  ;;  %5430 = vst [vmem:[#allocation29_spill] sm:$0xff] %v2849_v15  ;;  %v2880_v15 = vmul.f32 %v2775_v60, %v2520_v1  ;;  %v2888_v11 = vmul.f32 %v2778_v61, %v2520_v1 }
 0x104   :  { %270 = vrot.lane.b32.xlu1 %v2452_v63, %s2316_s12  ;;  %1050 = vrot.lane.b32.xlu0 %v2514_v0, %s2311_s7  ;;  %v2819_v63 = vstv %s2672_s14  ;;  %5438 = vst [vmem:[#allocation37_spill] sm:$0xff] %v2892_v58  ;;  %v2912_v58 = vmul.f32 %v2775_v60, %v2522_v2  ;;  %s2927_s14 = sld [smem:[#allocation6 + $0x2f]] }
 0x105   :  { %5424 = vst [vmem:[#allocation23_spill] sm:$0xff] %v2819_v63  ;;  %v2872_v54 = vmul.f32 %v2819_v63, %v2514_v0  ;;  %5436 = vst [vmem:[#allocation35_spill] sm:$0xff] %v2880_v15 }
 0x106   :  { %5437 = vst [vmem:[#allocation36_spill] sm:$0xff] %v2888_v11  ;;  %v2908_v11 = vmul.f32 %v2819_v63, %v2520_v1  ;;  %5442 = vst [vmem:[#allocation41_spill] sm:$0xff] %v2912_v58 }
 0x107   :  { %5434 = vst [vmem:[#allocation33_spill] sm:$0xff] %v2872_v54  ;;  %v2896_v54 = vmul.f32 %v2800_v8, %v2520_v1 }
 0x108   :  { %1052 = vrot.lane.b32.xlu1 %v2520_v1, %s2311_s7  ;;  %1054 = vrot.lane.b32.xlu0 %v2522_v2, %s2311_s7  ;;  %5441 = vst [vmem:[#allocation40_spill] sm:$0xff] %v2908_v11  ;;  %v2931_v11 = vmul.f32 %v2800_v8, %v2522_v2 }
 0x109   :  { %5439 = vst [vmem:[#allocation38_spill] sm:$0xff] %v2896_v54  ;;  %v2916_v54 = vmul.f32 %v2778_v61, %v2522_v2 }
 0x10a   :  { %5446 = vst [vmem:[#allocation45_spill] sm:$0xff] %v2931_v11  ;;  %v2964_v11 = vstv %s2767_s1  ;;  %s3023_s1 = sld [smem:[#allocation6 + $0x30]] }
 0x10b   :  { %5443 = vst [vmem:[#allocation42_spill] sm:$0xff] %v2916_v54  ;;  %v2939_v54 = vmul.f32 %v2819_v63, %v2522_v2  ;;  %5453 = vst [vmem:[#allocation52_spill] sm:$0xff] %v2964_v11 }
 0x10c   :  { %1058 = vrot.lane.b32.xlu0 %v2530_v4, %s2311_s7  ;;  %1056 = vrot.lane.b32.xlu1 %v2528_v3, %s2311_s7 }
 0x10d   :  { %5448 = vst [vmem:[#allocation47_spill] sm:$0xff] %v2939_v54  ;;  %v2961_v54 = vmul.f32 %v2775_v60, %v2528_v3 }
 0x10f   :  { %5452 = vst [vmem:[#allocation51_spill] sm:$0xff] %v2961_v54  ;;  %v2990_v54 = vmul.f32 %v2800_v8, %v2528_v3 }
 0x110   :  { %1062 = vrot.lane.b32.xlu0 %v2514_v0, %s2312_s8  ;;  %1060 = vrot.lane.b32.xlu1 %v2538_v5, %s2311_s7  ;;  %s2652_s7 = sld [smem:[#allocation6 + $0x54]] }
 0x111   :  { %5458 = vst [vmem:[#allocation57_spill] sm:$0xff] %v2990_v54  ;;  %v3010_v54 = vmul.f32 %v2778_v61, %v2530_v4 }
 0x113   :  { %5463 = vst [vmem:[#allocation62_spill] sm:$0xff] %v3010_v54  ;;  %v3027_v54 = vmul.f32 %v2800_v8, %v2530_v4 }
 0x114   :  { %1066 = vrot.lane.b32.xlu0 %v2522_v2, %s2312_s8  ;;  %1064 = vrot.lane.b32.xlu1 %v2520_v1, %s2312_s8 }
 0x115   :  { %5466 = vst [vmem:[#allocation65_spill] sm:$0xff] %v3027_v54  ;;  %v3049_v54 = vmul.f32 %v2778_v61, %v2538_v5 }
 0x116   :  { %v2803_v9 = vstv %s2652_s7  ;;  %s2904_s7 = sld [smem:[#allocation6 + $0x21]] }
 0x117   :  { %5420 = vst [vmem:[#allocation19_spill] sm:$0xff] %v2803_v9  ;;  %v2857_v7 = vmul.f32 %v2803_v9, %v2514_v0  ;;  %v2900_v15 = vmul.f32 %v2803_v9, %v2520_v1  ;;  %v2935_v58 = vmul.f32 %v2803_v9, %v2522_v2  ;;  %v2994_v10 = vmul.f32 %v2803_v9, %v2528_v3 }
 0x118   :  { %1070 = vrot.lane.b32.xlu0 %v2530_v4, %s2312_s8  ;;  %1068 = vrot.lane.b32.xlu1 %v2528_v3, %s2312_s8  ;;  %5472 = vst [vmem:[#allocation71_spill] sm:$0xff] %v3049_v54  ;;  %v3072_v54 = vstv %s2882_s4  ;;  %s4406_s4 = sld [smem:[#allocation6 + $0x34]] }
 0x119   :  { %5432 = vst [vmem:[#allocation31_spill] sm:$0xff] %v2857_v7  ;;  %v2876_v7 = vmul.f32 %v2772_v59, %v2520_v1  ;;  %5440 = vst [vmem:[#allocation39_spill] sm:$0xff] %v2900_v15  ;;  %v2920_v15 = vmul.f32 %v2781_v62, %v2522_v2 }
 0x11a   :  { %5447 = vst [vmem:[#allocation46_spill] sm:$0xff] %v2935_v58  ;;  %v2957_v58 = vmul.f32 %v2772_v59, %v2528_v3  ;;  %5459 = vst [vmem:[#allocation58_spill] sm:$0xff] %v2994_v10  ;;  %v3014_v10 = vmul.f32 %v2781_v62, %v2530_v4 }
 0x11b   :  { %5435 = vst [vmem:[#allocation34_spill] sm:$0xff] %v2876_v7  ;;  %5444 = vst [vmem:[#allocation43_spill] sm:$0xff] %v2920_v15  ;;  %v2923_v7 = vstv %s2745_s18  ;;  %v2946_v15 = vstv %s2763_s19  ;;  %s2971_s18 = sld [smem:[#allocation6 + $0x1b]]  ;;  %s2984_s19 = sld [smem:[#allocation6 + $0x22]] }
 0x11c   :  { %1074 = vrot.lane.b32.xlu0 %v2514_v0, %s2313_s9  ;;  %1072 = vrot.lane.b32.xlu1 %v2538_v5, %s2312_s8  ;;  %s2814_s8 = sld [smem:[#allocation6 + $0x4]]  ;;  %5445 = vst [vmem:[#allocation44_spill] sm:$0xff] %v2923_v7  ;;  %5449 = vst [vmem:[#allocation48_spill] sm:$0xff] %v2946_v15  ;;  %v2949_v7 = vstv %s2765_s20  ;;  %v2982_v15 = vstv %s2795_s22  ;;  %s2986_s20 = sld [smem:[#allocation6 + $0x29]] }
 0x11d   :  { %5450 = vst [vmem:[#allocation49_spill] sm:$0xff] %v2949_v7  ;;  %5451 = vst [vmem:[#allocation50_spill] sm:$0xff] %v2957_v58  ;;  %v2975_v7 = vmul.f32 %v2778_v61, %v2528_v3  ;;  %v2979_v58 = vmul.f32 %v2781_v62, %v2528_v3  ;;  %v3069_v61 = vstv %s2868_s2  ;;  %s4074_s22 = sld [smem:[#allocation6 + $0x4e]]  ;;  %s4244_s2 = sld [smem:[#allocation6 + $0x5d]] }
 0x11e   :  { %5457 = vst [vmem:[#allocation56_spill] sm:$0xff] %v2982_v15  ;;  %v3006_v15 = vmul.f32 %v2775_v60, %v2530_v4  ;;  %5464 = vst [vmem:[#allocation63_spill] sm:$0xff] %v3014_v10  ;;  %v3031_v10 = vmul.f32 %v2803_v9, %v2530_v4  ;;  %v3061_v9 = vstv %s2841_s29  ;;  %s4232_s29 = sld [smem:[#allocation6 + $0x4f]] }
 0x11f   :  { %5455 = vst [vmem:[#allocation54_spill] sm:$0xff] %v2975_v7  ;;  %5456 = vst [vmem:[#allocation55_spill] sm:$0xff] %v2979_v58  ;;  %v2998_v7 = vmul.f32 %v2819_v63, %v2528_v3  ;;  %v3002_v58 = vmul.f32 %v2772_v59, %v2530_v4  ;;  %v3021_v59 = vstv %s2797_s23  ;;  %s4078_s23 = sld [smem:[#allocation6 + $0x55]] }
 0x120   :  { %1078 = vrot.lane.b32.xlu0 %v2522_v2, %s2313_s9  ;;  %1076 = vrot.lane.b32.xlu1 %v2520_v1, %s2313_s9  ;;  %5462 = vst [vmem:[#allocation61_spill] sm:$0xff] %v3006_v15  ;;  %5465 = vst [vmem:[#allocation64_spill] sm:$0xff] %v3021_v59  ;;  %v3035_v15 = vmul.f32 %v2819_v63, %v2530_v4  ;;  %v3045_v59 = vmul.f32 %v2775_v60, %v2538_v5  ;;  %v3055_v63 = vstv %s2829_s25  ;;  %s4220_s25 = sld [smem:[#allocation6 + $0x41]] }
 0x121   :  { %5460 = vst [vmem:[#allocation59_spill] sm:$0xff] %v2998_v7  ;;  %5461 = vst [vmem:[#allocation60_spill] sm:$0xff] %v3002_v58  ;;  %v3041_v7 = vstv %s2816_s24  ;;  %v3066_v60 = vstv %s2866_s30  ;;  %s4208_s24 = sld [smem:[#allocation6 + $0x33]]  ;;  %s4242_s30 = sld [smem:[#allocation6 + $0x56]] }
 0x122   :  { %5467 = vst [vmem:[#allocation66_spill] sm:$0xff] %v3031_v10  ;;  %5468 = vst [vmem:[#allocation67_spill] sm:$0xff] %v3035_v15  ;;  %v3038_v58 = vstv %s2814_s8  ;;  %v3052_v10 = vstv %s2827_s0  ;;  %v3058_v15 = vstv %s2839_s26  ;;  %s4080_s8 = sld [smem:[#allocation6 + $0x5c]]  ;;  %s4218_s0 = sld [smem:[#allocation6 + $0x3a]] }
 0x123   :  { %5469 = vst [vmem:[#allocation68_spill] sm:$0xff] %v3038_v58  ;;  %5470 = vst [vmem:[#allocation69_spill] sm:$0xff] %v3041_v7  ;;  %v3108_v7 = vstv %s2969_s17  ;;  %s4230_s26 = sld [smem:[#allocation6 + $0x48]]  ;;  %s4606_s17 = sld [smem:[#allocation6 + $0x3c]] }
 0x124   :  { %1082 = vrot.lane.b32.xlu0 %v2530_v4, %s2313_s9  ;;  %1080 = vrot.lane.b32.xlu1 %v2528_v3, %s2313_s9  ;;  %5471 = vst [vmem:[#allocation70_spill] sm:$0xff] %v3045_v59  ;;  %5473 = vst [vmem:[#allocation72_spill] sm:$0xff] %v3052_v10  ;;  %v3075_v59 = vstv %s2884_s5  ;;  %v3105_v10 = vstv %s2953_s16  ;;  %s4418_s5 = sld [smem:[#allocation6 + $0x3b]]  ;;  %s4604_s16 = sld [smem:[#allocation6 + $0x35]] }
 0x125   :  { %5474 = vst [vmem:[#allocation73_spill] sm:$0xff] %v3055_v63  ;;  %5475 = vst [vmem:[#allocation74_spill] sm:$0xff] %v3058_v15  ;;  %v3085_v15 = vstv %s2904_s7  ;;  %v3102_v63 = vstv %s2951_s15  ;;  %s4426_s7 = sld [smem:[#allocation6 + $0x49]]  ;;  %s4438_s15 = sld [smem:[#allocation6 + $0x5e]] }
 0x126   :  { %5476 = vst [vmem:[#allocation75_spill] sm:$0xff] %v3061_v9  ;;  %5477 = vst [vmem:[#allocation76_spill] sm:$0xff] %v3066_v60  ;;  %v3082_v9 = vstv %s2902_s6  ;;  %v3089_v60 = vmul.f32 %v2781_v62, %v2538_v5  ;;  %v3114_v62 = vstv %s2984_s19  ;;  %s4420_s6 = sld [smem:[#allocation6 + $0x42]] }
 0x127   :  { %5478 = vst [vmem:[#allocation77_spill] sm:$0xff] %v3069_v61  ;;  %5479 = vst [vmem:[#allocation78_spill] sm:$0xff] %v3072_v54  ;;  %v3093_v54 = vmul.f32 %v2800_v8, %v2538_v5  ;;  %v3096_v61 = vstv %s2925_s13  ;;  %s4428_s13 = sld [smem:[#allocation6 + $0x50]]  ;;  %s4618_s19 = sld [smem:[#allocation6 + $0x4a]] }
 0x128   :  { %1086 = vrot.lane.b32.xlu0 %v2514_v0, %s2314_s10  ;;  %1084 = vrot.lane.b32.xlu1 %v2538_v5, %s2313_s9  ;;  %s3063_s9 = sld [smem:[#allocation5]]  ;;  %5480 = vst [vmem:[#allocation79_spill] sm:$0xff] %v3075_v59  ;;  %5481 = vst [vmem:[#allocation80_spill] sm:$0xff] %v3082_v9  ;;  %v3099_v59 = vstv %s2927_s14  ;;  %s4436_s14 = sld [smem:[#allocation6 + $0x57]] }
 0x129   :  { %5482 = vst [vmem:[#allocation81_spill] sm:$0xff] %v3085_v15  ;;  %5483 = vst [vmem:[#allocation82_spill] sm:$0xff] %v3089_v60  ;;  %v3111_v15 = vstv %s2971_s18  ;;  %v3117_v60 = vstv %s2986_s20  ;;  %s4616_s18 = sld [smem:[#allocation6 + $0x43]]  ;;  %s4624_s20 = sld [smem:[#allocation6 + $0x51]] }
 0x12a   :  { %5484 = vst [vmem:[#allocation83_spill] sm:$0xff] %v3093_v54  ;;  %5485 = vst [vmem:[#allocation84_spill] sm:$0xff] %v3096_v61 }
 0x12b   :  { %5486 = vst [vmem:[#allocation85_spill] sm:$0xff] %v3099_v59  ;;  %5487 = vst [vmem:[#allocation86_spill] sm:$0xff] %v3102_v63 }
 0x12c   :  { %1090 = vrot.lane.b32.xlu0 %v2522_v2, %s2314_s10  ;;  %1088 = vrot.lane.b32.xlu1 %v2520_v1, %s2314_s10  ;;  %5488 = vst [vmem:[#allocation87_spill] sm:$0xff] %v3105_v10  ;;  %5489 = vst [vmem:[#allocation88_spill] sm:$0xff] %v3108_v7 }
 0x12d   :  { %5490 = vst [vmem:[#allocation89_spill] sm:$0xff] %v3111_v15  ;;  %5491 = vst [vmem:[#allocation90_spill] sm:$0xff] %v3114_v62 }
 0x12e   :  { %v201_v9 = vpop.permute.xlu0 %200  ;;  %5492 = vst [vmem:[#allocation91_spill] sm:$0xff] %v3117_v60  ;;  %v3131_v60 = vstv %s3023_s1  ;;  %s4626_s1 = sld [smem:[#allocation6 + $0x58]] }
 0x12f   :  { %v280_v8 = vmul.f32 %v2550_v12, %v201_v9  ;;  %v352_v54 = vmul.f32 %v2552_v13, %v201_v9  ;;  %v469_v59 = vmul.f32 %v2554_v14, %v201_v9  ;;  %v586_v63 = vmul.f32 %v2565_v17, %v201_v9  ;;  %5493 = vst [vmem:[#allocation92_spill] sm:$0xff] %v3131_v60 }
 0x130   :  { %v703_v10 = vmul.f32 %v2567_v18, %v201_v9  ;;  %v820_v61 = vmul.f32 %v2637_v31, %v201_v9  ;;  %v937_v7 = vmul.f32 %v2714_v47, %v201_v9  ;;  %1094 = vrot.lane.b32.xlu0 %v2530_v4, %s2314_s10  ;;  %1092 = vrot.lane.b32.xlu1 %v2528_v3, %s2314_s10 }
 0x131   :  { %v3134_v62 = vadd.f32 %v280_v8, %v2563_v16  ;;  %v3137_v15 = vadd.f32 %v352_v54, %v2575_v19  ;;  %v3140_v58 = vadd.f32 %v469_v59, %v2579_v20  ;;  %v3143_v11 = vadd.f32 %v586_v63, %v2583_v21 }
 0x132   :  { %v3146_v9 = vadd.f32 %v703_v10, %v2587_v22  ;;  %v3149_v6 = vadd.f32 %v820_v61, %v2595_v23  ;;  %v3152_v60 = vadd.f32 %v937_v7, %v2599_v24  ;;  %v203_v16 = vpop.permute.xlu1 %202  ;;  %v205_v8 = vpop.permute.xlu0 %204 }
 0x133   :  { %5494 = vst [vmem:[#allocation93_spill] sm:$0xff] %v3134_v62  ;;  %v3155_v62 = vstv %s3063_s9  ;;  %v281_v19 = vmul.f32 %v2550_v12, %v203_v16  ;;  %v353_v20 = vmul.f32 %v2552_v13, %v203_v16  ;;  %v470_v21 = vmul.f32 %v2554_v14, %v203_v16  ;;  %s4636_s9 = sld [smem:[#allocation6 + $0x5f]] }
 0x134   :  { %5495 = vst [vmem:[#allocation94_spill] sm:$0xff] %v3155_v62  ;;  %v587_v54 = vmul.f32 %v2565_v17, %v203_v16  ;;  %v704_v22 = vmul.f32 %v2567_v18, %v203_v16  ;;  %v821_v23 = vmul.f32 %v2637_v31, %v203_v16  ;;  %v938_v10 = vmul.f32 %v2714_v47, %v203_v16 }
 0x135   :  { %v354_v24 = vmul.f32 %v2552_v13, %v205_v8  ;;  %1098 = vrot.lane.b32.xlu0 %v2514_v0, %s2315_s11  ;;  %v3168_v7 = vadd.f32 %v281_v19, %v2640_v32  ;;  %v3171_v63 = vadd.f32 %v353_v20, %v2644_v33  ;;  %v3174_v59 = vadd.f32 %v470_v21, %v2656_v35 }
 0x136   :  { %v3177_v61 = vadd.f32 %v587_v54, %v2660_v36  ;;  %1096 = vrot.lane.b32.xlu1 %v2538_v5, %s2314_s10  ;;  %v3182_v16 = vadd.f32 %v704_v22, %v2664_v37  ;;  %v3185_v62 = vadd.f32 %v821_v23, %v2668_v38  ;;  %v3188_v32 = vadd.f32 %v938_v10, %v2676_v39  ;;  %v207_v35 = vpop.permute.xlu1 %206  ;;  %v209_v10 = vpop.permute.xlu0 %208  ;;  %s4057_s10 = sld [smem:[#allocation6 + $0x32]] }
 0x137   :  { %v3191_v33 = vadd.f32 %v354_v24, %v2680_v40  ;;  %v471_v19 = vmul.f32 %v2554_v14, %v205_v8  ;;  %v588_v36 = vmul.f32 %v2565_v17, %v205_v8  ;;  %v705_v20 = vmul.f32 %v2567_v18, %v205_v8 }
 0x138   :  { %v822_v21 = vmul.f32 %v2637_v31, %v205_v8  ;;  %v939_v37 = vmul.f32 %v2714_v47, %v205_v8  ;;  %v282_v38 = vmul.f32 %v2550_v12, %v207_v35  ;;  %v355_v54 = vmul.f32 %v2552_v13, %v207_v35 }
 0x139   :  { %5496 = vst [vmem:[#allocation95_spill] sm:$0xff] %v3191_v33  ;;  %v472_v39 = vmul.f32 %v2554_v14, %v207_v35  ;;  %1102 = vrot.lane.b32.xlu0 %v2522_v2, %s2315_s11  ;;  %v3204_v40 = vadd.f32 %v471_v19, %v2684_v41  ;;  %v3207_v22 = vadd.f32 %v588_v36, %v2688_v42 }
 0x13a   :  { %v3210_v23 = vadd.f32 %v705_v20, %v2696_v43  ;;  %v3213_v8 = vadd.f32 %v822_v21, %v2700_v44  ;;  %1100 = vrot.lane.b32.xlu1 %v2520_v1, %s2315_s11  ;;  %v3218_v24 = vadd.f32 %v939_v37, %v2704_v45  ;;  %v3221_v33 = vadd.f32 %v282_v38, %v2602_v25  ;;  %v211_v21 = vpop.permute.xlu1 %210 }
 0x13b   :  { %v3224_v41 = vadd.f32 %v355_v54, %v2606_v26  ;;  %v3227_v42 = vadd.f32 %v472_v39, %v2614_v27  ;;  %v589_v43 = vmul.f32 %v2565_v17, %v207_v35  ;;  %v706_v44 = vmul.f32 %v2567_v18, %v207_v35 }
 0x13c   :  { %v823_v19 = vmul.f32 %v2637_v31, %v207_v35  ;;  %v940_v36 = vmul.f32 %v2714_v47, %v207_v35  ;;  %v283_v45 = vmul.f32 %v2550_v12, %v209_v10  ;;  %v356_v20 = vmul.f32 %v2552_v13, %v209_v10 }
 0x13d   :  { %v473_v25 = vmul.f32 %v2554_v14, %v209_v10  ;;  %v590_v26 = vmul.f32 %v2565_v17, %v209_v10  ;;  %1106 = vrot.lane.b32.xlu0 %v2530_v4, %s2315_s11  ;;  %v3240_v27 = vadd.f32 %v589_v43, %v2618_v28  ;;  %v3243_v37 = vadd.f32 %v706_v44, %v2622_v29  ;;  %v213_v44 = vpop.permute.xlu0 %212 }
 0x13e   :  { %v3246_v35 = vadd.f32 %v823_v19, %v2626_v30  ;;  %v3249_v12 = vadd.f32 %v940_v36, %v2648_v34  ;;  %1104 = vrot.lane.b32.xlu1 %v2528_v3, %s2315_s11  ;;  %v3254_v38 = vadd.f32 %v283_v45, %v2707_v46  ;;  %v3257_v54 = vadd.f32 %v356_v20, %v2718_v48  ;;  %v5502_v45 = vld [vmem:[#allocation20_spill] sm:$0xff] }
 0x13f   :  { %v3260_v28 = vadd.f32 %v473_v25, %v2722_v49  ;;  %v3263_v29 = vadd.f32 %v590_v26, %v2726_v50  ;;  %v707_v30 = vmul.f32 %v2567_v18, %v209_v10  ;;  %v824_v34 = vmul.f32 %v2637_v31, %v209_v10  ;;  %v5503_v25 = vld [vmem:[#allocation21_spill] sm:$0xff] }
 0x140   :  { %v941_v39 = vmul.f32 %v2714_v47, %v209_v10  ;;  %v357_v43 = vmul.f32 %v2552_v13, %v211_v21  ;;  %v474_v46 = vmul.f32 %v2554_v14, %v211_v21  ;;  %v591_v48 = vmul.f32 %v2565_v17, %v211_v21  ;;  %v5501_v10 = vld [vmem:[#allocation15_spill] sm:$0xff] }
 0x141   :  { %v708_v19 = vmul.f32 %v2567_v18, %v211_v21  ;;  %v825_v49 = vmul.f32 %v2637_v31, %v211_v21  ;;  %1110 = vrot.lane.b32.xlu0 %v2514_v0, %s2316_s12  ;;  %v3276_v50 = vadd.f32 %v707_v30, %v2732_v51  ;;  %v3279_v36 = vadd.f32 %v824_v34, %v2736_v52  ;;  %v5497_v18 = vld [vmem:[#allocation16_spill] sm:$0xff]  ;;  %v5499_v51 = vld [vmem:[#allocation17_spill] sm:$0xff]  ;;  %v215_v30 = vpop.permute.xlu1 %214 }
 0x142   :  { %v3282_v13 = vadd.f32 %v941_v39, %v2740_v53  ;;  %v3285_v14 = vadd.f32 %v357_v43, %v2749_v55  ;;  %1108 = vrot.lane.b32.xlu1 %v2538_v5, %s2315_s11  ;;  %v3290_v17 = vadd.f32 %v474_v46, %v2753_v56  ;;  %v3293_v0 = vadd.f32 %v591_v48, %v2757_v57  ;;  %v5504_v56 = vld [vmem:[#allocation22_spill] sm:$0xff]  ;;  %v5505_v39 = vld [vmem:[#allocation24_spill] sm:$0xff]  ;;  %v5506_v43 = vld [vmem:[#allocation25_spill] sm:$0xff]  ;;  %s4059_s11 = sld [smem:[#allocation6 + $0x39]] }
 0x143   :  { %v3296_v31 = vadd.f32 %v708_v19, %v5497_v18  ;;  %v3299_v52 = vadd.f32 %v825_v49, %v5499_v51  ;;  %v942_v53 = vmul.f32 %v2714_v47, %v211_v21  ;;  %v290_v55 = vmul.f32 %v5501_v10, %v213_v44  ;;  %v5507_v48 = vld [vmem:[#allocation32_spill] sm:$0xff]  ;;  %v5508_v49 = vld [vmem:[#allocation18_spill] sm:$0xff]  ;;  %v5509_v21 = vld [vmem:[#allocation93_spill] sm:$0xff] }
 0x144   :  { %v366_v20 = vmul.f32 %v5502_v45, %v213_v44  ;;  %v483_v26 = vmul.f32 %v5503_v25, %v213_v44  ;;  %v600_v34 = vmul.f32 %v5504_v56, %v213_v44  ;;  %v717_v57 = vmul.f32 %v5505_v39, %v213_v44 }
 0x145   :  { %5498 = vst [vmem:[#allocation16_spill] sm:$0xff] %v3296_v31  ;;  %5500 = vst [vmem:[#allocation17_spill] sm:$0xff] %v3299_v52  ;;  %v834_v46 = vmul.f32 %v5506_v43, %v213_v44  ;;  %v951_v19 = vmul.f32 %v5507_v48, %v213_v44  ;;  %1114 = vrot.lane.b32.xlu0 %v2522_v2, %s2316_s12  ;;  %v3312_v47 = vadd.f32 %v942_v53, %v5508_v49  ;;  %v217_v31 = vpop.permute.xlu0 %216 }
 0x146   :  { %v3315_v18 = vadd.f32 %v290_v55, %v5509_v21  ;;  %v3318_v51 = vadd.f32 %v366_v20, %v3137_v15  ;;  %v3321_v52 = vadd.f32 %v483_v26, %v3140_v58  ;;  %1112 = vrot.lane.b32.xlu1 %v2520_v1, %s2316_s12  ;;  %v3326_v44 = vadd.f32 %v600_v34, %v3143_v11 }
 0x147   :  { %v3329_v2 = vadd.f32 %v717_v57, %v3146_v9  ;;  %v3332_v53 = vadd.f32 %v834_v46, %v3149_v6  ;;  %v3335_v55 = vadd.f32 %v951_v19, %v3152_v60  ;;  %v291_v15 = vmul.f32 %v5501_v10, %v215_v30  ;;  %v219_v19 = vpop.permute.xlu1 %218 }
 0x148   :  { %v367_v58 = vmul.f32 %v5502_v45, %v215_v30  ;;  %v484_v20 = vmul.f32 %v5503_v25, %v215_v30  ;;  %v601_v1 = vmul.f32 %v5504_v56, %v215_v30  ;;  %v718_v11 = vmul.f32 %v5505_v39, %v215_v30 }
 0x149   :  { %v835_v26 = vmul.f32 %v5506_v43, %v215_v30  ;;  %v952_v9 = vmul.f32 %v5507_v48, %v215_v30  ;;  %v368_v6 = vmul.f32 %v5502_v45, %v217_v31  ;;  %1118 = vrot.lane.b32.xlu0 %v2530_v4, %s2316_s12  ;;  %v3348_v60 = vadd.f32 %v291_v15, %v3168_v7 }
 0x14a   :  { %v3351_v34 = vadd.f32 %v367_v58, %v3171_v63  ;;  %v3354_v57 = vadd.f32 %v484_v20, %v3174_v59  ;;  %v3357_v46 = vadd.f32 %v601_v1, %v3177_v61  ;;  %1116 = vrot.lane.b32.xlu1 %v2528_v3, %s2316_s12  ;;  %v3362_v30 = vadd.f32 %v718_v11, %v3182_v16  ;;  %v5510_v63 = vld [vmem:[#allocation95_spill] sm:$0xff] }
 0x14b   :  { %v3365_v4 = vadd.f32 %v835_v26, %v3185_v62  ;;  %v3368_v7 = vadd.f32 %v952_v9, %v3188_v32  ;;  %v3371_v49 = vadd.f32 %v368_v6, %v5510_v63  ;;  %v485_v59 = vmul.f32 %v5503_v25, %v217_v31  ;;  %v221_v26 = vpop.permute.xlu0 %220 }
 0x14c   :  { %v602_v61 = vmul.f32 %v5504_v56, %v217_v31  ;;  %v719_v21 = vmul.f32 %v5505_v39, %v217_v31  ;;  %v836_v3 = vmul.f32 %v5506_v43, %v217_v31  ;;  %v953_v16 = vmul.f32 %v5507_v48, %v217_v31 }
 0x14d   :  { %v292_v15 = vmul.f32 %v5501_v10, %v219_v19  ;;  %v369_v62 = vmul.f32 %v5502_v45, %v219_v19  ;;  %v486_v32 = vmul.f32 %v5503_v25, %v219_v19  ;;  %v3382_v58 = vadd.f32 %v485_v59, %v3204_v40  ;;  %v223_v59 = vpop.permute.xlu1 %222 }
 0x14e   :  { %v3385_v20 = vadd.f32 %v602_v61, %v3207_v22  ;;  %v3388_v1 = vadd.f32 %v719_v21, %v3210_v23  ;;  %v3391_v11 = vadd.f32 %v836_v3, %v3213_v8  ;;  %1120 = vrot.lane.b32.xlu1 %v2538_v5, %s2316_s12  ;;  %v3396_v31 = vadd.f32 %v953_v16, %v3218_v24  ;;  %s4070_s12 = sld [smem:[#allocation6 + $0x40]] }
 0x14f   :  { %v3399_v9 = vadd.f32 %v292_v15, %v3221_v33  ;;  %v3402_v40 = vadd.f32 %v369_v62, %v3224_v41  ;;  %v3405_v22 = vadd.f32 %v486_v32, %v3227_v42  ;;  %v603_v23 = vmul.f32 %v5504_v56, %v219_v19  ;;  %v225_v62 = vpop.permute.xlu0 %224 }
 0x150   :  { %v720_v8 = vmul.f32 %v5505_v39, %v219_v19  ;;  %v837_v6 = vmul.f32 %v5506_v43, %v219_v19  ;;  %v954_v5 = vmul.f32 %v5507_v48, %v219_v19  ;;  %v293_v24 = vmul.f32 %v5501_v10, %v221_v26 }
 0x151   :  { %v370_v63 = vmul.f32 %v5502_v45, %v221_v26  ;;  %v487_v33 = vmul.f32 %v5503_v25, %v221_v26  ;;  %v604_v41 = vmul.f32 %v5504_v56, %v221_v26  ;;  %v3416_v42 = vadd.f32 %v603_v23, %v3240_v27 }
 0x152   :  { %v3419_v61 = vadd.f32 %v720_v8, %v3243_v37  ;;  %v3422_v21 = vadd.f32 %v837_v6, %v3246_v35  ;;  %v3425_v19 = vadd.f32 %v954_v5, %v3249_v12  ;;  %v3428_v10 = vadd.f32 %v293_v24, %v3254_v38  ;;  %v5513_v6 = vld [vmem:[#allocation44_spill] sm:$0xff] }
 0x153   :  { %v3431_v3 = vadd.f32 %v370_v63, %v3257_v54  ;;  %v3434_v16 = vadd.f32 %v487_v33, %v3260_v28  ;;  %v3437_v27 = vadd.f32 %v604_v41, %v3263_v29  ;;  %v721_v37 = vmul.f32 %v5505_v39, %v221_v26  ;;  %v5514_v5 = vld [vmem:[#allocation48_spill] sm:$0xff]  ;;  %v227_v33 = vpop.permute.xlu1 %226 }
 0x154   :  { %v838_v35 = vmul.f32 %v5506_v43, %v221_v26  ;;  %v955_v15 = vmul.f32 %v5507_v48, %v221_v26  ;;  %v371_v12 = vmul.f32 %v5502_v45, %v223_v59  ;;  %v488_v38 = vmul.f32 %v5503_v25, %v223_v59 }
 0x155   :  { %v605_v54 = vmul.f32 %v5504_v56, %v223_v59  ;;  %v722_v32 = vmul.f32 %v5505_v39, %v223_v59  ;;  %v839_v28 = vmul.f32 %v5506_v43, %v223_v59  ;;  %v3448_v29 = vadd.f32 %v721_v37, %v3276_v50  ;;  %v5511_v39 = vld [vmem:[#allocation16_spill] sm:$0xff]  ;;  %v5512_v50 = vld [vmem:[#allocation17_spill] sm:$0xff] }
 0x156   :  { %v3451_v23 = vadd.f32 %v838_v35, %v3279_v36  ;;  %v3454_v8 = vadd.f32 %v955_v15, %v3282_v13  ;;  %v3457_v45 = vadd.f32 %v371_v12, %v3285_v14  ;;  %v3460_v25 = vadd.f32 %v488_v38, %v3290_v17  ;;  %v5515_v14 = vld [vmem:[#allocation49_spill] sm:$0xff]  ;;  %v5516_v17 = vld [vmem:[#allocation52_spill] sm:$0xff] }
 0x157   :  { %v3463_v56 = vadd.f32 %v605_v54, %v3293_v0  ;;  %v3466_v43 = vadd.f32 %v722_v32, %v5511_v39  ;;  %v3469_v26 = vadd.f32 %v839_v28, %v5512_v50  ;;  %v956_v36 = vmul.f32 %v5507_v48, %v223_v59  ;;  %v5517_v37 = vld [vmem:[#allocation53_spill] sm:$0xff]  ;;  %v5518_v35 = vld [vmem:[#allocation56_spill] sm:$0xff]  ;;  %v229_v28 = vpop.permute.xlu0 %228 }
 0x158   :  { %v300_v13 = vmul.f32 %v5513_v6, %v225_v62  ;;  %v380_v24 = vmul.f32 %v5514_v5, %v225_v62  ;;  %v497_v63 = vmul.f32 %v5515_v14, %v225_v62  ;;  %v614_v41 = vmul.f32 %v5516_v17, %v225_v62  ;;  %v5519_v12 = vld [vmem:[#allocation64_spill] sm:$0xff] }
 0x159   :  { %v731_v0 = vmul.f32 %v5517_v37, %v225_v62  ;;  %v848_v15 = vmul.f32 %v5518_v35, %v225_v62  ;;  %v965_v38 = vmul.f32 %v5519_v12, %v225_v62  ;;  %v3480_v54 = vadd.f32 %v956_v36, %v3312_v47 }
 0x15a   :  { %v3483_v48 = vadd.f32 %v300_v13, %v3315_v18  ;;  %v3486_v59 = vadd.f32 %v380_v24, %v3318_v51  ;;  %v3489_v32 = vadd.f32 %v497_v63, %v3321_v52  ;;  %v3492_v39 = vadd.f32 %v614_v41, %v3326_v44 }
 0x15b   :  { %v3495_v50 = vadd.f32 %v731_v0, %v3329_v2  ;;  %v3498_v62 = vadd.f32 %v848_v15, %v3332_v53  ;;  %v3501_v47 = vadd.f32 %v965_v38, %v3335_v55  ;;  %v301_v18 = vmul.f32 %v5513_v6, %v227_v33  ;;  %v231_v0 = vpop.permute.xlu1 %230 }
 0x15c   :  { %v381_v51 = vmul.f32 %v5514_v5, %v227_v33  ;;  %v498_v52 = vmul.f32 %v5515_v14, %v227_v33  ;;  %v615_v36 = vmul.f32 %v5516_v17, %v227_v33  ;;  %v732_v44 = vmul.f32 %v5517_v37, %v227_v33 }
 0x15d   :  { %v849_v13 = vmul.f32 %v5518_v35, %v227_v33  ;;  %v966_v2 = vmul.f32 %v5519_v12, %v227_v33  ;;  %v382_v53 = vmul.f32 %v5514_v5, %v229_v28  ;;  %v3512_v24 = vadd.f32 %v301_v18, %v3348_v60 }
 0x15e   :  { %v3515_v55 = vadd.f32 %v381_v51, %v3351_v34  ;;  %v3518_v63 = vadd.f32 %v498_v52, %v3354_v57  ;;  %v3521_v41 = vadd.f32 %v615_v36, %v3357_v46  ;;  %v3524_v15 = vadd.f32 %v732_v44, %v3362_v30 }
 0x15f   :  { %v3527_v33 = vadd.f32 %v849_v13, %v3365_v4  ;;  %v3530_v38 = vadd.f32 %v966_v2, %v3368_v7  ;;  %v3533_v60 = vadd.f32 %v382_v53, %v3371_v49  ;;  %v499_v34 = vmul.f32 %v5515_v14, %v229_v28  ;;  %v233_v13 = vpop.permute.xlu0 %232 }
 0x160   :  { %v616_v57 = vmul.f32 %v5516_v17, %v229_v28  ;;  %v733_v46 = vmul.f32 %v5517_v37, %v229_v28  ;;  %v850_v18 = vmul.f32 %v5518_v35, %v229_v28  ;;  %v967_v30 = vmul.f32 %v5519_v12, %v229_v28 }
 0x161   :  { %v302_v51 = vmul.f32 %v5513_v6, %v231_v0  ;;  %v383_v4 = vmul.f32 %v5514_v5, %v231_v0  ;;  %v500_v7 = vmul.f32 %v5515_v14, %v231_v0  ;;  %v3544_v52 = vadd.f32 %v499_v34, %v3382_v58 }
 0x162   :  { %v3547_v49 = vadd.f32 %v616_v57, %v3385_v20  ;;  %v3550_v36 = vadd.f32 %v733_v46, %v3388_v1  ;;  %v3553_v44 = vadd.f32 %v850_v18, %v3391_v11  ;;  %v3556_v28 = vadd.f32 %v967_v30, %v3396_v31  ;;  %v235_v46 = vpop.permute.xlu1 %234 }
 0x163   :  { %v3559_v2 = vadd.f32 %v302_v51, %v3399_v9  ;;  %v3562_v53 = vadd.f32 %v383_v4, %v3402_v40  ;;  %v3565_v58 = vadd.f32 %v500_v7, %v3405_v22  ;;  %v617_v20 = vmul.f32 %v5516_v17, %v231_v0 }
 0x164   :  { %v734_v1 = vmul.f32 %v5517_v37, %v231_v0  ;;  %v851_v11 = vmul.f32 %v5518_v35, %v231_v0  ;;  %v968_v34 = vmul.f32 %v5519_v12, %v231_v0  ;;  %v303_v31 = vmul.f32 %v5513_v6, %v233_v13 }
 0x165   :  { %v384_v57 = vmul.f32 %v5514_v5, %v233_v13  ;;  %v501_v9 = vmul.f32 %v5515_v14, %v233_v13  ;;  %v618_v40 = vmul.f32 %v5516_v17, %v233_v13  ;;  %v3576_v22 = vadd.f32 %v617_v20, %v3416_v42  ;;  %v237_v20 = vpop.permute.xlu0 %236 }
 0x166   :  { %v3579_v18 = vadd.f32 %v734_v1, %v3419_v61  ;;  %v3582_v30 = vadd.f32 %v851_v11, %v3422_v21  ;;  %v3585_v0 = vadd.f32 %v968_v34, %v3425_v19  ;;  %v3588_v6 = vadd.f32 %v303_v31, %v3428_v10 }
 0x167   :  { %v3591_v51 = vadd.f32 %v384_v57, %v3431_v3  ;;  %v3594_v4 = vadd.f32 %v501_v9, %v3434_v16  ;;  %v3597_v42 = vadd.f32 %v618_v40, %v3437_v27  ;;  %v735_v61 = vmul.f32 %v5517_v37, %v233_v13  ;;  %v239_v9 = vpop.permute.xlu1 %238 }
 0x168   :  { %v852_v21 = vmul.f32 %v5518_v35, %v233_v13  ;;  %v969_v7 = vmul.f32 %v5519_v12, %v233_v13  ;;  %v385_v19 = vmul.f32 %v5514_v5, %v235_v46  ;;  %v502_v10 = vmul.f32 %v5515_v14, %v235_v46  ;;  %v5521_v13 = vld [vmem:[#allocation69_spill] sm:$0xff] }
 0x169   :  { %v619_v3 = vmul.f32 %v5516_v17, %v235_v46  ;;  %v736_v1 = vmul.f32 %v5517_v37, %v235_v46  ;;  %v853_v16 = vmul.f32 %v5518_v35, %v235_v46  ;;  %v3608_v27 = vadd.f32 %v735_v61, %v3448_v29  ;;  %v5520_v35 = vld [vmem:[#allocation68_spill] sm:$0xff]  ;;  %v5524_v61 = vld [vmem:[#allocation74_spill] sm:$0xff] }
 0x16a   :  { %v3611_v11 = vadd.f32 %v852_v21, %v3451_v23  ;;  %v3614_v34 = vadd.f32 %v969_v7, %v3454_v8  ;;  %v3617_v5 = vadd.f32 %v385_v19, %v3457_v45  ;;  %v3620_v14 = vadd.f32 %v502_v10, %v3460_v25  ;;  %v5522_v45 = vld [vmem:[#allocation72_spill] sm:$0xff]  ;;  %v5523_v25 = vld [vmem:[#allocation73_spill] sm:$0xff]  ;;  %v5525_v21 = vld [vmem:[#allocation75_spill] sm:$0xff] }
 0x16b   :  { %v3623_v17 = vadd.f32 %v619_v3, %v3463_v56  ;;  %v3626_v37 = vadd.f32 %v736_v1, %v3466_v43  ;;  %v3629_v29 = vadd.f32 %v853_v16, %v3469_v26  ;;  %v970_v23 = vmul.f32 %v5519_v12, %v235_v46  ;;  %v5526_v43 = vld [vmem:[#allocation76_spill] sm:$0xff]  ;;  %v241_v3 = vpop.permute.xlu0 %240 }
 0x16c   :  { %v310_v8 = vmul.f32 %v5520_v35, %v237_v20  ;;  %v394_v31 = vmul.f32 %v5521_v13, %v237_v20  ;;  %v511_v57 = vmul.f32 %v5522_v45, %v237_v20  ;;  %v628_v40 = vmul.f32 %v5523_v25, %v237_v20 }
 0x16d   :  { %v745_v56 = vmul.f32 %v5524_v61, %v237_v20  ;;  %v862_v7 = vmul.f32 %v5525_v21, %v237_v20  ;;  %v979_v19 = vmul.f32 %v5526_v43, %v237_v20  ;;  %v3640_v26 = vadd.f32 %v970_v23, %v3480_v54 }
 0x16e   :  { %v3643_v12 = vadd.f32 %v310_v8, %v3483_v48  ;;  %v3646_v46 = vadd.f32 %v394_v31, %v3486_v59  ;;  %v3649_v10 = vadd.f32 %v511_v57, %v3489_v32  ;;  %v3652_v1 = vadd.f32 %v628_v40, %v3492_v39 }
 0x16f   :  { %v3655_v16 = vadd.f32 %v745_v56, %v3495_v50  ;;  %v3658_v20 = vadd.f32 %v862_v7, %v3498_v62  ;;  %v3661_v54 = vadd.f32 %v979_v19, %v3501_v47  ;;  %v311_v48 = vmul.f32 %v5520_v35, %v239_v9  ;;  %v243_v56 = vpop.permute.xlu1 %242 }
 0x170   :  { %v395_v59 = vmul.f32 %v5521_v13, %v239_v9  ;;  %v512_v32 = vmul.f32 %v5522_v45, %v239_v9  ;;  %v629_v23 = vmul.f32 %v5523_v25, %v239_v9  ;;  %v746_v39 = vmul.f32 %v5524_v61, %v239_v9 }
 0x171   :  { %v863_v8 = vmul.f32 %v5525_v21, %v239_v9  ;;  %v980_v50 = vmul.f32 %v5526_v43, %v239_v9  ;;  %v396_v62 = vmul.f32 %v5521_v13, %v241_v3  ;;  %v3672_v31 = vadd.f32 %v311_v48, %v3512_v24 }
 0x172   :  { %v3675_v47 = vadd.f32 %v395_v59, %v3515_v55  ;;  %v3678_v57 = vadd.f32 %v512_v32, %v3518_v63  ;;  %v3681_v40 = vadd.f32 %v629_v23, %v3521_v41  ;;  %v3684_v7 = vadd.f32 %v746_v39, %v3524_v15 }
 0x173   :  { %v3687_v9 = vadd.f32 %v863_v8, %v3527_v33  ;;  %v3690_v19 = vadd.f32 %v980_v50, %v3530_v38  ;;  %v3693_v24 = vadd.f32 %v396_v62, %v3533_v60  ;;  %v513_v55 = vmul.f32 %v5522_v45, %v241_v3  ;;  %v245_v8 = vpop.permute.xlu0 %244 }
 0x174   :  { %v630_v63 = vmul.f32 %v5523_v25, %v241_v3  ;;  %v747_v41 = vmul.f32 %v5524_v61, %v241_v3  ;;  %v864_v48 = vmul.f32 %v5525_v21, %v241_v3  ;;  %v981_v15 = vmul.f32 %v5526_v43, %v241_v3 }
 0x175   :  { %v312_v59 = vmul.f32 %v5520_v35, %v243_v56  ;;  %v397_v33 = vmul.f32 %v5521_v13, %v243_v56  ;;  %v514_v38 = vmul.f32 %v5522_v45, %v243_v56  ;;  %v3704_v32 = vadd.f32 %v513_v55, %v3544_v52 }
 0x176   :  { %v3707_v60 = vadd.f32 %v630_v63, %v3547_v49  ;;  %v3710_v23 = vadd.f32 %v747_v41, %v3550_v36  ;;  %v3713_v39 = vadd.f32 %v864_v48, %v3553_v44  ;;  %v3716_v3 = vadd.f32 %v981_v15, %v3556_v28  ;;  %v247_v41 = vpop.permute.xlu1 %246 }
 0x177   :  { %v3719_v50 = vadd.f32 %v312_v59, %v3559_v2  ;;  %v3722_v62 = vadd.f32 %v397_v33, %v3562_v53  ;;  %v3725_v52 = vadd.f32 %v514_v38, %v3565_v58  ;;  %v631_v49 = vmul.f32 %v5523_v25, %v243_v56 }
 0x178   :  { %v748_v36 = vmul.f32 %v5524_v61, %v243_v56  ;;  %v865_v44 = vmul.f32 %v5525_v21, %v243_v56  ;;  %v982_v55 = vmul.f32 %v5526_v43, %v243_v56  ;;  %v313_v28 = vmul.f32 %v5520_v35, %v245_v8 }
 0x179   :  { %v398_v63 = vmul.f32 %v5521_v13, %v245_v8  ;;  %v515_v2 = vmul.f32 %v5522_v45, %v245_v8  ;;  %v632_v53 = vmul.f32 %v5523_v25, %v245_v8  ;;  %v3736_v58 = vadd.f32 %v631_v49, %v3576_v22  ;;  %v249_v49 = vpop.permute.xlu0 %248 }
 0x17a   :  { %v3739_v48 = vadd.f32 %v748_v36, %v3579_v18  ;;  %v3742_v15 = vadd.f32 %v865_v44, %v3582_v30  ;;  %v3745_v56 = vadd.f32 %v982_v55, %v3585_v0  ;;  %v3748_v35 = vadd.f32 %v313_v28, %v3588_v6 }
 0x17b   :  { %v3751_v59 = vadd.f32 %v398_v63, %v3591_v51  ;;  %v3754_v33 = vadd.f32 %v515_v2, %v3594_v4  ;;  %v3757_v22 = vadd.f32 %v632_v53, %v3597_v42  ;;  %v749_v18 = vmul.f32 %v5524_v61, %v245_v8  ;;  %v251_v2 = vpop.permute.xlu1 %250 }
 0x17c   :  { %v866_v30 = vmul.f32 %v5525_v21, %v245_v8  ;;  %v983_v38 = vmul.f32 %v5526_v43, %v245_v8  ;;  %v399_v0 = vmul.f32 %v5521_v13, %v247_v41  ;;  %v516_v6 = vmul.f32 %v5522_v45, %v247_v41  ;;  %v5528_v8 = vld [vmem:[#allocation78_spill] sm:$0xff] }
 0x17d   :  { %v633_v51 = vmul.f32 %v5523_v25, %v247_v41  ;;  %v750_v36 = vmul.f32 %v5524_v61, %v247_v41  ;;  %v867_v4 = vmul.f32 %v5525_v21, %v247_v41  ;;  %v3768_v42 = vadd.f32 %v749_v18, %v3608_v27  ;;  %v5527_v21 = vld [vmem:[#allocation77_spill] sm:$0xff] }
 0x17e   :  { %v3771_v44 = vadd.f32 %v866_v30, %v3611_v11  ;;  %v3774_v55 = vadd.f32 %v983_v38, %v3614_v34  ;;  %v3777_v13 = vadd.f32 %v399_v0, %v3617_v5  ;;  %v3780_v45 = vadd.f32 %v516_v6, %v3620_v14  ;;  %v5529_v5 = vld [vmem:[#allocation79_spill] sm:$0xff]  ;;  %v5530_v14 = vld [vmem:[#allocation80_spill] sm:$0xff]  ;;  %v5531_v18 = vld [vmem:[#allocation81_spill] sm:$0xff] }
 0x17f   :  { %v3783_v25 = vadd.f32 %v633_v51, %v3623_v17  ;;  %v3786_v61 = vadd.f32 %v750_v36, %v3626_v37  ;;  %v3789_v27 = vadd.f32 %v867_v4, %v3629_v29  ;;  %v984_v11 = vmul.f32 %v5526_v43, %v247_v41  ;;  %v5532_v30 = vld [vmem:[#allocation84_spill] sm:$0xff]  ;;  %v5533_v37 = vld [vmem:[#allocation85_spill] sm:$0xff]  ;;  %v253_v51 = vpop.permute.xlu0 %252 }
 0x180   :  { %v320_v34 = vmul.f32 %v5527_v21, %v249_v49  ;;  %v408_v28 = vmul.f32 %v5528_v8, %v249_v49  ;;  %v525_v63 = vmul.f32 %v5529_v5, %v249_v49  ;;  %v642_v53 = vmul.f32 %v5530_v14, %v249_v49 }
 0x181   :  { %v759_v17 = vmul.f32 %v5531_v18, %v249_v49  ;;  %v876_v38 = vmul.f32 %v5532_v30, %v249_v49  ;;  %v993_v0 = vmul.f32 %v5533_v37, %v249_v49  ;;  %v3800_v29 = vadd.f32 %v984_v11, %v3640_v26 }
 0x182   :  { %v3803_v43 = vadd.f32 %v320_v34, %v3643_v12  ;;  %v3806_v41 = vadd.f32 %v408_v28, %v3646_v46  ;;  %v3809_v6 = vadd.f32 %v525_v63, %v3649_v10  ;;  %v3812_v36 = vadd.f32 %v642_v53, %v3652_v1 }
 0x183   :  { %v3815_v4 = vadd.f32 %v759_v17, %v3655_v16  ;;  %v3818_v49 = vadd.f32 %v876_v38, %v3658_v20  ;;  %v3821_v26 = vadd.f32 %v993_v0, %v3661_v54  ;;  %v321_v12 = vmul.f32 %v5527_v21, %v251_v2  ;;  %v255_v17 = vpop.permute.xlu1 %254 }
 0x184   :  { %v409_v46 = vmul.f32 %v5528_v8, %v251_v2  ;;  %v526_v10 = vmul.f32 %v5529_v5, %v251_v2  ;;  %v643_v11 = vmul.f32 %v5530_v14, %v251_v2  ;;  %v760_v1 = vmul.f32 %v5531_v18, %v251_v2 }
 0x185   :  { %v877_v34 = vmul.f32 %v5532_v30, %v251_v2  ;;  %v994_v16 = vmul.f32 %v5533_v37, %v251_v2  ;;  %v410_v20 = vmul.f32 %v5528_v8, %v253_v51  ;;  %v3832_v28 = vadd.f32 %v321_v12, %v3672_v31 }
 0x186   :  { %v3835_v54 = vadd.f32 %v409_v46, %v3675_v47  ;;  %v3838_v63 = vadd.f32 %v526_v10, %v3678_v57  ;;  %v3841_v53 = vadd.f32 %v643_v11, %v3681_v40  ;;  %v3844_v38 = vadd.f32 %v760_v1, %v3684_v7 }
 0x187   :  { %v3847_v2 = vadd.f32 %v877_v34, %v3687_v9  ;;  %v3850_v0 = vadd.f32 %v994_v16, %v3690_v19  ;;  %v3853_v31 = vadd.f32 %v410_v20, %v3693_v24  ;;  %v527_v47 = vmul.f32 %v5529_v5, %v253_v51  ;;  %v257_v34 = vpop.permute.xlu0 %256 }
 0x188   :  { %v644_v57 = vmul.f32 %v5530_v14, %v253_v51  ;;  %v761_v40 = vmul.f32 %v5531_v18, %v253_v51  ;;  %v878_v12 = vmul.f32 %v5532_v30, %v253_v51  ;;  %v995_v7 = vmul.f32 %v5533_v37, %v253_v51 }
 0x189   :  { %v322_v46 = vmul.f32 %v5527_v21, %v255_v17  ;;  %v411_v9 = vmul.f32 %v5528_v8, %v255_v17  ;;  %v528_v19 = vmul.f32 %v5529_v5, %v255_v17  ;;  %v3864_v10 = vadd.f32 %v527_v47, %v3704_v32 }
 0x18a   :  { %v3867_v24 = vadd.f32 %v644_v57, %v3707_v60  ;;  %v3870_v11 = vadd.f32 %v761_v40, %v3710_v23  ;;  %v3873_v1 = vadd.f32 %v878_v12, %v3713_v39  ;;  %v3876_v51 = vadd.f32 %v995_v7, %v3716_v3  ;;  %v259_v40 = vpop.permute.xlu1 %258 }
 0x18b   :  { %v3879_v16 = vadd.f32 %v322_v46, %v3719_v50  ;;  %v3882_v20 = vadd.f32 %v411_v9, %v3722_v62  ;;  %v3885_v32 = vadd.f32 %v528_v19, %v3725_v52  ;;  %v645_v60 = vmul.f32 %v5530_v14, %v255_v17 }
 0x18c   :  { %v762_v23 = vmul.f32 %v5531_v18, %v255_v17  ;;  %v879_v39 = vmul.f32 %v5532_v30, %v255_v17  ;;  %v996_v47 = vmul.f32 %v5533_v37, %v255_v17  ;;  %v323_v3 = vmul.f32 %v5527_v21, %v257_v34 }
 0x18d   :  { %v412_v57 = vmul.f32 %v5528_v8, %v257_v34  ;;  %v529_v50 = vmul.f32 %v5529_v5, %v257_v34  ;;  %v646_v62 = vmul.f32 %v5530_v14, %v257_v34  ;;  %v3896_v52 = vadd.f32 %v645_v60, %v3736_v58 }
 0x18e   :  { %v3899_v12 = vadd.f32 %v762_v23, %v3739_v48  ;;  %v3902_v7 = vadd.f32 %v879_v39, %v3742_v15  ;;  %v3905_v17 = vadd.f32 %v996_v47, %v3745_v56  ;;  %v3908_v21 = vadd.f32 %v323_v3, %v3748_v35  ;;  %v261_v23 = vpop.permute.xlu0 %260 }
 0x18f   :  { %v3911_v46 = vadd.f32 %v412_v57, %v3751_v59  ;;  %v3914_v9 = vadd.f32 %v529_v50, %v3754_v33  ;;  %v3917_v58 = vadd.f32 %v646_v62, %v3757_v22  ;;  %v763_v48 = vmul.f32 %v5531_v18, %v257_v34  ;;  %v5539_v50 = vld [vmem:[#allocation89_spill] sm:$0xff]  ;;  %v5540_v62 = vld [vmem:[#allocation90_spill] sm:$0xff] }
 0x190   :  { %v880_v15 = vmul.f32 %v5532_v30, %v257_v34  ;;  %v997_v19 = vmul.f32 %v5533_v37, %v257_v34  ;;  %v413_v56 = vmul.f32 %v5528_v8, %v259_v40  ;;  %v530_v35 = vmul.f32 %v5529_v5, %v259_v40  ;;  %v5537_v34 = vld [vmem:[#allocation87_spill] sm:$0xff] }
 0x191   :  { %v647_v60 = vmul.f32 %v5530_v14, %v259_v40  ;;  %v764_v59 = vmul.f32 %v5531_v18, %v259_v40  ;;  %v881_v33 = vmul.f32 %v5532_v30, %v259_v40  ;;  %v3928_v22 = vadd.f32 %v763_v48, %v3768_v42  ;;  %v5536_v30 = vld [vmem:[#allocation86_spill] sm:$0xff] }
 0x192   :  { %v3931_v39 = vadd.f32 %v880_v15, %v3771_v44  ;;  %v3934_v47 = vadd.f32 %v997_v19, %v3774_v55  ;;  %v3937_v8 = vadd.f32 %v413_v56, %v3777_v13  ;;  %v3940_v5 = vadd.f32 %v530_v35, %v3780_v45  ;;  %v5538_v13 = vld [vmem:[#allocation88_spill] sm:$0xff] }
 0x193   :  { %v3943_v14 = vadd.f32 %v647_v60, %v3783_v25  ;;  %v3946_v18 = vadd.f32 %v764_v59, %v3786_v61  ;;  %v3949_v42 = vadd.f32 %v881_v33, %v3789_v27  ;;  %v998_v44 = vmul.f32 %v5533_v37, %v259_v40  ;;  %v5541_v25 = vld [vmem:[#allocation91_spill] sm:$0xff]  ;;  %v5542_v19 = vld [vmem:[#allocation92_spill] sm:$0xff]  ;;  %v263_v27 = vpop.permute.xlu1 %262 }
 0x194   :  { %v330_v55 = vmul.f32 %v5536_v30, %v261_v23  ;;  %v422_v3 = vmul.f32 %v5537_v34, %v261_v23  ;;  %v539_v57 = vmul.f32 %v5538_v13, %v261_v23  ;;  %v656_v45 = vmul.f32 %v5539_v50, %v261_v23 }
 0x195   :  { %5534 = vst [vmem:[#allocation15_spill] sm:$0xff] %v3946_v18  ;;  %5535 = vst [vmem:[#allocation20_spill] sm:$0xff] %v3949_v42  ;;  %v773_v48 = vmul.f32 %v5540_v62, %v261_v23  ;;  %v890_v15 = vmul.f32 %v5541_v25, %v261_v23  ;;  %v1007_v61 = vmul.f32 %v5542_v19, %v261_v23  ;;  %v5545_v42 = vld [vmem:[#allocation94_spill] sm:$0xff] }
 0x196   :  { %v3960_v37 = vadd.f32 %v998_v44, %v3800_v29  ;;  %v334_v40 = vadd.f32 %v330_v55, %v3803_v43  ;;  %v428_v56 = vadd.f32 %v422_v3, %v3806_v41  ;;  %v545_v35 = vadd.f32 %v539_v57, %v3809_v6  ;;  %v265_v44 = vpop.permute.xlu0 %264 }
 0x197   :  { %v662_v60 = vadd.f32 %v656_v45, %v3812_v36  ;;  %v779_v59 = vadd.f32 %v773_v48, %v3815_v4  ;;  %v896_v33 = vadd.f32 %v890_v15, %v3818_v49  ;;  %v3969_v23 = vadd.f32 %v1007_v61, %v3821_v26 }
 0x198   :  { %5543 = vst [vmem:[#allocation21_spill] sm:$0xff] %v3960_v37  ;;  %v338_v18 = vadd.f32 %v334_v40, %v5545_v42  ;;  %v441_v29 = vrot.slane %v428_v56, 1  ;;  %v331_v43 = vmul.f32 %v5536_v30, %v263_v27  ;;  %v558_v41 = vrot.slane %v545_v35, 2 }
 0x199   :  { %5544 = vst [vmem:[#allocation22_spill] sm:$0xff] %v3969_v23  ;;  %v675_v55 = vrot.slane %v662_v60, 3  ;;  %v792_v6 = vrot.slane %v779_v59, 4  ;;  %v909_v3 = vrot.slane %v896_v33, 5  ;;  %v423_v4 = vmul.f32 %v5537_v34, %v263_v27 }
 0x19a   :  { %v335_v36 = vadd.f32 %v331_v43, %v3832_v28  ;;  %v540_v49 = vmul.f32 %v5538_v13, %v263_v27  ;;  %v657_v26 = vmul.f32 %v5539_v50, %v263_v27  ;;  %v774_v57 = vmul.f32 %v5540_v62, %v263_v27 }
 0x19b   :  { %v891_v45 = vmul.f32 %v5541_v25, %v263_v27  ;;  %v1008_v48 = vmul.f32 %v5542_v19, %v263_v27  ;;  %v424_v15 = vmul.f32 %v5537_v34, %v265_v44  ;;  %v429_v40 = vadd.f32 %v423_v4, %v3835_v54 }
 0x19c   :  { %v339_v61 = vadd.f32 %v335_v36, %v5545_v42  ;;  %v546_v28 = vadd.f32 %v540_v49, %v3838_v63  ;;  %v663_v56 = vadd.f32 %v657_v26, %v3841_v53  ;;  %v780_v35 = vadd.f32 %v774_v57, %v3844_v38  ;;  %v267_v49 = vpop.permute.xlu1 %266 }
 0x19d   :  { %v897_v60 = vadd.f32 %v891_v45, %v3847_v2  ;;  %v3988_v59 = vadd.f32 %v1008_v48, %v3850_v0  ;;  %v430_v33 = vadd.f32 %v424_v15, %v3853_v31  ;;  %v442_v27 = vrot.slane %v429_v40, 1 }
 0x19e   :  { %v559_v43 = vrot.slane %v546_v28, 2  ;;  %v676_v23 = vrot.slane %v663_v56, 3  ;;  %v541_v36 = vmul.f32 %v5538_v13, %v265_v44  ;;  %v793_v37 = vrot.slane %v780_v35, 4 }
 0x19f   :  { %5546 = vst [vmem:[#allocation24_spill] sm:$0xff] %v3988_v59  ;;  %v910_v54 = vrot.slane %v897_v60, 5  ;;  %v5409_v63 = vrot.slane %v3988_v59, 6  ;;  %v444_v4 = vrot.slane %v430_v33, 1  ;;  %v443_v53 = vsel %vm440_vm4, %v441_v29, %v442_v27 }
 0x1a0   :  { %v560_v38 = vsel %vm557_vm5, %v558_v41, %v559_v43  ;;  %v677_v2 = vsel %vm674_vm6, %v675_v55, %v676_v23  ;;  %v547_v0 = vadd.f32 %v541_v36, %v3864_v10  ;;  %v455_v31 = vadd.f32 %v443_v53, %v338_v18 }
 0x1a1   :  { %v794_v26 = vsel %vm791_vm7, %v792_v6, %v793_v37  ;;  %v3999_v57 = vsel %vm908_vm8, %v909_v3, %v910_v54  ;;  %v445_v45 = vsel %vm440_vm4, %v442_v27, %v444_v4  ;;  %v658_v40 = vmul.f32 %v5539_v50, %v265_v44 }
 0x1a2   :  { %5547 = vst [vmem:[#allocation25_spill] sm:$0xff] %v3999_v57  ;;  %v456_v48 = vadd.f32 %v445_v45, %v339_v61  ;;  %v561_v15 = vrot.slane %v547_v0, 2  ;;  %v775_v29 = vmul.f32 %v5540_v62, %v265_v44  ;;  %v572_v41 = vadd.f32 %v560_v38, %v455_v31  ;;  %v4020_v0 = vld [vmem:[#allocation4 + $0x58] sm:$0x3f] }
 0x1a3   :  { %v892_v55 = vmul.f32 %v5541_v25, %v265_v44  ;;  %v1009_v10 = vmul.f32 %v5542_v19, %v265_v44  ;;  %v332_v18 = vmul.f32 %v5536_v30, %v267_v49  ;;  %v664_v3 = vadd.f32 %v658_v40, %v3867_v24 }
 0x1a4   :  { %v562_v6 = vsel %vm557_vm5, %v559_v43, %v561_v15  ;;  %v781_v28 = vadd.f32 %v775_v29, %v3870_v11  ;;  %v425_v61 = vmul.f32 %v5537_v34, %v267_v49  ;;  %v689_v56 = vadd.f32 %v677_v2, %v572_v41 }
 0x1a5   :  { %v573_v35 = vadd.f32 %v562_v6, %v456_v48  ;;  %v898_v60 = vadd.f32 %v892_v55, %v3873_v1  ;;  %v1015_v33 = vadd.f32 %v1009_v10, %v3876_v51  ;;  %v678_v27 = vrot.slane %v664_v3, 3  ;;  %v269_v1 = vpop.permute.xlu0 %268  ;;  %v5549_v51 = vld [vmem:[#allocation19_spill] sm:$0xff] }
 0x1a6   :  { %v795_v36 = vrot.slane %v781_v28, 4  ;;  %v336_v44 = vadd.f32 %v332_v18, %v3879_v16  ;;  %v4014_v4 = vadd.f32 %v794_v26, %v689_v56  ;;  %v542_v24 = vmul.f32 %v5538_v13, %v267_v49 }
 0x1a7   :  { %v912_v43 = vrot.slane %v898_v60, 5  ;;  %v1029_v53 = vrot.slane %v1015_v33, 6  ;;  %v679_v11 = vsel %vm674_vm6, %v676_v23, %v678_v27  ;;  %v431_v2 = vadd.f32 %v425_v61, %v3882_v20  ;;  %v271_v60 = vpop.permute.xlu1 %270 }
 0x1a8   :  { %5548 = vst [vmem:[#allocation32_spill] sm:$0xff] %v4014_v4  ;;  %v796_v38 = vsel %vm791_vm7, %v793_v37, %v795_v36  ;;  %v4024_v31 = vmul.f32 %v4020_v0, %v5549_v51  ;;  %v690_v16 = vadd.f32 %v679_v11, %v573_v35  ;;  %v548_v23 = vadd.f32 %v542_v24, %v3885_v32 }
 0x1a9   :  { %v913_v26 = vsel %vm908_vm8, %v910_v54, %v912_v43  ;;  %v1030_v45 = vsel %vm1025_vm9, %v5409_v63, %v1029_v53  ;;  %v659_v37 = vmul.f32 %v5539_v50, %v267_v49  ;;  %v776_v20 = vmul.f32 %v5540_v62, %v267_v49 }
 0x1aa   :  { %v893_v48 = vmul.f32 %v5541_v25, %v267_v49  ;;  %v1010_v15 = vmul.f32 %v5542_v19, %v267_v49  ;;  %v807_v40 = vadd.f32 %v796_v38, %v690_v16  ;;  %v340_v29 = vadd.f32 %v336_v44, %v5545_v42 }
 0x1ab   :  { %v333_v41 = vmul.f32 %v5536_v30, %v269_v1  ;;  %v426_v54 = vmul.f32 %v5537_v34, %v269_v1  ;;  %v665_v55 = vadd.f32 %v659_v37, %v3896_v52  ;;  %v782_v10 = vadd.f32 %v776_v20, %v3899_v12 }
 0x1ac   :  { %v899_v32 = vadd.f32 %v893_v48, %v3902_v7  ;;  %v4042_v18 = vadd.f32 %v1010_v15, %v3905_v17  ;;  %v924_v6 = vadd.f32 %v913_v26, %v807_v40  ;;  %v446_v3 = vrot.slane %v431_v2, 1  ;;  %v5554_v40 = vld [vmem:[#allocation15_spill] sm:$0xff] }
 0x1ad   :  { %v432_v49 = vadd.f32 %v426_v54, %v3911_v46  ;;  %v543_v28 = vmul.f32 %v5538_v13, %v269_v1  ;;  %v563_v61 = vrot.slane %v548_v23, 2  ;;  %v680_v56 = vrot.slane %v665_v55, 3 }
 0x1ae   :  { %5550 = vst [vmem:[#allocation18_spill] sm:$0xff] %v4042_v18  ;;  %v797_v30 = vrot.slane %v782_v10, 4  ;;  %v337_v35 = vadd.f32 %v333_v41, %v3908_v21  ;;  %v4047_v52 = vadd.f32 %v1030_v45, %v924_v6  ;;  %v914_v12 = vrot.slane %v899_v32, 5 }
 0x1af   :  { %v447_v33 = vrot.slane %v432_v49, 1  ;;  %v549_v7 = vadd.f32 %v543_v28, %v3914_v9  ;;  %v660_v17 = vmul.f32 %v5539_v50, %v269_v1  ;;  %v777_v27 = vmul.f32 %v5540_v62, %v269_v1  ;;  %v5557_v28 = vld [vmem:[#allocation21_spill] sm:$0xff] }
 0x1b0   :  { %5551 = vst [vmem:[#allocation93_spill] sm:$0xff] %v4047_v52  ;;  %v894_v46 = vmul.f32 %v5541_v25, %v269_v1  ;;  %v1011_v36 = vmul.f32 %v5542_v19, %v269_v1  ;;  %v427_v21 = vmul.f32 %v5537_v34, %v271_v60  ;;  %v544_v53 = vmul.f32 %v5538_v13, %v271_v60 }
 0x1b1   :  { %v448_v44 = vsel %vm440_vm4, %v446_v3, %v447_v33  ;;  %v564_v43 = vrot.slane %v549_v7, 2  ;;  %v666_v24 = vadd.f32 %v660_v17, %v3917_v58  ;;  %v783_v11 = vadd.f32 %v777_v27, %v3928_v22  ;;  %v5556_v3 = vld [vmem:[#allocation20_spill] sm:$0xff] }
 0x1b2   :  { %v457_v9 = vadd.f32 %v448_v44, %v340_v29  ;;  %v900_v38 = vadd.f32 %v894_v46, %v3931_v39  ;;  %v4066_v1 = vadd.f32 %v1011_v36, %v3934_v47  ;;  %v433_v34 = vadd.f32 %v427_v21, %v3937_v8 }
 0x1b3   :  { %v565_v2 = vsel %vm557_vm5, %v563_v61, %v564_v43  ;;  %v550_v13 = vadd.f32 %v544_v53, %v3940_v5  ;;  %v681_v16 = vrot.slane %v666_v24, 3  ;;  %v798_v58 = vrot.slane %v783_v11, 4 }
 0x1b4   :  { %5552 = vst [vmem:[#allocation95_spill] sm:$0xff] %v4066_v1  ;;  %v574_v51 = vadd.f32 %v565_v2, %v457_v9  ;;  %v915_v26 = vrot.slane %v900_v38, 5  ;;  %v341_v22 = vadd.f32 %v337_v35, %v5545_v42  ;;  %v449_v39 = vrot.slane %v433_v34, 1  ;;  %v5559_v35 = vld [vmem:[#allocation23_spill] sm:$0xff]  ;;  %v5588_v38 = vld [vmem:[#allocation58_spill] sm:$0xff] }
 0x1b5   :  { %v566_v45 = vrot.slane %v550_v13, 2  ;;  %v661_v47 = vmul.f32 %v5539_v50, %v271_v60  ;;  %v682_v8 = vsel %vm674_vm6, %v680_v56, %v681_v16  ;;  %v799_v5 = vsel %vm791_vm7, %v797_v30, %v798_v58  ;;  %v5599_v1 = vld [vmem:[#allocation82_spill] sm:$0xff] }
 0x1b6   :  { %v4085_v23 = vsel %vm908_vm8, %v914_v12, %v915_v26  ;;  %v778_v37 = vmul.f32 %v5540_v62, %v271_v60  ;;  %v691_v42 = vadd.f32 %v682_v8, %v574_v51  ;;  %v450_v20 = vsel %vm440_vm4, %v447_v33, %v449_v39  ;;  %v5564_v39 = vld [vmem:[#allocation27_spill] sm:$0xff] }
 0x1b7   :  { %5553 = vst [vmem:[#allocation16_spill] sm:$0xff] %v4085_v23  ;;  %v567_v50 = vsel %vm557_vm5, %v564_v43, %v566_v45  ;;  %v667_v48 = vadd.f32 %v661_v47, %v3943_v14  ;;  %v458_v15 = vadd.f32 %v450_v20, %v341_v22  ;;  %v895_v41 = vmul.f32 %v5541_v25, %v271_v60  ;;  %v1051_v25 = vpop.permute.xlu0 %1050  ;;  %v1053_v43 = vpop.permute.xlu1 %1052  ;;  %v5566_v20 = vld [vmem:[#allocation29_spill] sm:$0xff] }
 0x1b8   :  { %v784_v29 = vadd.f32 %v778_v37, %v5554_v40  ;;  %v1012_v54 = vmul.f32 %v5542_v19, %v271_v60  ;;  %v4094_v55 = vadd.f32 %v799_v5, %v691_v42  ;;  %v4097_v10 = vstv %s4057_s10  ;;  %v5565_v37 = vld [vmem:[#allocation28_spill] sm:$0xff]  ;;  %v5567_v40 = vld [vmem:[#allocation30_spill] sm:$0xff]  ;;  %s4792_s10 = sld [smem:[#allocation6 + $0x36]] }
 0x1b9   :  { %v683_v62 = vrot.slane %v667_v48, 3  ;;  %v4100_v32 = vstv %s4059_s11  ;;  %v575_v6 = vadd.f32 %v567_v50, %v458_v15  ;;  %v901_v49 = vadd.f32 %v895_v41, %v5556_v3  ;;  %v5568_v41 = vld [vmem:[#allocation31_spill] sm:$0xff]  ;;  %s4804_s11 = sld [smem:[#allocation6 + $0x3d]] }
 0x1ba   :  { %5555 = vst [vmem:[#allocation17_spill] sm:$0xff] %v4094_v55  ;;  %v800_v14 = vrot.slane %v784_v29, 4  ;;  %v4104_v61 = vadd.f32 %v1012_v54, %v5557_v28  ;;  %v4108_v56 = vstv %s4070_s12  ;;  %v4111_v30 = vstv %s4072_s21  ;;  %s4806_s12 = sld [smem:[#allocation6 + $0x44]]  ;;  %s4814_s21 = sld [smem:[#allocation6 + $0x4b]] }
 0x1bb   :  { %v684_v19 = vsel %vm674_vm6, %v681_v16, %v683_v62  ;;  %v4115_v60 = vmul.f32 %v4020_v0, %v5559_v35  ;;  %v917_v7 = vrot.slane %v901_v49, 5  ;;  %v4119_v17 = vstv %s4074_s22  ;;  %v1055_v5 = vpop.permute.xlu0 %1054  ;;  %v5570_v49 = vld [vmem:[#allocation34_spill] sm:$0xff]  ;;  %v1057_v35 = vpop.permute.xlu1 %1056  ;;  %s4816_s22 = sld [smem:[#allocation6 + $0x52]] }
 0x1bc   :  { %5558 = vst [vmem:[#allocation44_spill] sm:$0xff] %v4104_v61  ;;  %v692_v12 = vadd.f32 %v684_v19, %v575_v6  ;;  %v801_v33 = vsel %vm791_vm7, %v798_v58, %v800_v14  ;;  %v4122_v27 = vstv %s4078_s23  ;;  %v4125_v46 = vstv %s4080_s8  ;;  %v5569_v14 = vld [vmem:[#allocation33_spill] sm:$0xff]  ;;  %v5589_v61 = vld [vmem:[#allocation59_spill] sm:$0xff]  ;;  %s4822_s23 = sld [smem:[#allocation6 + $0x59]]  ;;  %s4824_s8 = sld [smem:[#allocation6 + $0x60]] }
 0x1bd   :  { %v1130_v36 = vmul.f32 %v4097_v10, %v1051_v25  ;;  %v1202_v44 = vmul.f32 %v4100_v32, %v1051_v25  ;;  %v4132_v0 = vsel %vm908_vm8, %v915_v26, %v917_v7  ;;  %v1318_v53 = vmul.f32 %v4108_v56, %v1051_v25  ;;  %v5563_v26 = vld [vmem:[#allocation26_spill] sm:$0xff]  ;;  %v5572_v7 = vld [vmem:[#allocation36_spill] sm:$0xff] }
 0x1be   :  { %v4129_v21 = vadd.f32 %v801_v33, %v692_v12  ;;  %5561 = vst [vmem:[#allocation49_spill] sm:$0xff] %v4132_v0  ;;  %v1434_v9 = vmul.f32 %v4111_v30, %v1051_v25  ;;  %v1550_v2 = vmul.f32 %v4119_v17, %v1051_v25  ;;  %v1666_v34 = vmul.f32 %v4122_v27, %v1051_v25  ;;  %v5571_v12 = vld [vmem:[#allocation35_spill] sm:$0xff] }
 0x1bf   :  { %v1782_v16 = vmul.f32 %v4125_v46, %v1051_v25  ;;  %v1131_v58 = vmul.f32 %v4097_v10, %v1053_v43  ;;  %v4145_v22 = vadd.f32 %v1130_v36, %v5563_v26  ;;  %v4148_v45 = vadd.f32 %v1202_v44, %v5564_v39  ;;  %v5575_v26 = vld [vmem:[#allocation39_spill] sm:$0xff] }
 0x1c0   :  { %5560 = vst [vmem:[#allocation48_spill] sm:$0xff] %v4129_v21  ;;  %v1203_v47 = vmul.f32 %v4100_v32, %v1053_v43  ;;  %v1319_v8 = vmul.f32 %v4108_v56, %v1053_v43  ;;  %v4153_v42 = vadd.f32 %v1318_v53, %v5565_v37  ;;  %v4156_v50 = vadd.f32 %v1434_v9, %v5566_v20  ;;  %v5573_v53 = vld [vmem:[#allocation37_spill] sm:$0xff] }
 0x1c1   :  { %v1435_v48 = vmul.f32 %v4111_v30, %v1053_v43  ;;  %v1551_v15 = vmul.f32 %v4119_v17, %v1053_v43  ;;  %v4161_v29 = vadd.f32 %v1550_v2, %v5567_v40  ;;  %v4164_v54 = vadd.f32 %v1666_v34, %v5568_v41  ;;  %v5574_v2 = vld [vmem:[#allocation38_spill] sm:$0xff]  ;;  %v1059_v40 = vpop.permute.xlu0 %1058 }
 0x1c2   :  { %v1667_v62 = vmul.f32 %v4122_v27, %v1053_v43  ;;  %v1783_v6 = vmul.f32 %v4125_v46, %v1053_v43  ;;  %v4169_v3 = vadd.f32 %v1782_v16, %v5569_v14  ;;  %v4172_v28 = vadd.f32 %v1131_v58, %v5570_v49 }
 0x1c3   :  { %v1204_v25 = vmul.f32 %v4100_v32, %v1055_v5  ;;  %v1320_v19 = vmul.f32 %v4108_v56, %v1055_v5  ;;  %v4177_v33 = vadd.f32 %v1203_v47, %v5571_v12  ;;  %v4180_v36 = vadd.f32 %v1319_v8, %v5572_v7  ;;  %v5576_v47 = vld [vmem:[#allocation40_spill] sm:$0xff]  ;;  %v5580_v12 = vld [vmem:[#allocation45_spill] sm:$0xff] }
 0x1c4   :  { %v1436_v44 = vmul.f32 %v4111_v30, %v1055_v5  ;;  %v1552_v43 = vmul.f32 %v4119_v17, %v1055_v5  ;;  %v4185_v9 = vadd.f32 %v1435_v48, %v5573_v53  ;;  %v4188_v34 = vadd.f32 %v1551_v15, %v5574_v2  ;;  %v5577_v48 = vld [vmem:[#allocation41_spill] sm:$0xff]  ;;  %v5578_v15 = vld [vmem:[#allocation42_spill] sm:$0xff] }
 0x1c5   :  { %v1668_v16 = vmul.f32 %v4122_v27, %v1055_v5  ;;  %v1784_v58 = vmul.f32 %v4125_v46, %v1055_v5  ;;  %v4193_v39 = vadd.f32 %v1667_v62, %v5575_v26  ;;  %v4196_v8 = vadd.f32 %v1783_v6, %v5576_v47  ;;  %v5579_v62 = vld [vmem:[#allocation43_spill] sm:$0xff] }
 0x1c6   :  { %v1132_v37 = vmul.f32 %v4097_v10, %v1057_v35  ;;  %v1205_v20 = vmul.f32 %v4100_v32, %v1057_v35  ;;  %v4201_v41 = vadd.f32 %v1204_v25, %v5577_v48  ;;  %v4204_v14 = vadd.f32 %v1320_v19, %v5578_v15  ;;  %v5581_v19 = vld [vmem:[#allocation46_spill] sm:$0xff]  ;;  %v5582_v26 = vld [vmem:[#allocation47_spill] sm:$0xff] }
 0x1c7   :  { %v1321_v49 = vmul.f32 %v4108_v56, %v1057_v35  ;;  %v1437_v5 = vmul.f32 %v4111_v30, %v1057_v35  ;;  %v4211_v6 = vadd.f32 %v1436_v44, %v5579_v62  ;;  %v4214_v7 = vadd.f32 %v1552_v43, %v5580_v12  ;;  %v5583_v43 = vld [vmem:[#allocation50_spill] sm:$0xff]  ;;  %v5584_v62 = vld [vmem:[#allocation51_spill] sm:$0xff] }
 0x1c8   :  { %v1553_v53 = vmul.f32 %v4119_v17, %v1057_v35  ;;  %v1669_v25 = vmul.f32 %v4122_v27, %v1057_v35  ;;  %v4223_v2 = vadd.f32 %v1668_v16, %v5581_v19  ;;  %v4226_v47 = vadd.f32 %v1784_v58, %v5582_v26  ;;  %v1061_v58 = vpop.permute.xlu1 %1060  ;;  %v5586_v26 = vld [vmem:[#allocation55_spill] sm:$0xff] }
 0x1c9   :  { %v1785_v44 = vmul.f32 %v4125_v46, %v1057_v35  ;;  %v1133_v48 = vmul.f32 %v4097_v10, %v1059_v40  ;;  %v4235_v15 = vadd.f32 %v1132_v37, %v5583_v43  ;;  %v4238_v12 = vadd.f32 %v1205_v20, %v5584_v62  ;;  %v5585_v10 = vld [vmem:[#allocation54_spill] sm:$0xff]  ;;  %v5587_v43 = vld [vmem:[#allocation57_spill] sm:$0xff] }
 0x1ca   :  { %v1206_v16 = vmul.f32 %v4100_v32, %v1059_v40  ;;  %v1322_v19 = vmul.f32 %v4108_v56, %v1059_v40  ;;  %v4247_v35 = vadd.f32 %v1321_v49, %v5585_v10  ;;  %v4250_v51 = vadd.f32 %v1437_v5, %v5586_v26  ;;  %v5590_v5 = vld [vmem:[#allocation60_spill] sm:$0xff] }
 0x1cb   :  { %v1438_v37 = vmul.f32 %v4111_v30, %v1059_v40  ;;  %v1554_v20 = vmul.f32 %v4119_v17, %v1059_v40  ;;  %v4255_v62 = vadd.f32 %v1553_v53, %v5587_v43  ;;  %v4258_v13 = vadd.f32 %v1669_v25, %v5588_v38  ;;  %v5591_v43 = vld [vmem:[#allocation61_spill] sm:$0xff]  ;;  %v5592_v25 = vld [vmem:[#allocation62_spill] sm:$0xff] }
 0x1cc   :  { %v1670_v11 = vmul.f32 %v4122_v27, %v1059_v40  ;;  %v1786_v63 = vmul.f32 %v4125_v46, %v1059_v40  ;;  %v4263_v49 = vadd.f32 %v1785_v44, %v5589_v61  ;;  %v4266_v10 = vadd.f32 %v1133_v48, %v5590_v5  ;;  %v5593_v40 = vld [vmem:[#allocation63_spill] sm:$0xff]  ;;  %v5594_v44 = vld [vmem:[#allocation65_spill] sm:$0xff]  ;;  %v5595_v5 = vld [vmem:[#allocation66_spill] sm:$0xff] }
 0x1cd   :  { %v1207_v26 = vmul.f32 %v4100_v32, %v1061_v58  ;;  %v1323_v53 = vmul.f32 %v4108_v56, %v1061_v58  ;;  %v4271_v38 = vadd.f32 %v1206_v16, %v5591_v43  ;;  %v4274_v0 = vadd.f32 %v1322_v19, %v5592_v25  ;;  %v5596_v56 = vld [vmem:[#allocation67_spill] sm:$0xff]  ;;  %v1063_v43 = vpop.permute.xlu0 %1062 }
 0x1ce   :  { %v4277_v61 = vadd.f32 %v1438_v37, %v5593_v40  ;;  %v4280_v48 = vadd.f32 %v1554_v20, %v5594_v44  ;;  %v4283_v32 = vadd.f32 %v1670_v11, %v5595_v5  ;;  %v4286_v21 = vadd.f32 %v1786_v63, %v5596_v56  ;;  %v5597_v44 = vld [vmem:[#allocation70_spill] sm:$0xff]  ;;  %v5598_v11 = vld [vmem:[#allocation71_spill] sm:$0xff] }
 0x1cf   :  { %v1439_v16 = vmul.f32 %v4111_v30, %v1061_v58  ;;  %v1555_v19 = vmul.f32 %v4119_v17, %v1061_v58  ;;  %v1671_v25 = vmul.f32 %v4122_v27, %v1061_v58  ;;  %v1787_v37 = vmul.f32 %v4125_v46, %v1061_v58  ;;  %v1065_v58 = vpop.permute.xlu1 %1064 }
 0x1d0   :  { %v4293_v40 = vstv %s4208_s24  ;;  %v4296_v20 = vstv %s4218_s0  ;;  %v4299_v18 = vadd.f32 %v1207_v26, %v5597_v44  ;;  %v4302_v5 = vadd.f32 %v1323_v53, %v5598_v11  ;;  %v5601_v11 = vld [vmem:[#allocation83_spill] sm:$0xff]  ;;  %s4972_s24 = sld [smem:[#allocation6 + $0x37]]  ;;  %s4974_s0 = sld [smem:[#allocation6 + $0x3e]] }
 0x1d1   :  { %v4305_v63 = vstv %s4220_s25  ;;  %v4308_v30 = vstv %s4230_s26  ;;  %v4311_v17 = vstv %s4232_s29  ;;  %v4314_v56 = vstv %s4242_s30  ;;  %s4980_s25 = sld [smem:[#allocation6 + $0x45]]  ;;  %s4982_s26 = sld [smem:[#allocation6 + $0x4c]] }
 0x1d2   :  { %v4317_v27 = vstv %s4244_s2  ;;  %v1140_v46 = vmul.f32 %v4293_v40, %v1063_v43  ;;  %v4321_v23 = vadd.f32 %v1439_v16, %v5599_v1  ;;  %v1216_v26 = vmul.f32 %v4296_v20, %v1063_v43  ;;  %s4996_s29 = sld [smem:[#allocation6 + $0x53]]  ;;  %s4998_s30 = sld [smem:[#allocation6 + $0x5a]] }
 0x1d3   :  { %v1332_v53 = vmul.f32 %v4305_v63, %v1063_v43  ;;  %v1448_v44 = vmul.f32 %v4308_v30, %v1063_v43  ;;  %v4327_v55 = vadd.f32 %v1555_v19, %v5601_v11  ;;  %v4330_v52 = vadd.f32 %v1671_v25, %v4024_v31  ;;  %s5012_s2 = sld [smem:[#allocation6 + $0x61]] }
 0x1d4   :  { %5600 = vst [vmem:[#allocation52_spill] sm:$0xff] %v4321_v23  ;;  %v4333_v24 = vadd.f32 %v1787_v37, %v4115_v60  ;;  %v1564_v59 = vmul.f32 %v4311_v17, %v1063_v43  ;;  %v4337_v1 = vadd.f32 %v1140_v46, %v4145_v22  ;;  %v1680_v16 = vmul.f32 %v4314_v56, %v1063_v43  ;;  %v1067_v23 = vpop.permute.xlu0 %1066 }
 0x1d5   :  { %v1796_v57 = vmul.f32 %v4317_v27, %v1063_v43  ;;  %v1141_v4 = vmul.f32 %v4293_v40, %v1065_v58  ;;  %v4343_v19 = vadd.f32 %v1216_v26, %v4148_v45  ;;  %v4346_v31 = vadd.f32 %v1332_v53, %v4153_v42 }
 0x1d6   :  { %v4349_v60 = vadd.f32 %v1448_v44, %v4156_v50  ;;  %v1217_v25 = vmul.f32 %v4296_v20, %v1065_v58  ;;  %v1333_v22 = vmul.f32 %v4305_v63, %v1065_v58  ;;  %v1449_v37 = vmul.f32 %v4308_v30, %v1065_v58 }
 0x1d7   :  { %v1565_v43 = vmul.f32 %v4311_v17, %v1065_v58  ;;  %v1681_v46 = vmul.f32 %v4314_v56, %v1065_v58  ;;  %v4357_v11 = vadd.f32 %v1564_v59, %v4161_v29  ;;  %v1797_v45 = vmul.f32 %v4317_v27, %v1065_v58  ;;  %v1069_v59 = vpop.permute.xlu1 %1068 }
 0x1d8   :  { %5602 = vst [vmem:[#allocation53_spill] sm:$0xff] %v4349_v60  ;;  %v1218_v42 = vmul.f32 %v4296_v20, %v1067_v23  ;;  %v1334_v50 = vmul.f32 %v4305_v63, %v1067_v23  ;;  %v4363_v26 = vadd.f32 %v1680_v16, %v4164_v54  ;;  %v4366_v53 = vadd.f32 %v1796_v57, %v4169_v3  ;;  %v1071_v16 = vpop.permute.xlu0 %1070 }
 0x1d9   :  { %5603 = vst [vmem:[#allocation56_spill] sm:$0xff] %v4357_v11  ;;  %v4369_v44 = vadd.f32 %v1141_v4, %v4172_v28  ;;  %v4372_v60 = vadd.f32 %v1217_v25, %v4177_v33  ;;  %v4375_v29 = vadd.f32 %v1333_v22, %v4180_v36  ;;  %v4378_v58 = vadd.f32 %v1449_v37, %v4185_v9 }
 0x1da   :  { %v4381_v11 = vadd.f32 %v1565_v43, %v4188_v34  ;;  %v1450_v54 = vmul.f32 %v4308_v30, %v1067_v23  ;;  %v4385_v57 = vadd.f32 %v1681_v46, %v4193_v39  ;;  %v1566_v4 = vmul.f32 %v4311_v17, %v1067_v23 }
 0x1db   :  { %v1682_v3 = vmul.f32 %v4314_v56, %v1067_v23  ;;  %v1798_v28 = vmul.f32 %v4317_v27, %v1067_v23  ;;  %v4391_v33 = vadd.f32 %v1797_v45, %v4196_v8  ;;  %v4394_v36 = vadd.f32 %v1218_v42, %v4201_v41 }
 0x1dc   :  { %v4397_v9 = vadd.f32 %v1334_v50, %v4204_v14  ;;  %v1142_v34 = vmul.f32 %v4293_v40, %v1069_v59  ;;  %v4401_v39 = vadd.f32 %v1450_v54, %v4211_v6  ;;  %v1219_v25 = vmul.f32 %v4296_v20, %v1069_v59  ;;  %v1073_v50 = vpop.permute.xlu1 %1072 }
 0x1dd   :  { %v1335_v22 = vmul.f32 %v4305_v63, %v1069_v59  ;;  %v1451_v23 = vmul.f32 %v4308_v30, %v1069_v59  ;;  %v4409_v8 = vadd.f32 %v1566_v4, %v4214_v7  ;;  %v4412_v41 = vadd.f32 %v1682_v3, %v4223_v2 }
 0x1de   :  { %v4415_v14 = vadd.f32 %v1798_v28, %v4226_v47  ;;  %v1567_v6 = vmul.f32 %v4311_v17, %v1069_v59  ;;  %v1683_v37 = vmul.f32 %v4314_v56, %v1069_v59  ;;  %v1799_v43 = vmul.f32 %v4317_v27, %v1069_v59 }
 0x1df   :  { %v1143_v46 = vmul.f32 %v4293_v40, %v1071_v16  ;;  %v1220_v7 = vmul.f32 %v4296_v20, %v1071_v16  ;;  %v4431_v2 = vadd.f32 %v1142_v34, %v4235_v15  ;;  %v1336_v47 = vmul.f32 %v4305_v63, %v1071_v16 }
 0x1e0   :  { %v1452_v45 = vmul.f32 %v4308_v30, %v1071_v16  ;;  %v1568_v42 = vmul.f32 %v4311_v17, %v1071_v16  ;;  %v4441_v40 = vadd.f32 %v1219_v25, %v4238_v12  ;;  %v4444_v59 = vadd.f32 %v1335_v22, %v4247_v35  ;;  %v1075_v25 = vpop.permute.xlu0 %1074 }
 0x1e1   :  { %v4447_v15 = vadd.f32 %v1451_v23, %v4250_v51  ;;  %v4450_v54 = vadd.f32 %v1567_v6, %v4255_v62  ;;  %v4453_v4 = vadd.f32 %v1683_v37, %v4258_v13  ;;  %v4456_v3 = vadd.f32 %v1799_v43, %v4263_v49  ;;  %v5604_v37 = vld [vmem:[#allocation52_spill] sm:$0xff] }
 0x1e2   :  { %v4459_v28 = vadd.f32 %v1143_v46, %v4266_v10  ;;  %v1684_v12 = vmul.f32 %v4314_v56, %v1071_v16  ;;  %v4463_v35 = vadd.f32 %v1220_v7, %v4271_v38  ;;  %v1800_v51 = vmul.f32 %v4317_v27, %v1071_v16 }
 0x1e3   :  { %v1221_v62 = vmul.f32 %v4296_v20, %v1073_v50  ;;  %v1337_v13 = vmul.f32 %v4305_v63, %v1073_v50  ;;  %v4469_v49 = vadd.f32 %v1336_v47, %v4274_v0  ;;  %v4472_v10 = vadd.f32 %v1452_v45, %v4277_v61 }
 0x1e4   :  { %v4475_v38 = vadd.f32 %v1568_v42, %v4280_v48  ;;  %v1453_v34 = vmul.f32 %v4308_v30, %v1073_v50  ;;  %v4479_v20 = vadd.f32 %v1684_v12, %v4283_v32  ;;  %v1569_v63 = vmul.f32 %v4311_v17, %v1073_v50 }
 0x1e5   :  { %v1685_v16 = vmul.f32 %v4314_v56, %v1073_v50  ;;  %v1801_v0 = vmul.f32 %v4317_v27, %v1073_v50  ;;  %v4485_v61 = vadd.f32 %v1800_v51, %v4286_v21  ;;  %v4488_v22 = vadd.f32 %v1221_v62, %v4299_v18 }
 0x1e6   :  { %v4491_v48 = vadd.f32 %v1337_v13, %v4302_v5  ;;  %v4494_v30 = vstv %s4406_s4  ;;  %v4497_v32 = vstv %s4418_s5  ;;  %v4500_v23 = vstv %s4420_s6  ;;  %v1077_v5 = vpop.permute.xlu1 %1076  ;;  %s2317_s4 = smov [#allocation11]  }
 0x1e7   :  { %v4503_v17 = vstv %s4426_s7  ;;  %v4506_v56 = vstv %s4428_s13  ;;  %v4509_v27 = vstv %s4436_s14  ;;  %v4512_v21 = vstv %s4438_s15  ;;  %s1921_s5 = sshll.u32 %s2317_s4, 4  ;;  %s1922_s5 = int_to_ptr.vmem [resolvable:$true] %s1921_s5 }
 0x1e8   :  { %v1150_v18 = vmul.f32 %v4494_v30, %v1075_v25  ;;  %v1230_v6 = vmul.f32 %v4497_v32, %v1075_v25  ;;  %v4517_v43 = vadd.f32 %v1453_v34, %v5604_v37  ;;  %v4520_v46 = vadd.f32 %v1569_v63, %v4327_v55  ;;  %v1079_v34 = vpop.permute.xlu0 %1078  ;;  %s2204_s6 = scalar_lea.vmem %s1922_s5, 512  ;;  %p2209_p1 = scmp.lt.s32.totalorder %s1922_s5, %s1922_s5 }
 0x1e9   :  { %v1346_v7 = vmul.f32 %v4500_v23, %v1075_v25  ;;  %v1462_v47 = vmul.f32 %v4503_v17, %v1075_v25  ;;  %v4525_v45 = vadd.f32 %v1685_v16, %v4330_v52  ;;  %v4528_v42 = vadd.f32 %v1801_v0, %v4333_v24  ;;  %v5606_v24 = vld [vmem:[#allocation53_spill] sm:$0xff]  ;;  %p2205_p0 = scmp.ne.s32.totalorder %s1922_s5, %s2204_s6  ;;  %p2210_p2 = scmp.lt.s32.totalorder %s2204_s6, %s2204_s6 }
 0x1ea   :  { %v1578_v50 = vmul.f32 %v4506_v56, %v1075_v25  ;;  %v1694_v12 = vmul.f32 %v4509_v27, %v1075_v25  ;;  %v4533_v51 = vadd.f32 %v1150_v18, %v4337_v1  ;;  %v4536_v55 = vadd.f32 %v1230_v6, %v4343_v19  ;;  %v5608_v6 = vld [vmem:[#allocation56_spill] sm:$0xff] }
 0x1eb   :  { %v1810_v62 = vmul.f32 %v4512_v21, %v1075_v25  ;;  %v1151_v13 = vmul.f32 %v4494_v30, %v1077_v5  ;;  %v4541_v52 = vadd.f32 %v1346_v7, %v4346_v31  ;;  %v4544_v63 = vadd.f32 %v1462_v47, %v5606_v24  ;;  %p2211_p3 = por %p2210_p2, %p2209_p1 }
 0x1ec   :  { %v1231_v16 = vmul.f32 %v4497_v32, %v1077_v5  ;;  %v1347_v0 = vmul.f32 %v4500_v23, %v1077_v5  ;;  %v1463_v1 = vmul.f32 %v4503_v17, %v1077_v5  ;;  %v1579_v19 = vmul.f32 %v4506_v56, %v1077_v5 }
 0x1ed   :  { %5605 = vst [vmem:[#allocation64_spill] sm:$0xff] %v4541_v52  ;;  %5607 = vst [vmem:[#allocation68_spill] sm:$0xff] %v4544_v63  ;;  %v1695_v18 = vmul.f32 %v4509_v27, %v1077_v5  ;;  %v1811_v25 = vmul.f32 %v4512_v21, %v1077_v5  ;;  %v4553_v37 = vadd.f32 %v1578_v50, %v5608_v6  ;;  %v1081_v50 = vpop.permute.xlu1 %1080  ;;  %p2212_p4 = pnand %p2211_p3, %p2205_p0 }
 0x1ee   :  { %v4556_v31 = vadd.f32 %v1694_v12, %v4363_v26  ;;  %v1232_v7 = vmul.f32 %v4497_v32, %v1079_v34  ;;  %v1348_v47 = vmul.f32 %v4500_v23, %v1079_v34  ;;  %v4561_v24 = vadd.f32 %v1810_v62, %v4366_v53 }
 0x1ef   :  { %v4564_v63 = vadd.f32 %v1151_v13, %v4369_v44  ;;  %v4567_v52 = vadd.f32 %v1231_v16, %v4372_v60  ;;  %v4570_v5 = vadd.f32 %v1347_v0, %v4375_v29  ;;  %v4573_v26 = vadd.f32 %v1463_v1, %v4378_v58  ;;  %v1083_v0 = vpop.permute.xlu0 %1082 }
 0x1f0   :  { %v4576_v12 = vadd.f32 %v1579_v19, %v4381_v11  ;;  %v1464_v6 = vmul.f32 %v4503_v17, %v1079_v34  ;;  %v1580_v53 = vmul.f32 %v4506_v56, %v1079_v34  ;;  %v4581_v44 = vadd.f32 %v1695_v18, %v4385_v57 }
 0x1f1   :  { %v4584_v60 = vadd.f32 %v1811_v25, %v4391_v33  ;;  %v1696_v29 = vmul.f32 %v4509_v27, %v1079_v34  ;;  %v1812_v62 = vmul.f32 %v4512_v21, %v1079_v34  ;;  %v4589_v58 = vadd.f32 %v1232_v7, %v4394_v36 }
 0x1f2   :  { %v4592_v11 = vadd.f32 %v1348_v47, %v4397_v9  ;;  %v1152_v13 = vmul.f32 %v4494_v30, %v1081_v50  ;;  %v1233_v16 = vmul.f32 %v4497_v32, %v1081_v50  ;;  %v4597_v57 = vadd.f32 %v1464_v6, %v4401_v39  ;;  %v1085_v6 = vpop.permute.xlu1 %1084 }
 0x1f3   :  { %v4600_v33 = vadd.f32 %v1580_v53, %v4409_v8  ;;  %v1349_v1 = vmul.f32 %v4500_v23, %v1081_v50  ;;  %v1465_v34 = vmul.f32 %v4503_v17, %v1081_v50  ;;  %v4609_v36 = vadd.f32 %v1696_v29, %v4412_v41 }
 0x1f4   :  { %v4612_v9 = vadd.f32 %v1812_v62, %v4415_v14  ;;  %v1581_v39 = vmul.f32 %v4506_v56, %v1081_v50  ;;  %v1697_v19 = vmul.f32 %v4509_v27, %v1081_v50  ;;  %v1813_v8 = vmul.f32 %v4512_v21, %v1081_v50 }
 0x1f5   :  { %v1153_v18 = vmul.f32 %v4494_v30, %v1083_v0  ;;  %v1234_v25 = vmul.f32 %v4497_v32, %v1083_v0  ;;  %v1350_v41 = vmul.f32 %v4500_v23, %v1083_v0  ;;  %v4629_v14 = vadd.f32 %v1152_v13, %v4431_v2 }
 0x1f6   :  { %v4632_v7 = vadd.f32 %v1233_v16, %v4441_v40  ;;  %v1466_v47 = vmul.f32 %v4503_v17, %v1083_v0  ;;  %v1582_v50 = vmul.f32 %v4506_v56, %v1083_v0  ;;  %v4639_v30 = vadd.f32 %v1349_v1, %v4444_v59 }
 0x1f7   :  { %v4642_v53 = vadd.f32 %v1465_v34, %v4447_v15  ;;  %v4645_v29 = vadd.f32 %v1581_v39, %v4450_v54  ;;  %v4648_v2 = vadd.f32 %v1697_v19, %v4453_v4  ;;  %v4651_v40 = vadd.f32 %v1813_v8, %v4456_v3  ;;  %v1089_v8 = vpop.permute.xlu1 %1088 }
 0x1f8   :  { %v4654_v62 = vadd.f32 %v1153_v18, %v4459_v28  ;;  %v1698_v13 = vmul.f32 %v4509_v27, %v1083_v0  ;;  %v1814_v59 = vmul.f32 %v4512_v21, %v1083_v0  ;;  %v4659_v15 = vadd.f32 %v1234_v25, %v4463_v35  ;;  %v1087_v0 = vpop.permute.xlu0 %1086 }
 0x1f9   :  { %v4662_v54 = vadd.f32 %v1350_v41, %v4469_v49  ;;  %v1235_v4 = vmul.f32 %v4497_v32, %v1085_v6  ;;  %v1351_v3 = vmul.f32 %v4500_v23, %v1085_v6  ;;  %v4667_v28 = vadd.f32 %v1466_v47, %v4472_v10 }
 0x1fa   :  { %v4670_v16 = vadd.f32 %v1582_v50, %v4475_v38  ;;  %v1467_v35 = vmul.f32 %v4503_v17, %v1085_v6  ;;  %v1583_v49 = vmul.f32 %v4506_v56, %v1085_v6  ;;  %v4675_v1 = vadd.f32 %v1698_v13, %v4479_v20 }
 0x1fb   :  { %v4678_v32 = vadd.f32 %v1814_v59, %v4485_v61  ;;  %v1699_v23 = vmul.f32 %v4509_v27, %v1085_v6  ;;  %v1815_v10 = vmul.f32 %v4512_v21, %v1085_v6  ;;  %v4683_v34 = vadd.f32 %v1235_v4, %v4488_v22 }
 0x1fc   :  { %v4686_v38 = vadd.f32 %v1351_v3, %v4491_v48  ;;  %v4689_v17 = vstv %s4604_s16  ;;  %v4692_v56 = vstv %s4606_s17  ;;  %v4695_v39 = vstv %s4616_s18  ;;  %v1091_v4 = vpop.permute.xlu0 %1090 }
 0x1fd   :  { %v4698_v20 = vstv %s4618_s19  ;;  %v4701_v61 = vstv %s4624_s20  ;;  %v4704_v19 = vstv %s4626_s1  ;;  %v4707_v27 = vstv %s4636_s9 }
 0x1fe   :  { %v1160_v22 = vmul.f32 %v4689_v17, %v1087_v0  ;;  %v1244_v21 = vmul.f32 %v4692_v56, %v1087_v0  ;;  %v1360_v48 = vmul.f32 %v4695_v39, %v1087_v0  ;;  %v4713_v18 = vadd.f32 %v1467_v35, %v4517_v43 }
 0x1ff   :  { %v4716_v25 = vadd.f32 %v1583_v49, %v4520_v46  ;;  %v4719_v41 = vadd.f32 %v1699_v23, %v4525_v45  ;;  %v1476_v47 = vmul.f32 %v4698_v20, %v1087_v0  ;;  %v4723_v50 = vadd.f32 %v1815_v10, %v4528_v42  ;;  %v5609_v45 = vld [vmem:[#allocation64_spill] sm:$0xff] }
 0x200   :  { %v1592_v6 = vmul.f32 %v4701_v61, %v1087_v0  ;;  %v1708_v13 = vmul.f32 %v4704_v19, %v1087_v0  ;;  %v1824_v59 = vmul.f32 %v4707_v27, %v1087_v0  ;;  %v4729_v43 = vadd.f32 %v1160_v22, %v4533_v51  ;;  %v5611_v42 = vld [vmem:[#allocation68_spill] sm:$0xff] }
 0x201   :  { %v4732_v46 = vadd.f32 %v1244_v21, %v4536_v55  ;;  %v4735_v3 = vadd.f32 %v1360_v48, %v5609_v45  ;;  %v1161_v35 = vmul.f32 %v4689_v17, %v1089_v8  ;;  %v4739_v49 = vadd.f32 %v1476_v47, %v5611_v42 }
 0x202   :  { %v1245_v23 = vmul.f32 %v4692_v56, %v1089_v8  ;;  %v1361_v10 = vmul.f32 %v4695_v39, %v1089_v8  ;;  %v1477_v0 = vmul.f32 %v4698_v20, %v1089_v8  ;;  %v1593_v51 = vmul.f32 %v4701_v61, %v1089_v8 }
 0x203   :  { %5610 = vst [vmem:[#allocation69_spill] sm:$0xff] %v4735_v3  ;;  %5612 = vst [vmem:[#allocation72_spill] sm:$0xff] %v4739_v49  ;;  %v1709_v22 = vmul.f32 %v4704_v19, %v1089_v8  ;;  %v1825_v55 = vmul.f32 %v4707_v27, %v1089_v8  ;;  %v1246_v21 = vmul.f32 %v4692_v56, %v1091_v4 }
 0x204   :  { %v4749_v48 = vadd.f32 %v1592_v6, %v4553_v37  ;;  %v4752_v47 = vadd.f32 %v1708_v13, %v4556_v31  ;;  %v4755_v45 = vadd.f32 %v1824_v59, %v4561_v24  ;;  %v1362_v42 = vmul.f32 %v4695_v39, %v1091_v4  ;;  %v1093_v6 = vpop.permute.xlu1 %1092 }
 0x205   :  { %v4759_v49 = vadd.f32 %v1161_v35, %v4564_v63  ;;  %v4762_v3 = vadd.f32 %v1245_v23, %v4567_v52  ;;  %v4765_v8 = vadd.f32 %v1361_v10, %v4570_v5  ;;  %v4768_v37 = vadd.f32 %v1477_v0, %v4573_v26  ;;  %v1095_v0 = vpop.permute.xlu0 %1094 }
 0x206   :  { %v4771_v31 = vadd.f32 %v1593_v51, %v4576_v12  ;;  %v1478_v24 = vmul.f32 %v4698_v20, %v1091_v4  ;;  %v1594_v13 = vmul.f32 %v4701_v61, %v1091_v4  ;;  %v1710_v63 = vmul.f32 %v4704_v19, %v1091_v4 }
 0x207   :  { %v4777_v59 = vadd.f32 %v1709_v22, %v4581_v44  ;;  %v4780_v52 = vadd.f32 %v1825_v55, %v4584_v60  ;;  %v4783_v5 = vadd.f32 %v1246_v21, %v4589_v58  ;;  %v1826_v26 = vmul.f32 %v4707_v27, %v1091_v4 }
 0x208   :  { %v4787_v12 = vadd.f32 %v1362_v42, %v4592_v11  ;;  %v1162_v35 = vmul.f32 %v4689_v17, %v1093_v6  ;;  %v1247_v23 = vmul.f32 %v4692_v56, %v1093_v6  ;;  %v1363_v10 = vmul.f32 %v4695_v39, %v1093_v6 }
 0x209   :  { %v4795_v44 = vadd.f32 %v1478_v24, %v4597_v57  ;;  %v4798_v60 = vadd.f32 %v1594_v13, %v4600_v33  ;;  %v4801_v58 = vadd.f32 %v1710_v63, %v4609_v36  ;;  %v1479_v11 = vmul.f32 %v4698_v20, %v1093_v6 }
 0x20a   :  { %v4809_v4 = vadd.f32 %v1826_v26, %v4612_v9  ;;  %v1595_v51 = vmul.f32 %v4701_v61, %v1093_v6  ;;  %v1711_v57 = vmul.f32 %v4704_v19, %v1093_v6  ;;  %v1827_v22 = vmul.f32 %v4707_v27, %v1093_v6  ;;  %v1097_v9 = vpop.permute.xlu1 %1096 }
 0x20b   :  { %v1163_v33 = vmul.f32 %v4689_v17, %v1095_v0  ;;  %v1248_v36 = vmul.f32 %v4692_v56, %v1095_v0  ;;  %v1364_v55 = vmul.f32 %v4695_v39, %v1095_v0  ;;  %v1480_v21 = vmul.f32 %v4698_v20, %v1095_v0 }
 0x20c   :  { %v4827_v42 = vadd.f32 %v1162_v35, %v4629_v14  ;;  %v4830_v6 = vadd.f32 %v1247_v23, %v4632_v7  ;;  %v4833_v24 = vadd.f32 %v1363_v10, %v4639_v30  ;;  %v1596_v17 = vmul.f32 %v4701_v61, %v1095_v0 }
 0x20d   :  { %v4837_v13 = vadd.f32 %v1479_v11, %v4642_v53  ;;  %v4840_v63 = vadd.f32 %v1595_v51, %v4645_v29  ;;  %v4843_v26 = vadd.f32 %v1711_v57, %v4648_v2  ;;  %v4846_v14 = vadd.f32 %v1827_v22, %v4651_v40 }
 0x20e   :  { %v4849_v7 = vadd.f32 %v1163_v33, %v4654_v62  ;;  %v1712_v30 = vmul.f32 %v4704_v19, %v1095_v0  ;;  %v1828_v35 = vmul.f32 %v4707_v27, %v1095_v0  ;;  %v1249_v53 = vmul.f32 %v4692_v56, %v1097_v9  ;;  %v1099_v0 = vpop.permute.xlu0 %1098 }
 0x20f   :  { %v4855_v29 = vadd.f32 %v1248_v36, %v4659_v15  ;;  %v4858_v2 = vadd.f32 %v1364_v55, %v4662_v54  ;;  %v4861_v40 = vadd.f32 %v1480_v21, %v4667_v28  ;;  %v1365_v62 = vmul.f32 %v4695_v39, %v1097_v9 }
 0x210   :  { %v4865_v23 = vadd.f32 %v1596_v17, %v4670_v16  ;;  %v1481_v56 = vmul.f32 %v4698_v20, %v1097_v9  ;;  %v1597_v15 = vmul.f32 %v4701_v61, %v1097_v9  ;;  %v1713_v10 = vmul.f32 %v4704_v19, %v1097_v9 }
 0x211   :  { %v4871_v54 = vadd.f32 %v1712_v30, %v4675_v1  ;;  %v4874_v28 = vadd.f32 %v1828_v35, %v4678_v32  ;;  %v4877_v39 = vadd.f32 %v1249_v53, %v4683_v34  ;;  %v1829_v16 = vmul.f32 %v4707_v27, %v1097_v9  ;;  %v1101_v1 = vpop.permute.xlu1 %1100 }
 0x212   :  { %5613 = vst [vmem:[#allocation73_spill] sm:$0xff] %v4865_v23  ;;  %v4881_v11 = vadd.f32 %v1365_v62, %v4686_v38  ;;  %v4884_v20 = vstv %s4792_s10  ;;  %v4887_v61 = vstv %s4804_s11  ;;  %v4890_v19 = vstv %s4806_s12 }
 0x213   :  { %5614 = vst [vmem:[#allocation74_spill] sm:$0xff] %v4871_v54  ;;  %5615 = vst [vmem:[#allocation75_spill] sm:$0xff] %v4874_v28  ;;  %v4893_v51 = vstv %s4814_s21  ;;  %v4896_v32 = vstv %s4816_s22  ;;  %v4899_v57 = vstv %s4822_s23  ;;  %v4902_v34 = vstv %s4824_s8 }
 0x214   :  { %5616 = vst [vmem:[#allocation76_spill] sm:$0xff] %v4877_v39  ;;  %5617 = vst [vmem:[#allocation77_spill] sm:$0xff] %v4881_v11  ;;  %v1170_v27 = vmul.f32 %v4884_v20, %v1099_v0  ;;  %v1258_v38 = vmul.f32 %v4887_v61, %v1099_v0  ;;  %v1374_v22 = vmul.f32 %v4890_v19, %v1099_v0 }
 0x215   :  { %v1490_v33 = vmul.f32 %v4893_v51, %v1099_v0  ;;  %v1606_v36 = vmul.f32 %v4896_v32, %v1099_v0  ;;  %v1722_v55 = vmul.f32 %v4899_v57, %v1099_v0  ;;  %v1838_v21 = vmul.f32 %v4902_v34, %v1099_v0  ;;  %v5622_v0 = vld [vmem:[#allocation69_spill] sm:$0xff] }
 0x216   :  { %v1171_v9 = vmul.f32 %v4884_v20, %v1101_v1  ;;  %v4913_v17 = vadd.f32 %v1481_v56, %v4713_v18  ;;  %v4916_v30 = vadd.f32 %v1597_v15, %v4716_v25  ;;  %v4919_v35 = vadd.f32 %v1713_v10, %v4719_v41  ;;  %v5623_v18 = vld [vmem:[#allocation72_spill] sm:$0xff]  ;;  %v1103_v25 = vpop.permute.xlu0 %1102 }
 0x217   :  { %v4922_v53 = vadd.f32 %v1829_v16, %v4723_v50  ;;  %v4925_v62 = vadd.f32 %v1170_v27, %v4729_v43  ;;  %v4928_v11 = vadd.f32 %v1258_v38, %v4732_v46  ;;  %v4931_v39 = vadd.f32 %v1374_v22, %v5622_v0 }
 0x218   :  { %5618 = vst [vmem:[#allocation78_spill] sm:$0xff] %v4913_v17  ;;  %5619 = vst [vmem:[#allocation79_spill] sm:$0xff] %v4916_v30  ;;  %v4934_v56 = vadd.f32 %v1490_v33, %v5623_v18  ;;  %v1259_v15 = vmul.f32 %v4887_v61, %v1101_v1  ;;  %v1375_v41 = vmul.f32 %v4890_v19, %v1101_v1  ;;  %v1105_v18 = vpop.permute.xlu1 %1104  ;;  %v5082_v30 = vstv %s4982_s26 }
 0x219   :  { %5620 = vst [vmem:[#allocation80_spill] sm:$0xff] %v4919_v35  ;;  %5621 = vst [vmem:[#allocation81_spill] sm:$0xff] %v4922_v53  ;;  %v1491_v50 = vmul.f32 %v4893_v51, %v1101_v1  ;;  %v1607_v10 = vmul.f32 %v4896_v32, %v1101_v1  ;;  %v4941_v43 = vadd.f32 %v1606_v36, %v4749_v48  ;;  %v5073_v53 = vstv %s4972_s24 }
 0x21a   :  { %v4944_v46 = vadd.f32 %v1722_v55, %v4752_v47  ;;  %v4947_v16 = vadd.f32 %v1838_v21, %v4755_v45  ;;  %v4950_v27 = vadd.f32 %v1171_v9, %v4759_v49  ;;  %v1723_v38 = vmul.f32 %v4899_v57, %v1101_v1 }
 0x21b   :  { %v1839_v22 = vmul.f32 %v4902_v34, %v1101_v1  ;;  %v1260_v33 = vmul.f32 %v4887_v61, %v1103_v25  ;;  %v1376_v0 = vmul.f32 %v4890_v19, %v1103_v25  ;;  %v4957_v48 = vadd.f32 %v1259_v15, %v4762_v3 }
 0x21c   :  { %v4960_v47 = vadd.f32 %v1375_v41, %v4765_v8  ;;  %v4963_v45 = vadd.f32 %v1491_v50, %v4768_v37  ;;  %v4966_v49 = vadd.f32 %v1607_v10, %v4771_v31  ;;  %v1492_v36 = vmul.f32 %v4893_v51, %v1103_v25  ;;  %v1107_v50 = vpop.permute.xlu0 %1106 }
 0x21d   :  { %v1608_v1 = vmul.f32 %v4896_v32, %v1103_v25  ;;  %v1724_v55 = vmul.f32 %v4899_v57, %v1103_v25  ;;  %v1840_v21 = vmul.f32 %v4902_v34, %v1103_v25  ;;  %v1172_v3 = vmul.f32 %v4884_v20, %v1105_v18 }
 0x21e   :  { %v1261_v8 = vmul.f32 %v4887_v61, %v1105_v18  ;;  %v1377_v37 = vmul.f32 %v4890_v19, %v1105_v18  ;;  %v1493_v31 = vmul.f32 %v4893_v51, %v1105_v18  ;;  %v4985_v9 = vadd.f32 %v1723_v38, %v4777_v59 }
 0x21f   :  { %v4988_v25 = vadd.f32 %v1839_v22, %v4780_v52  ;;  %v4991_v15 = vadd.f32 %v1260_v33, %v4783_v5  ;;  %v4994_v41 = vadd.f32 %v1376_v0, %v4787_v12  ;;  %v5001_v10 = vadd.f32 %v1492_v36, %v4795_v44  ;;  %v1109_v33 = vpop.permute.xlu1 %1108 }
 0x220   :  { %v5004_v59 = vadd.f32 %v1608_v1, %v4798_v60  ;;  %v5007_v52 = vadd.f32 %v1724_v55, %v4801_v58  ;;  %v5010_v5 = vadd.f32 %v1840_v21, %v4809_v4  ;;  %v5015_v12 = vadd.f32 %v1172_v3, %v4827_v42  ;;  %v5629_v3 = vld [vmem:[#allocation32_spill] sm:$0xff] }
 0x221   :  { %v1609_v38 = vmul.f32 %v4896_v32, %v1105_v18  ;;  %v1725_v22 = vmul.f32 %v4899_v57, %v1105_v18  ;;  %v1841_v44 = vmul.f32 %v4902_v34, %v1105_v18  ;;  %v5021_v60 = vadd.f32 %v1261_v8, %v4830_v6  ;;  %v5630_v8 = vld [vmem:[#allocation25_spill] sm:$0xff] }
 0x222   :  { %v5024_v58 = vadd.f32 %v1377_v37, %v4833_v24  ;;  %v5027_v4 = vadd.f32 %v1493_v31, %v4837_v13  ;;  %v5030_v42 = vmul.f32 %v4884_v20, %v1107_v50  ;;  %v5033_v0 = vmul.f32 %v4887_v61, %v1107_v50  ;;  %v1111_v37 = vpop.permute.xlu0 %1110  ;;  %v5631_v31 = vld [vmem:[#allocation24_spill] sm:$0xff] }
 0x223   :  { %v5036_v18 = vmul.f32 %v4890_v19, %v1107_v50  ;;  %v5039_v6 = vmul.f32 %v4893_v51, %v1107_v50  ;;  %v5042_v24 = vmul.f32 %v4896_v32, %v1107_v50  ;;  %v5045_v13 = vadd.f32 %v1609_v38, %v4840_v63  ;;  %v5633_v38 = vld [vmem:[#allocation22_spill] sm:$0xff] }
 0x224   :  { %v5048_v20 = vadd.f32 %v1725_v22, %v4843_v26  ;;  %v5051_v36 = vadd.f32 %v1841_v44, %v4846_v14  ;;  %v5054_v1 = vmul.f32 %v4899_v57, %v1107_v50  ;;  %v5057_v55 = vmul.f32 %v4902_v34, %v1107_v50 }
 0x225   :  { %5624 = vst [vmem:[#allocation84_spill] sm:$0xff] %v5042_v24  ;;  %v5060_v21 = vmul.f32 %v4887_v61, %v1109_v33  ;;  %v5063_v63 = vmul.f32 %v4890_v19, %v1109_v33  ;;  %v923_v26 = vadd.f32 %v5630_v8, %v5629_v3  ;;  %v5632_v14 = vrot.slane %v5631_v31, 6  ;;  %v1113_v3 = vpop.permute.xlu1 %1112 }
 0x226   :  { %5625 = vst [vmem:[#allocation85_spill] sm:$0xff] %v5054_v1  ;;  %5626 = vst [vmem:[#allocation86_spill] sm:$0xff] %v5057_v55  ;;  %v5634_v22 = vrot.slane %v5633_v38, 6  ;;  %v5076_v50 = vstv %s4974_s0  ;;  %v5079_v35 = vstv %s4980_s25  ;;  %v5085_v19 = vstv %s4996_s29 }
 0x227   :  { %5627 = vst [vmem:[#allocation87_spill] sm:$0xff] %v5060_v21  ;;  %5628 = vst [vmem:[#allocation88_spill] sm:$0xff] %v5063_v63  ;;  %v5088_v17 = vstv %s4998_s30  ;;  %v5091_v8 = vstv %s5012_s2  ;;  %v1180_v31 = vmul.f32 %v5073_v53, %v1111_v37  ;;  %v1388_v38 = vmul.f32 %v5079_v35, %v1111_v37 }
 0x228   :  { %v1028_v44 = vsel %vm1025_vm9, %v5634_v22, %v5632_v14  ;;  %v1272_v14 = vmul.f32 %v5076_v50, %v1111_v37  ;;  %v1504_v22 = vmul.f32 %v5082_v30, %v1111_v37  ;;  %v1620_v63 = vmul.f32 %v5085_v19, %v1111_v37 }
 0x229   :  { %v1040_v61 = vadd.f32 %v1028_v44, %v923_v26  ;;  %v1736_v26 = vmul.f32 %v5088_v17, %v1111_v37  ;;  %v1852_v44 = vmul.f32 %v5091_v8, %v1111_v37  ;;  %v1184_v21 = vadd.f32 %v1180_v31, %v4925_v62 }
 0x22a   :  { %v1278_v55 = vadd.f32 %v1272_v14, %v4928_v11  ;;  %v5103_v28 = vadd.f32 %v1388_v38, %v4931_v39  ;;  %v1181_v1 = vmul.f32 %v5073_v53, %v1113_v3  ;;  %v5107_v54 = vmul.f32 %v4893_v51, %v1109_v33 }
 0x22b   :  { %v5110_v24 = vmul.f32 %v4896_v32, %v1109_v33  ;;  %v5113_v23 = vmul.f32 %v4899_v57, %v1109_v33  ;;  %v5116_v37 = vadd.f32 %v1504_v22, %v4934_v56  ;;  %v5119_v62 = vmul.f32 %v4902_v34, %v1109_v33  ;;  %v1115_v32 = vpop.permute.xlu0 %1114 }
 0x22c   :  { %v5122_v39 = vadd.f32 %v1620_v63, %v4941_v43  ;;  %v5125_v11 = vadd.f32 %v1736_v26, %v4944_v46  ;;  %v5128_v51 = vadd.f32 %v1852_v44, %v4947_v16  ;;  %v5130_v31 = vadd.f32 %v1184_v21, %v1040_v61  ;;  %v5636_v44 = vld [vmem:[#allocation93_spill] sm:$0xff] }
 0x22d   :  { %5635 = vst [vmem:[#allocation89_spill] sm:$0xff] %v5116_v37  ;;  %v1290_v57 = vrot.slane %v1278_v55, 1  ;;  %v1185_v56 = vadd.f32 %v1181_v1, %v4950_v27  ;;  %v1273_v33 = vmul.f32 %v5076_v50, %v1113_v3  ;;  %v1389_v43 = vmul.f32 %v5079_v35, %v1113_v3 }
 0x22e   :  { %v1505_v46 = vmul.f32 %v5082_v30, %v1113_v3  ;;  %v1621_v63 = vmul.f32 %v5085_v19, %v1113_v3  ;;  %v1737_v16 = vmul.f32 %v5088_v17, %v1113_v3  ;;  %v1853_v21 = vmul.f32 %v5091_v8, %v1113_v3 }
 0x22f   :  { %v1274_v55 = vmul.f32 %v5076_v50, %v1115_v32  ;;  %v1279_v61 = vadd.f32 %v1273_v33, %v4957_v48  ;;  %v5144_v27 = vadd.f32 %v1389_v43, %v4960_v47  ;;  %v1390_v38 = vmul.f32 %v5079_v35, %v1115_v32 }
 0x230   :  { %v5147_v1 = vadd.f32 %v1505_v46, %v4963_v45  ;;  %v1189_v34 = vadd.f32 %v1185_v56, %v5636_v44  ;;  %v5155_v37 = vadd.f32 %v1621_v63, %v4966_v49  ;;  %v5158_v48 = vadd.f32 %v1737_v16, %v4985_v9  ;;  %v1117_v63 = vpop.permute.xlu1 %1116  ;;  %v5641_v56 = vld [vmem:[#allocation18_spill] sm:$0xff]  ;;  %v5647_v45 = vld [vmem:[#allocation44_spill] sm:$0xff] }
 0x231   :  { %v1280_v3 = vadd.f32 %v1274_v55, %v4991_v15  ;;  %v1291_v14 = vrot.slane %v1279_v61, 1  ;;  %v1396_v47 = vadd.f32 %v1390_v38, %v4994_v41  ;;  %v5164_v43 = vadd.f32 %v1853_v21, %v4988_v25  ;;  %v5637_v61 = vld [vmem:[#allocation17_spill] sm:$0xff]  ;;  %v5638_v38 = vld [vmem:[#allocation16_spill] sm:$0xff] }
 0x232   :  { %v1506_v55 = vmul.f32 %v5082_v30, %v1115_v32  ;;  %v1622_v49 = vmul.f32 %v5085_v19, %v1115_v32  ;;  %v1738_v41 = vmul.f32 %v5088_v17, %v1115_v32  ;;  %v1854_v16 = vmul.f32 %v5091_v8, %v1115_v32 }
 0x233   :  { %v1293_v46 = vrot.slane %v1280_v3, 1  ;;  %v1409_v15 = vrot.slane %v1396_v47, 2  ;;  %v925_v44 = vadd.f32 %v5638_v38, %v5637_v61  ;;  %v1639_v25 = vrot.slane %v5155_v37, 4 }
 0x234   :  { %v1512_v47 = vadd.f32 %v1506_v55, %v5001_v10  ;;  %v5179_v26 = vadd.f32 %v1622_v49, %v5004_v59  ;;  %v5642_v33 = vrot.slane %v5641_v56, 6  ;;  %v1182_v61 = vmul.f32 %v5073_v53, %v1117_v63 }
 0x235   :  { %v1294_v9 = vsel %vm440_vm4, %v1291_v14, %v1293_v46  ;;  %v5639_v46 = vld [vmem:[#allocation95_spill] sm:$0xff]  ;;  %v5188_v38 = vsel %vm440_vm4, %v1290_v57, %v1291_v14  ;;  %v5194_v55 = vadd.f32 %v1738_v41, %v5007_v52  ;;  %v1391_v57 = vmul.f32 %v5079_v35, %v1117_v63 }
 0x236   :  { %v1305_v3 = vadd.f32 %v1294_v9, %v1189_v34  ;;  %v5640_v22 = vrot.slane %v5639_v46, 6  ;;  %v5643_v34 = vrot.slane %v5144_v27, 2  ;;  %v1525_v49 = vrot.slane %v1512_v47, 3  ;;  %v5644_v47 = vld [vmem:[#allocation48_spill] sm:$0xff] }
 0x237   :  { %v5197_v9 = vadd.f32 %v1854_v16, %v5010_v5  ;;  %v1186_v56 = vadd.f32 %v1182_v61, %v5015_v12  ;;  %v1507_v14 = vmul.f32 %v5082_v30, %v1117_v63  ;;  %v1855_v5 = vmul.f32 %v5091_v8, %v1117_v63 }
 0x238   :  { %v1033_v32 = vsel %vm1025_vm9, %v5642_v33, %v5640_v22  ;;  %v1410_v10 = vsel %vm557_vm5, %v5643_v34, %v1409_v15  ;;  %v1275_v22 = vmul.f32 %v5076_v50, %v1117_v63  ;;  %v1623_v15 = vmul.f32 %v5085_v19, %v1117_v63 }
 0x239   :  { %v1042_v59 = vadd.f32 %v1033_v32, %v925_v44  ;;  %v5201_v33 = vadd.f32 %v1410_v10, %v1305_v3  ;;  %v1739_v44 = vmul.f32 %v5088_v17, %v1117_v63  ;;  %v1397_v16 = vadd.f32 %v1391_v57, %v5024_v58  ;;  %v5645_v32 = vld [vmem:[#allocation49_spill] sm:$0xff] }
 0x23a   :  { %v1281_v41 = vadd.f32 %v1275_v22, %v5021_v60  ;;  %v5213_v3 = vadd.f32 %v1507_v14, %v5027_v4  ;;  %v926_v61 = vadd.f32 %v5645_v32, %v5644_v47  ;;  %v5646_v34 = vrot.slane %v5147_v1, 3  ;;  %v1119_v32 = vpop.permute.xlu0 %1118 }
 0x23b   :  { %v1190_v22 = vadd.f32 %v1186_v56, %v1042_v59  ;;  %v5648_v63 = vrot.slane %v5647_v45, 6  ;;  %v5649_v12 = vrot.slane %v5639_v46, 6  ;;  %v5229_v4 = vadd.f32 %v1623_v15, %v5045_v13  ;;  %v5650_v56 = vld [vmem:[#allocation73_spill] sm:$0xff]  ;;  %v5651_v15 = vld [vmem:[#allocation84_spill] sm:$0xff] }
 0x23c   :  { %v5220_v10 = vsel %vm674_vm6, %v5646_v34, %v1525_v49  ;;  %v1295_v57 = vrot.slane %v1281_v41, 1  ;;  %v5232_v14 = vadd.f32 %v1739_v44, %v5048_v20  ;;  %v1411_v49 = vrot.slane %v1397_v16, 2  ;;  %v5652_v44 = vld [vmem:[#allocation74_spill] sm:$0xff] }
 0x23d   :  { %v1035_v58 = vsel %vm1025_vm9, %v5649_v12, %v5648_v63  ;;  %v1527_v34 = vrot.slane %v5213_v3, 3  ;;  %v5236_v59 = vadd.f32 %v1855_v5, %v5051_v36  ;;  %v1177_v45 = vadd.f32 %v5030_v42, %v4849_v7  ;;  %v5653_v12 = vld [vmem:[#allocation85_spill] sm:$0xff]  ;;  %v5655_v63 = vld [vmem:[#allocation86_spill] sm:$0xff] }
 0x23e   :  { %v1043_v47 = vadd.f32 %v1035_v58, %v926_v61  ;;  %v1268_v46 = vadd.f32 %v5033_v0, %v4855_v29  ;;  %v1384_v13 = vadd.f32 %v5036_v18, %v4858_v2  ;;  %v1500_v20 = vadd.f32 %v5039_v6, %v4861_v40  ;;  %v5654_v61 = vld [vmem:[#allocation75_spill] sm:$0xff] }
 0x23f   :  { %v1616_v41 = vadd.f32 %v5651_v15, %v5650_v56  ;;  %v1732_v16 = vadd.f32 %v5653_v12, %v5652_v44  ;;  %v1183_v36 = vmul.f32 %v5073_v53, %v1119_v32  ;;  %v1276_v5 = vmul.f32 %v5076_v50, %v1119_v32 }
 0x240   :  { %v1392_v7 = vmul.f32 %v5079_v35, %v1119_v32  ;;  %v1508_v29 = vmul.f32 %v5082_v30, %v1119_v32  ;;  %v1624_v42 = vmul.f32 %v5085_v19, %v1119_v32  ;;  %v1740_v2 = vmul.f32 %v5088_v17, %v1119_v32 }
 0x241   :  { %v1856_v40 = vmul.f32 %v5091_v8, %v1119_v32  ;;  %v1643_v0 = vrot.slane %v5229_v4, 4  ;;  %v1187_v18 = vadd.f32 %v1183_v36, %v1177_v45  ;;  %v1282_v6 = vadd.f32 %v1276_v5, %v1268_v46  ;;  %v5656_v4 = vld [vmem:[#allocation76_spill] sm:$0xff]  ;;  %v5657_v45 = vld [vmem:[#allocation87_spill] sm:$0xff] }
 0x242   :  { %v1398_v3 = vadd.f32 %v1392_v7, %v1384_v13  ;;  %v1848_v53 = vadd.f32 %v5655_v63, %v5654_v61  ;;  %v1514_v58 = vadd.f32 %v1508_v29, %v1500_v20  ;;  %v5260_v56 = vadd.f32 %v1624_v42, %v1616_v41  ;;  %v5658_v13 = vld [vmem:[#allocation77_spill] sm:$0xff]  ;;  %v5659_v36 = vld [vmem:[#allocation88_spill] sm:$0xff]  ;;  %v1121_v20 = vpop.permute.xlu1 %1120 }
 0x243   :  { %v5262_v15 = vadd.f32 %v1740_v2, %v1732_v16  ;;  %v1759_v44 = vrot.slane %v5232_v14, 5  ;;  %v1875_v12 = vrot.slane %v5236_v59, 6  ;;  %v1296_v60 = vrot.slane %v1282_v6, 1  ;;  %v5662_v63 = vld [vmem:[#allocation80_spill] sm:$0xff] }
 0x244   :  { %v1412_v21 = vrot.slane %v1398_v3, 2  ;;  %v1191_v32 = vadd.f32 %v1187_v18, %v1043_v47  ;;  %v5266_v52 = vadd.f32 %v1856_v40, %v1848_v53  ;;  %v1269_v46 = vadd.f32 %v5657_v45, %v5656_v4  ;;  %v5660_v47 = vld [vmem:[#allocation78_spill] sm:$0xff]  ;;  %v5661_v40 = vld [vmem:[#allocation79_spill] sm:$0xff] }
 0x245   :  { %v1385_v5 = vadd.f32 %v5659_v36, %v5658_v13  ;;  %v1297_v41 = vsel %vm440_vm4, %v1295_v57, %v1296_v60  ;;  %v1528_v16 = vrot.slane %v1514_v58, 3  ;;  %v1644_v7 = vrot.slane %v5260_v56, 4 }
 0x246   :  { %v1760_v14 = vrot.slane %v5262_v15, 5  ;;  %v1306_v29 = vadd.f32 %v1297_v41, %v1190_v22  ;;  %v1413_v42 = vsel %vm557_vm5, %v1411_v49, %v1412_v21  ;;  %v1501_v2 = vadd.f32 %v5107_v54, %v5660_v47 }
 0x247   :  { %v1617_v18 = vadd.f32 %v5110_v24, %v5661_v40  ;;  %v1277_v6 = vmul.f32 %v5076_v50, %v1121_v20  ;;  %v1393_v3 = vmul.f32 %v5079_v35, %v1121_v20  ;;  %v1509_v57 = vmul.f32 %v5082_v30, %v1121_v20  ;;  %v5663_v30 = vld [vmem:[#allocation81_spill] sm:$0xff] }
 0x248   :  { %v1625_v61 = vmul.f32 %v5085_v19, %v1121_v20  ;;  %v1733_v53 = vadd.f32 %v5113_v23, %v5662_v63  ;;  %v1741_v22 = vmul.f32 %v5088_v17, %v1121_v20  ;;  %v1857_v49 = vmul.f32 %v5091_v8, %v1121_v20 }
 0x249   :  { %v1304_v54 = vadd.f32 %v5188_v38, %v5130_v31  ;;  %v1283_v58 = vadd.f32 %v1277_v6, %v1269_v46  ;;  %v1399_v24 = vadd.f32 %v1393_v3, %v1385_v5  ;;  %v1515_v56 = vadd.f32 %v1509_v57, %v1501_v2 }
 0x24a   :  { %v1631_v50 = vadd.f32 %v1625_v61, %v1617_v18  ;;  %v1422_v15 = vadd.f32 %v1413_v42, %v1306_v29  ;;  %v1876_v35 = vrot.slane %v5266_v52, 6  ;;  %v1849_v19 = vadd.f32 %v5119_v62, %v5663_v30  ;;  %v5667_v29 = vld [vmem:[#allocation89_spill] sm:$0xff] }
 0x24b   :  { %v1747_v4 = vadd.f32 %v1741_v22, %v1733_v53  ;;  %v1298_v45 = vrot.slane %v1283_v58, 1  ;;  %v1414_v23 = vrot.slane %v1399_v24, 2  ;;  %v1530_v13 = vrot.slane %v1515_v56, 3 }
 0x24c   :  { %v5664_v17 = vrot.slane %v5144_v27, 2  ;;  %v5665_v8 = vrot.slane %v5103_v28, 2  ;;  %v1529_v38 = vsel %vm674_vm6, %v1527_v34, %v1528_v16  ;;  %v1863_v46 = vadd.f32 %v1857_v49, %v1849_v19 }
 0x24d   :  { %v1537_v52 = vadd.f32 %v5220_v10, %v5201_v33  ;;  %v1299_v5 = vsel %vm440_vm4, %v1296_v60, %v1298_v45  ;;  %v1646_v62 = vrot.slane %v1631_v50, 4  ;;  %v1762_v20 = vrot.slane %v1747_v4, 5 }
 0x24e   :  { %v1408_v31 = vsel %vm557_vm5, %v5665_v8, %v5664_v17  ;;  %v5666_v41 = vrot.slane %v5147_v1, 3  ;;  %v5668_v42 = vrot.slane %v5667_v29, 3  ;;  %v1307_v28 = vadd.f32 %v1299_v5, %v1191_v32 }
 0x24f   :  { %v1420_v36 = vadd.f32 %v1408_v31, %v1304_v54  ;;  %v1415_v47 = vsel %vm557_vm5, %v1412_v21, %v1414_v23  ;;  %v1538_v34 = vadd.f32 %v1529_v38, %v1422_v15  ;;  %v1531_v40 = vsel %vm674_vm6, %v1528_v16, %v1530_v13 }
 0x250   :  { %v1524_v27 = vsel %vm674_vm6, %v5668_v42, %v5666_v41  ;;  %v5669_v33 = vrot.slane %v5122_v39, 4  ;;  %v5670_v60 = vrot.slane %v5179_v26, 4  ;;  %v1645_v32 = vsel %vm791_vm7, %v1643_v0, %v1644_v7 }
 0x251   :  { %v1536_v2 = vadd.f32 %v1524_v27, %v1420_v36  ;;  %v1423_v18 = vadd.f32 %v1415_v47, %v1307_v28  ;;  %v1654_v3 = vadd.f32 %v1645_v32, %v1538_v34  ;;  %v5671_v16 = vrot.slane %v5158_v48, 5 }
 0x252   :  { %v1640_v10 = vsel %vm791_vm7, %v5669_v33, %v1639_v25  ;;  %v1642_v1 = vsel %vm791_vm7, %v1639_v25, %v5670_v60  ;;  %v5672_v57 = vrot.slane %v5125_v11, 5  ;;  %v5673_v61 = vrot.slane %v5194_v55, 5 }
 0x253   :  { %v1652_v21 = vadd.f32 %v1640_v10, %v1536_v2  ;;  %v1653_v6 = vadd.f32 %v1642_v1, %v1537_v52  ;;  %v5674_v26 = vmov %v5671_v16  ;;  %v1761_v25 = vsel %vm908_vm8, %v1759_v44, %v1760_v14 }
 0x254   :  { %v1756_v39 = vsel %vm908_vm8, %v5672_v57, %v5671_v16  ;;  %v1758_v37 = vsel %vm908_vm8, %v5674_v26, %v5673_v61  ;;  %v5675_v0 = vrot.slane %v5164_v43, 6  ;;  %v5676_v63 = vrot.slane %v5128_v51, 6 }
 0x255   :  { %v1539_v22 = vadd.f32 %v1531_v40, %v1423_v18  ;;  %v1768_v49 = vadd.f32 %v1756_v39, %v1652_v21  ;;  %v1769_v54 = vadd.f32 %v1758_v37, %v1653_v6  ;;  %v1770_v11 = vadd.f32 %v1761_v25, %v1654_v3 }
 0x256   :  { %v1872_v53 = vsel %vm1025_vm9, %v5676_v63, %v5675_v0  ;;  %v1647_v58 = vsel %vm791_vm7, %v1644_v7, %v1646_v62  ;;  %v1878_v24 = vrot.slane %v1863_v46, 6  ;;  %v5677_v55 = vrot.slane %v5197_v9, 6 }
 0x257   :  { %v5678_v48 = vmov %v5675_v0  ;;  %v1877_v44 = vsel %vm1025_vm9, %v1875_v12, %v1876_v35  ;;  %v1655_v51 = vadd.f32 %v1647_v58, %v1539_v22  ;;  %v1884_v50 = vadd.f32 %v1872_v53, %v1768_v49 }
 0x258   :  { %v1874_v56 = vsel %vm1025_vm9, %v5678_v48, %v5677_v55  ;;  %v1886_v30 = vadd.f32 %v1877_v44, %v1770_v11  ;;  %v1763_v19 = vsel %vm908_vm8, %v1760_v14, %v1762_v20  ;;  %v1879_v9 = vsel %vm1025_vm9, %v1876_v35, %v1878_v24 }
 0x259   :  { %v1885_v15 = vadd.f32 %v1874_v56, %v1769_v54  ;;  %v1771_v4 = vadd.f32 %v1763_v19, %v1655_v51  ;;  %v2063_v45 = vmul.f32 -1.442695, %v1884_v50 }
 0x25a   :  { %v2065_v23 = vmul.f32 -1.442695, %v1886_v30 }
 0x25b   :  { %v2064_v7 = vmul.f32 -1.442695, %v1885_v15  ;;  %v1887_v13 = vadd.f32 %v1879_v9, %v1771_v4  ;;  %2153 = vpow2.f32 %v2063_v45 }
 0x25d   :  { %2155 = vpow2.f32 %v2064_v7  ;;  %v2066_v43 = vmul.f32 -1.442695, %v1887_v13 }
 0x25e   :  { %2157 = vpow2.f32 %v2065_v23 }
 0x25f   :  { %2159 = vpow2.f32 %v2066_v43 }
 0x265   :  { %v2154_v59 = vpop.eup %2153 }
 0x266   :  { %v1900_v17 = vadd.f32 1.0, %v2154_v59 }
 0x267   :  { %v2156_v12 = vpop.eup %2155 }
 0x268   :  { %v2158_v8 = vpop.eup %2157  ;;  %v1901_v31 = vadd.f32 1.0, %v2156_v12  ;;  %2161 = vrcp.f32 %v1900_v17 }
 0x269   :  { %v1902_v38 = vadd.f32 1.0, %v2158_v8  ;;  %v2160_v14 = vpop.eup %2159 }
 0x26a   :  { %2163 = vrcp.f32 %v1901_v31  ;;  %v1903_v46 = vadd.f32 1.0, %v2160_v14 }
 0x26b   :  { %2165 = vrcp.f32 %v1902_v38 }
 0x26c   :  { %2167 = vrcp.f32 %v1903_v46 }
 0x272   :  { %v2162_v36 = vpop.eup %2161 }
 0x273   :  { %1912 = vst.msk [vmem:[#allocation11] sm:$0xff] %vm47_vm0, %v2162_v36 }
 0x274   :  { %v2164_v35 = vpop.eup %2163 }
 0x275   :  { %v2166_v52 = vpop.eup %2165  ;;  %1913 = vst.msk [vmem:[#allocation11 + $0x8] sm:$0xff] %vm47_vm0, %v2164_v35 }
 0x276   :  { %1914 = vst.msk [vmem:[#allocation11 + $0x10] sm:$0xff] %vm47_vm0, %v2166_v52  ;;  %v2168_v5 = vpop.eup %2167 }
 0x277   :  { %1915 = vst.msk [vmem:[#allocation11 + $0x18] sm:$0xff] %vm47_vm0, %v2168_v5 }
 0x278   :  { %2215 = shalt.err (!%p2212_p4)
}
 0x279   :  { %s2216_s14 = scalar_lea.hbm %s5369_s3, 512 }
 0x27a   :  { %p2217_p5 = scmp.ne.s32.totalorder %s5369_s3, %s2216_s14  ;;  %p2220_p6 = scmp.lt.u32.totalorder %s2216_s14, %s5369_s3 }
 0x27c   :  { %p2222_p7 = pnand %p2220_p6, %p2217_p5 }
 0x27e   :  { %2225 = shalt.err (!%p2222_p7)
}
 0x27f   :  { %1927 = dma.vmem_to_hbm [thread:$0]  %s1922_s5, 512, %s5369_s3, [#allocation8], %s2306_s27, %s2306_s27, %s2307_s28  }
 0x280   :  { %2266 = dma.done.wait [#allocation8], 512  }
 0x281   :  { %2267 = vsyncadd [#allocation8], 4294966784 }
 0x282   :  { %1931 = vsyncpa [#allocation7], 1 }
 0x283   :  { %1932 = vsyncpa [#allocation8], 1 }
 0x284   :  { %1933 = vsyncpa [#allocation9], 1 }

</bundles_post_ra>
